<compile_context>
chip_gen: v7x
topology: tpu7x:2x2x1
jax: 0.10.0
libtpu: 0.0.40
codegen_flags: <defaults>
</compile_context>

<pallas_src>
import functools

import jax
import jax.numpy as jnp
from jax.experimental import pallas as pl
from jax.experimental.pallas import tpu as pltpu


def _aspp_kernel(x_ref, wa_ref, ba_ref, wb_ref, bb_ref, wf_ref, bf_ref, o_ref,
                 *, h_img, w_img, dilations, eps):
    hw = h_img * w_img
    x = x_ref[0]                                     # (dim, HW), f32

    def inorm(y):
        mean = jnp.mean(y, axis=1, keepdims=True)
        cen = y - mean
        var = jnp.mean(cen * cen, axis=1, keepdims=True)
        return cen * (1.0 / jnp.sqrt(var + eps))

    def conv1x1(w, b, inp):
        return jnp.dot(w, inp, preferred_element_type=jnp.float32) + b

    # Flat spatial index -> (row, col), float-only ops (no vector int div/mod).
    p = jax.lax.broadcasted_iota(jnp.int32, (1, hw), 1).astype(jnp.float32)
    hh = jnp.floor((p + 0.5) * (1.0 / w_img))        # row index h
    ww = p - hh * w_img                              # col index w

    def dilated3x3(di, d, inp):
        cout = wb_ref.shape[1]
        acc = jnp.zeros((cout, hw), jnp.float32)
        for ky in range(3):
            for kx in range(3):
                dy, dx = (ky - 1) * d, (kx - 1) * d
                s = dy * w_img + dx                  # flat source offset
                if s == 0:
                    shifted = inp
                else:
                    # shifted[:, p] = inp[:, p + s] (zero where (h+dy, w+dx) OOB)
                    rolled = pltpu.roll(inp, shift=(-s) % hw, axis=1)
                    mask = ((hh >= -dy) & (hh <= h_img - 1 - dy) &
                            (ww >= -dx) & (ww <= w_img - 1 - dx))
                    shifted = rolled * mask.astype(jnp.float32)
                acc = acc + jnp.dot(wb_ref[di * 9 + ky * 3 + kx], shifted,
                                    preferred_element_type=jnp.float32)
        return acc + bb_ref[di]

    # Branch 1: 1x1 conv -> IN (no activation).
    branch_outs = [inorm(conv1x1(wa_ref[0], ba_ref[0], x))]

    # Branches with dilation 3 / 6 / 9: 1x1 conv -> IN -> ReLU -> dil. 3x3 -> IN.
    for bi, d in enumerate(dilations):
        t = jnp.maximum(inorm(conv1x1(wa_ref[bi + 1], ba_ref[bi + 1], x)), 0.0)
        branch_outs.append(inorm(dilated3x3(bi, d, t)))

    # Fuse 1x1 conv over the channel concat, written as per-branch matmuls.
    out = bf_ref[...]
    for bi, yb in enumerate(branch_outs):
        out = out + jnp.dot(wf_ref[bi], yb, preferred_element_type=jnp.float32)
    o_ref[0] = inorm(out).astype(o_ref.dtype)


def aspp_forward(x, params):
    """x: (B, dim, H, W) f32. Returns (B, 2*dim, H, W)."""
    wa, ba, wb, bb, wf_s, bf = params
    B, C, H, W = x.shape
    HW = H * W
    assert HW % 128 == 0, "lane-dense layout wants H*W to be a multiple of 128"
    dp = wa.shape[1]
    cout = wf_s.shape[1]
    x2 = x.reshape(B, C, HW)

    kernel = functools.partial(_aspp_kernel, h_img=H, w_img=W,
                               dilations=(3, 6, 9), eps=1e-5)

    def _resident(arr):          # full array, same block every grid step
        nd = arr.ndim
        return pl.BlockSpec(arr.shape, lambda b: (0,) * nd)

    flops = B * (4 * 2 * dp * C * HW          # four entry 1x1 convs
                 + 3 * 9 * 2 * dp * dp * HW   # three dilated 3x3 convs (9 taps)
                 + 2 * cout * 4 * dp * HW)    # fuse 1x1 conv
    bytes_accessed = 4 * (x2.size + wa.size + ba.size + wb.size + bb.size
                          + wf_s.size + bf.size + B * cout * HW)

    out = pl.pallas_call(
        kernel,
        out_shape=jax.ShapeDtypeStruct((B, cout, HW), x.dtype),
        grid=(B,),
        in_specs=[pl.BlockSpec((1, C, HW), lambda b: (b, 0, 0)),
                  _resident(wa), _resident(ba), _resident(wb),
                  _resident(bb), _resident(wf_s), _resident(bf)],
        out_specs=pl.BlockSpec((1, cout, HW), lambda b: (b, 0, 0)),
        compiler_params=pltpu.CompilerParams(
            dimension_semantics=("parallel",)),
        cost_estimate=pl.CostEstimate(
            flops=flops,
            transcendentals=B * (7 * dp + cout),
            bytes_accessed=bytes_accessed),
    )(x2, wa, ba, wb, bb, wf_s, bf)
    return out.reshape(B, cout, H, W)


def init_params(key, dim):
    """Deterministic synthetic ASPP parameters (uniform, conv-style scale)."""
    dp = dim // 2
    cout = 2 * dim
    ks = jax.random.split(key, 6)

    def u(k, shape, fan_in):
        bound = 1.0 / (fan_in ** 0.5)
        return jax.random.uniform(k, shape, jnp.float32, -bound, bound)

    wa = u(ks[0], (4, dp, dim), dim)        # conv1 + three branch-entry 1x1 convs
    ba = u(ks[1], (4, dp, 1), dim)
    wb = u(ks[2], (27, dp, dp), 9 * dp)     # 3 dilations x 9 taps, each (Cout, Cin)
    bb = u(ks[3], (3, dp, 1), 9 * dp)
    wf = u(ks[4], (4, cout, dp), 4 * dp)    # fuse weight, pre-split per branch
    bf = u(ks[5], (cout, 1), 4 * dp)
    return wa, ba, wb, bb, wf, bf


def aspp_reference(x, params, dilations=(3, 6, 9), eps=1e-5):
    """Pure-JAX reference of the same ASPP forward pass (norm='in')."""
    wa, ba, wb, bb, wf_s, bf = params
    dp = wa.shape[1]

    def conv(inp, w_oihw, bias, dilation=1, padding=0):
        dn = jax.lax.conv_dimension_numbers(inp.shape, w_oihw.shape,
                                            ('NCHW', 'OIHW', 'NCHW'))
        y = jax.lax.conv_general_dilated(
            inp, w_oihw, window_strides=(1, 1),
            padding=[(padding, padding), (padding, padding)],
            rhs_dilation=(dilation, dilation), dimension_numbers=dn,
            precision=jax.lax.Precision.HIGHEST)
        return y + bias.reshape(1, -1, 1, 1)

    def inorm(y):
        m = y.mean(axis=(2, 3), keepdims=True)
        v = ((y - m) ** 2).mean(axis=(2, 3), keepdims=True)
        return (y - m) / jnp.sqrt(v + eps)

    def as1x1(w2d):
        return w2d[:, :, None, None]

    branches = [inorm(conv(x, as1x1(wa[0]), ba[0]))]
    for i, d in enumerate(dilations):
        t = jax.nn.relu(inorm(conv(x, as1x1(wa[i + 1]), ba[i + 1])))
        w3 = wb[i * 9:(i + 1) * 9].reshape(3, 3, dp, dp).transpose(2, 3, 0, 1)
        branches.append(inorm(conv(t, w3, bb[i], dilation=d, padding=d)))
    cat = jnp.concatenate(branches, axis=1)
    wf_full = jnp.concatenate([wf_s[i] for i in range(wf_s.shape[0])], axis=1)
    return inorm(conv(cat, as1x1(wf_full), bf))


if __name__ == "__main__":
    key = jax.random.PRNGKey(0)
    kx, kp = jax.random.split(key)

    # ASPP(dim=8, norm='in', activation='relu'): dim_part=4, output channels=16.
    B, dim, H, W = 2, 8, 16, 16
    x = jax.random.normal(kx, (B, dim, H, W), jnp.float32)
    params = init_params(kp, dim)

    out = jax.block_until_ready(aspp_forward(x, params))
    ref = aspp_reference(x, params)

    assert out.shape == (B, 2 * dim, H, W), out.shape
    max_err = float(jnp.max(jnp.abs(out - ref)))
    assert jnp.allclose(out, ref, atol=1e-3, rtol=1e-3), (
        f"mismatch vs reference, max_err={max_err}")

    print("KERNEL_OK")
</pallas_src>

<mosaic_0001>
module attributes {stable_mosaic.version = 11 : i64} {
  func.func @_aspp_kernel(%arg0: i32, %arg1: memref<1x8x256xf32, #tpu.memory_space<vmem>>, %arg2: memref<4x4x8xf32, #tpu.memory_space<vmem>>, %arg3: memref<4x4x1xf32, #tpu.memory_space<vmem>>, %arg4: memref<27x4x4xf32, #tpu.memory_space<vmem>>, %arg5: memref<3x4x1xf32, #tpu.memory_space<vmem>>, %arg6: memref<4x16x4xf32, #tpu.memory_space<vmem>>, %arg7: memref<16x1xf32, #tpu.memory_space<vmem>>, %arg8: memref<1x16x256xf32, #tpu.memory_space<vmem>>) attributes {dimension_semantics = [#tpu.dimension_semantics<parallel>], iteration_bounds = array<i64: 2>, scalar_prefetch = 0 : i64, scratch_operands = 0 : i64, tpu.core_type = #tpu.core_type<tc>, window_params = [{transform_indices = @transform_0, window_bounds = array<i64: 1, 8, 256>}, {pipeline_mode = #tpu.pipeline_mode<synchronous>, transform_indices = @transform_1, window_bounds = array<i64: 4, 4, 8>}, {pipeline_mode = #tpu.pipeline_mode<synchronous>, transform_indices = @transform_2, window_bounds = array<i64: 4, 4, 1>}, {pipeline_mode = #tpu.pipeline_mode<synchronous>, transform_indices = @transform_3, window_bounds = array<i64: 27, 4, 4>}, {pipeline_mode = #tpu.pipeline_mode<synchronous>, transform_indices = @transform_4, window_bounds = array<i64: 3, 4, 1>}, {pipeline_mode = #tpu.pipeline_mode<synchronous>, transform_indices = @transform_5, window_bounds = array<i64: 4, 16, 4>}, {pipeline_mode = #tpu.pipeline_mode<synchronous>, transform_indices = @transform_6, window_bounds = array<i64: 16, 1>}, {transform_indices = @transform_7, window_bounds = array<i64: 1, 16, 256>}]} {
    %c0 = arith.constant 0 : index
    %c0_0 = arith.constant 0 : index
    %c0_1 = arith.constant 0 : index
    %0 = vector.load %arg1[%c0, %c0_0, %c0_1] : memref<1x8x256xf32, #tpu.memory_space<vmem>>, vector<1x8x256xf32>
    %1 = vector.shape_cast %0 : vector<1x8x256xf32> to vector<8x256xf32>
    %2 = tpu.iota {dimensions = array<i32: 1>} : vector<1x256xi32>
    %3 = arith.sitofp %2 : vector<1x256xi32> to vector<1x256xf32>
    %cst = arith.constant 5.000000e-01 : f32
    %4 = vector.broadcast %cst : f32 to vector<1x256xf32>
    %5 = arith.addf %3, %4 : vector<1x256xf32>
    %cst_2 = arith.constant 6.250000e-02 : f32
    %6 = vector.broadcast %cst_2 : f32 to vector<1x256xf32>
    %7 = arith.mulf %5, %6 : vector<1x256xf32>
    %8 = math.floor %7 : vector<1x256xf32>
    %cst_3 = arith.constant 1.600000e+01 : f32
    %9 = vector.broadcast %cst_3 : f32 to vector<1x256xf32>
    %10 = arith.mulf %8, %9 : vector<1x256xf32>
    %11 = arith.subf %3, %10 : vector<1x256xf32>
    %c0_4 = arith.constant 0 : index
    %c0_5 = arith.constant 0 : index
    %c0_6 = arith.constant 0 : index
    %12 = vector.load %arg2[%c0_4, %c0_5, %c0_6] : memref<4x4x8xf32, #tpu.memory_space<vmem>>, vector<1x4x8xf32>
    %13 = vector.shape_cast %12 : vector<1x4x8xf32> to vector<4x8xf32>
    %c0_7 = arith.constant 0 : index
    %c0_8 = arith.constant 0 : index
    %c0_9 = arith.constant 0 : index
    %14 = vector.load %arg3[%c0_7, %c0_8, %c0_9] : memref<4x4x1xf32, #tpu.memory_space<vmem>>, vector<1x4x1xf32>
    %15 = vector.shape_cast %14 : vector<1x4x1xf32> to vector<4x1xf32>
    %cst_10 = arith.constant dense<0.000000e+00> : vector<4x256xf32>
    %16 = tpu.matmul %13, %1, %cst_10 {dimension_numbers = #tpu.dot_dimension_numbers<[1], [0], [0], [1], [0, 0, 1, 1], [], []>} : vector<4x8xf32>, vector<8x256xf32>, vector<4x256xf32> -> vector<4x256xf32>
    %17 = vector.broadcast %15 : vector<4x1xf32> to vector<4x256xf32>
    %18 = arith.addf %16, %17 : vector<4x256xf32>
    %cst_11 = arith.constant dense<0.000000e+00> : vector<4xf32>
    %19 = vector.multi_reduction <add>, %18, %cst_11 [1] : vector<4x256xf32> to vector<4xf32>
    %20 = vector.shape_cast %19 : vector<4xf32> to vector<4x1xf32>
    %cst_12 = arith.constant 2.560000e+02 : f32
    %21 = vector.broadcast %cst_12 : f32 to vector<4x1xf32>
    %22 = arith.divf %20, %21 : vector<4x1xf32>
    %23 = vector.broadcast %22 : vector<4x1xf32> to vector<4x256xf32>
    %24 = arith.subf %18, %23 : vector<4x256xf32>
    %25 = arith.mulf %24, %24 : vector<4x256xf32>
    %cst_13 = arith.constant dense<0.000000e+00> : vector<4xf32>
    %26 = vector.multi_reduction <add>, %25, %cst_13 [1] : vector<4x256xf32> to vector<4xf32>
    %27 = vector.shape_cast %26 : vector<4xf32> to vector<4x1xf32>
    %cst_14 = arith.constant 2.560000e+02 : f32
    %28 = vector.broadcast %cst_14 : f32 to vector<4x1xf32>
    %29 = arith.divf %27, %28 : vector<4x1xf32>
    %cst_15 = arith.constant 9.99999974E-6 : f32
    %30 = vector.broadcast %cst_15 : f32 to vector<4x1xf32>
    %31 = arith.addf %29, %30 : vector<4x1xf32>
    %32 = math.sqrt %31 : vector<4x1xf32>
    %cst_16 = arith.constant 1.000000e+00 : f32
    %33 = vector.broadcast %cst_16 : f32 to vector<4x1xf32>
    %34 = arith.divf %33, %32 : vector<4x1xf32>
    %35 = vector.broadcast %34 : vector<4x1xf32> to vector<4x256xf32>
    %36 = arith.mulf %24, %35 : vector<4x256xf32>
    %c1 = arith.constant 1 : index
    %c0_17 = arith.constant 0 : index
    %c0_18 = arith.constant 0 : index
    %37 = vector.load %arg2[%c1, %c0_17, %c0_18] : memref<4x4x8xf32, #tpu.memory_space<vmem>>, vector<1x4x8xf32>
    %38 = vector.shape_cast %37 : vector<1x4x8xf32> to vector<4x8xf32>
    %c1_19 = arith.constant 1 : index
    %c0_20 = arith.constant 0 : index
    %c0_21 = arith.constant 0 : index
    %39 = vector.load %arg3[%c1_19, %c0_20, %c0_21] : memref<4x4x1xf32, #tpu.memory_space<vmem>>, vector<1x4x1xf32>
    %40 = vector.shape_cast %39 : vector<1x4x1xf32> to vector<4x1xf32>
    %cst_22 = arith.constant dense<0.000000e+00> : vector<4x256xf32>
    %41 = tpu.matmul %38, %1, %cst_22 {dimension_numbers = #tpu.dot_dimension_numbers<[1], [0], [0], [1], [0, 0, 1, 1], [], []>} : vector<4x8xf32>, vector<8x256xf32>, vector<4x256xf32> -> vector<4x256xf32>
    %42 = vector.broadcast %40 : vector<4x1xf32> to vector<4x256xf32>
    %43 = arith.addf %41, %42 : vector<4x256xf32>
    %cst_23 = arith.constant dense<0.000000e+00> : vector<4xf32>
    %44 = vector.multi_reduction <add>, %43, %cst_23 [1] : vector<4x256xf32> to vector<4xf32>
    %45 = vector.shape_cast %44 : vector<4xf32> to vector<4x1xf32>
    %cst_24 = arith.constant 2.560000e+02 : f32
    %46 = vector.broadcast %cst_24 : f32 to vector<4x1xf32>
    %47 = arith.divf %45, %46 : vector<4x1xf32>
    %48 = vector.broadcast %47 : vector<4x1xf32> to vector<4x256xf32>
    %49 = arith.subf %43, %48 : vector<4x256xf32>
    %50 = arith.mulf %49, %49 : vector<4x256xf32>
    %cst_25 = arith.constant dense<0.000000e+00> : vector<4xf32>
    %51 = vector.multi_reduction <add>, %50, %cst_25 [1] : vector<4x256xf32> to vector<4xf32>
    %52 = vector.shape_cast %51 : vector<4xf32> to vector<4x1xf32>
    %cst_26 = arith.constant 2.560000e+02 : f32
    %53 = vector.broadcast %cst_26 : f32 to vector<4x1xf32>
    %54 = arith.divf %52, %53 : vector<4x1xf32>
    %cst_27 = arith.constant 9.99999974E-6 : f32
    %55 = vector.broadcast %cst_27 : f32 to vector<4x1xf32>
    %56 = arith.addf %54, %55 : vector<4x1xf32>
    %57 = math.sqrt %56 : vector<4x1xf32>
    %cst_28 = arith.constant 1.000000e+00 : f32
    %58 = vector.broadcast %cst_28 : f32 to vector<4x1xf32>
    %59 = arith.divf %58, %57 : vector<4x1xf32>
    %60 = vector.broadcast %59 : vector<4x1xf32> to vector<4x256xf32>
    %61 = arith.mulf %49, %60 : vector<4x256xf32>
    %cst_29 = arith.constant 0.000000e+00 : f32
    %62 = vector.broadcast %cst_29 : f32 to vector<4x256xf32>
    %63 = arith.maximumf %61, %62 : vector<4x256xf32>
    %cst_30 = arith.constant 0.000000e+00 : f32
    %64 = vector.broadcast %cst_30 : f32 to vector<4x256xf32>
    %c51_i32 = arith.constant 51 : i32
    %65 = tpu.dynamic_rotate %63 by %c51_i32 dim 1 : vector<4x256xf32>, i32 -> vector<4x256xf32>
    %cst_31 = arith.constant 3.000000e+00 : f32
    %66 = vector.broadcast %cst_31 : f32 to vector<1x256xf32>
    %67 = arith.cmpf oge, %8, %66 : vector<1x256xf32>
    %cst_32 = arith.constant 1.800000e+01 : f32
    %68 = vector.broadcast %cst_32 : f32 to vector<1x256xf32>
    %69 = arith.cmpf ole, %8, %68 : vector<1x256xf32>
    %70 = arith.andi %67, %69 : vector<1x256xi1>
    %cst_33 = arith.constant 3.000000e+00 : f32
    %71 = vector.broadcast %cst_33 : f32 to vector<1x256xf32>
    %72 = arith.cmpf oge, %11, %71 : vector<1x256xf32>
    %73 = arith.andi %70, %72 : vector<1x256xi1>
    %cst_34 = arith.constant 1.800000e+01 : f32
    %74 = vector.broadcast %cst_34 : f32 to vector<1x256xf32>
    %75 = arith.cmpf ole, %11, %74 : vector<1x256xf32>
    %76 = arith.andi %73, %75 : vector<1x256xi1>
    %77 = arith.extui %76 : vector<1x256xi1> to vector<1x256xi32>
    %78 = arith.sitofp %77 : vector<1x256xi32> to vector<1x256xf32>
    %79 = vector.broadcast %78 : vector<1x256xf32> to vector<4x256xf32>
    %80 = arith.mulf %65, %79 : vector<4x256xf32>
    %c0_35 = arith.constant 0 : index
    %c0_36 = arith.constant 0 : index
    %c0_37 = arith.constant 0 : index
    %81 = vector.load %arg4[%c0_35, %c0_36, %c0_37] : memref<27x4x4xf32, #tpu.memory_space<vmem>>, vector<1x4x4xf32>
    %82 = vector.shape_cast %81 : vector<1x4x4xf32> to vector<4x4xf32>
    %cst_38 = arith.constant dense<0.000000e+00> : vector<4x256xf32>
    %83 = tpu.matmul %82, %80, %cst_38 {dimension_numbers = #tpu.dot_dimension_numbers<[1], [0], [0], [1], [0, 0, 1, 1], [], []>} : vector<4x4xf32>, vector<4x256xf32>, vector<4x256xf32> -> vector<4x256xf32>
    %84 = arith.addf %64, %83 : vector<4x256xf32>
    %c48_i32 = arith.constant 48 : i32
    %85 = tpu.dynamic_rotate %63 by %c48_i32 dim 1 : vector<4x256xf32>, i32 -> vector<4x256xf32>
    %cst_39 = arith.constant 3.000000e+00 : f32
    %86 = vector.broadcast %cst_39 : f32 to vector<1x256xf32>
    %87 = arith.cmpf oge, %8, %86 : vector<1x256xf32>
    %cst_40 = arith.constant 1.800000e+01 : f32
    %88 = vector.broadcast %cst_40 : f32 to vector<1x256xf32>
    %89 = arith.cmpf ole, %8, %88 : vector<1x256xf32>
    %90 = arith.andi %87, %89 : vector<1x256xi1>
    %cst_41 = arith.constant 0.000000e+00 : f32
    %91 = vector.broadcast %cst_41 : f32 to vector<1x256xf32>
    %92 = arith.cmpf oge, %11, %91 : vector<1x256xf32>
    %93 = arith.andi %90, %92 : vector<1x256xi1>
    %cst_42 = arith.constant 1.500000e+01 : f32
    %94 = vector.broadcast %cst_42 : f32 to vector<1x256xf32>
    %95 = arith.cmpf ole, %11, %94 : vector<1x256xf32>
    %96 = arith.andi %93, %95 : vector<1x256xi1>
    %97 = arith.extui %96 : vector<1x256xi1> to vector<1x256xi32>
    %98 = arith.sitofp %97 : vector<1x256xi32> to vector<1x256xf32>
    %99 = vector.broadcast %98 : vector<1x256xf32> to vector<4x256xf32>
    %100 = arith.mulf %85, %99 : vector<4x256xf32>
    %c1_43 = arith.constant 1 : index
    %c0_44 = arith.constant 0 : index
    %c0_45 = arith.constant 0 : index
    %101 = vector.load %arg4[%c1_43, %c0_44, %c0_45] : memref<27x4x4xf32, #tpu.memory_space<vmem>>, vector<1x4x4xf32>
    %102 = vector.shape_cast %101 : vector<1x4x4xf32> to vector<4x4xf32>
    %cst_46 = arith.constant dense<0.000000e+00> : vector<4x256xf32>
    %103 = tpu.matmul %102, %100, %cst_46 {dimension_numbers = #tpu.dot_dimension_numbers<[1], [0], [0], [1], [0, 0, 1, 1], [], []>} : vector<4x4xf32>, vector<4x256xf32>, vector<4x256xf32> -> vector<4x256xf32>
    %104 = arith.addf %84, %103 : vector<4x256xf32>
    %c45_i32 = arith.constant 45 : i32
    %105 = tpu.dynamic_rotate %63 by %c45_i32 dim 1 : vector<4x256xf32>, i32 -> vector<4x256xf32>
    %cst_47 = arith.constant 3.000000e+00 : f32
    %106 = vector.broadcast %cst_47 : f32 to vector<1x256xf32>
    %107 = arith.cmpf oge, %8, %106 : vector<1x256xf32>
    %cst_48 = arith.constant 1.800000e+01 : f32
    %108 = vector.broadcast %cst_48 : f32 to vector<1x256xf32>
    %109 = arith.cmpf ole, %8, %108 : vector<1x256xf32>
    %110 = arith.andi %107, %109 : vector<1x256xi1>
    %cst_49 = arith.constant -3.000000e+00 : f32
    %111 = vector.broadcast %cst_49 : f32 to vector<1x256xf32>
    %112 = arith.cmpf oge, %11, %111 : vector<1x256xf32>
    %113 = arith.andi %110, %112 : vector<1x256xi1>
    %cst_50 = arith.constant 1.200000e+01 : f32
    %114 = vector.broadcast %cst_50 : f32 to vector<1x256xf32>
    %115 = arith.cmpf ole, %11, %114 : vector<1x256xf32>
    %116 = arith.andi %113, %115 : vector<1x256xi1>
    %117 = arith.extui %116 : vector<1x256xi1> to vector<1x256xi32>
    %118 = arith.sitofp %117 : vector<1x256xi32> to vector<1x256xf32>
    %119 = vector.broadcast %118 : vector<1x256xf32> to vector<4x256xf32>
    %120 = arith.mulf %105, %119 : vector<4x256xf32>
    %c2 = arith.constant 2 : index
    %c0_51 = arith.constant 0 : index
    %c0_52 = arith.constant 0 : index
    %121 = vector.load %arg4[%c2, %c0_51, %c0_52] : memref<27x4x4xf32, #tpu.memory_space<vmem>>, vector<1x4x4xf32>
    %122 = vector.shape_cast %121 : vector<1x4x4xf32> to vector<4x4xf32>
    %cst_53 = arith.constant dense<0.000000e+00> : vector<4x256xf32>
    %123 = tpu.matmul %122, %120, %cst_53 {dimension_numbers = #tpu.dot_dimension_numbers<[1], [0], [0], [1], [0, 0, 1, 1], [], []>} : vector<4x4xf32>, vector<4x256xf32>, vector<4x256xf32> -> vector<4x256xf32>
    %124 = arith.addf %104, %123 : vector<4x256xf32>
    %c3_i32 = arith.constant 3 : i32
    %125 = tpu.dynamic_rotate %63 by %c3_i32 dim 1 : vector<4x256xf32>, i32 -> vector<4x256xf32>
    %cst_54 = arith.constant 0.000000e+00 : f32
    %126 = vector.broadcast %cst_54 : f32 to vector<1x256xf32>
    %127 = arith.cmpf oge, %8, %126 : vector<1x256xf32>
    %cst_55 = arith.constant 1.500000e+01 : f32
    %128 = vector.broadcast %cst_55 : f32 to vector<1x256xf32>
    %129 = arith.cmpf ole, %8, %128 : vector<1x256xf32>
    %130 = arith.andi %127, %129 : vector<1x256xi1>
    %cst_56 = arith.constant 3.000000e+00 : f32
    %131 = vector.broadcast %cst_56 : f32 to vector<1x256xf32>
    %132 = arith.cmpf oge, %11, %131 : vector<1x256xf32>
    %133 = arith.andi %130, %132 : vector<1x256xi1>
    %cst_57 = arith.constant 1.800000e+01 : f32
    %134 = vector.broadcast %cst_57 : f32 to vector<1x256xf32>
    %135 = arith.cmpf ole, %11, %134 : vector<1x256xf32>
    %136 = arith.andi %133, %135 : vector<1x256xi1>
    %137 = arith.extui %136 : vector<1x256xi1> to vector<1x256xi32>
    %138 = arith.sitofp %137 : vector<1x256xi32> to vector<1x256xf32>
    %139 = vector.broadcast %138 : vector<1x256xf32> to vector<4x256xf32>
    %140 = arith.mulf %125, %139 : vector<4x256xf32>
    %c3 = arith.constant 3 : index
    %c0_58 = arith.constant 0 : index
    %c0_59 = arith.constant 0 : index
    %141 = vector.load %arg4[%c3, %c0_58, %c0_59] : memref<27x4x4xf32, #tpu.memory_space<vmem>>, vector<1x4x4xf32>
    %142 = vector.shape_cast %141 : vector<1x4x4xf32> to vector<4x4xf32>
    %cst_60 = arith.constant dense<0.000000e+00> : vector<4x256xf32>
    %143 = tpu.matmul %142, %140, %cst_60 {dimension_numbers = #tpu.dot_dimension_numbers<[1], [0], [0], [1], [0, 0, 1, 1], [], []>} : vector<4x4xf32>, vector<4x256xf32>, vector<4x256xf32> -> vector<4x256xf32>
    %144 = arith.addf %124, %143 : vector<4x256xf32>
    %c4 = arith.constant 4 : index
    %c0_61 = arith.constant 0 : index
    %c0_62 = arith.constant 0 : index
    %145 = vector.load %arg4[%c4, %c0_61, %c0_62] : memref<27x4x4xf32, #tpu.memory_space<vmem>>, vector<1x4x4xf32>
    %146 = vector.shape_cast %145 : vector<1x4x4xf32> to vector<4x4xf32>
    %cst_63 = arith.constant dense<0.000000e+00> : vector<4x256xf32>
    %147 = tpu.matmul %146, %63, %cst_63 {dimension_numbers = #tpu.dot_dimension_numbers<[1], [0], [0], [1], [0, 0, 1, 1], [], []>} : vector<4x4xf32>, vector<4x256xf32>, vector<4x256xf32> -> vector<4x256xf32>
    %148 = arith.addf %144, %147 : vector<4x256xf32>
    %c253_i32 = arith.constant 253 : i32
    %149 = tpu.dynamic_rotate %63 by %c253_i32 dim 1 : vector<4x256xf32>, i32 -> vector<4x256xf32>
    %cst_64 = arith.constant 0.000000e+00 : f32
    %150 = vector.broadcast %cst_64 : f32 to vector<1x256xf32>
    %151 = arith.cmpf oge, %8, %150 : vector<1x256xf32>
    %cst_65 = arith.constant 1.500000e+01 : f32
    %152 = vector.broadcast %cst_65 : f32 to vector<1x256xf32>
    %153 = arith.cmpf ole, %8, %152 : vector<1x256xf32>
    %154 = arith.andi %151, %153 : vector<1x256xi1>
    %cst_66 = arith.constant -3.000000e+00 : f32
    %155 = vector.broadcast %cst_66 : f32 to vector<1x256xf32>
    %156 = arith.cmpf oge, %11, %155 : vector<1x256xf32>
    %157 = arith.andi %154, %156 : vector<1x256xi1>
    %cst_67 = arith.constant 1.200000e+01 : f32
    %158 = vector.broadcast %cst_67 : f32 to vector<1x256xf32>
    %159 = arith.cmpf ole, %11, %158 : vector<1x256xf32>
    %160 = arith.andi %157, %159 : vector<1x256xi1>
    %161 = arith.extui %160 : vector<1x256xi1> to vector<1x256xi32>
    %162 = arith.sitofp %161 : vector<1x256xi32> to vector<1x256xf32>
    %163 = vector.broadcast %162 : vector<1x256xf32> to vector<4x256xf32>
    %164 = arith.mulf %149, %163 : vector<4x256xf32>
    %c5 = arith.constant 5 : index
    %c0_68 = arith.constant 0 : index
    %c0_69 = arith.constant 0 : index
    %165 = vector.load %arg4[%c5, %c0_68, %c0_69] : memref<27x4x4xf32, #tpu.memory_space<vmem>>, vector<1x4x4xf32>
    %166 = vector.shape_cast %165 : vector<1x4x4xf32> to vector<4x4xf32>
    %cst_70 = arith.constant dense<0.000000e+00> : vector<4x256xf32>
    %167 = tpu.matmul %166, %164, %cst_70 {dimension_numbers = #tpu.dot_dimension_numbers<[1], [0], [0], [1], [0, 0, 1, 1], [], []>} : vector<4x4xf32>, vector<4x256xf32>, vector<4x256xf32> -> vector<4x256xf32>
    %168 = arith.addf %148, %167 : vector<4x256xf32>
    %c211_i32 = arith.constant 211 : i32
    %169 = tpu.dynamic_rotate %63 by %c211_i32 dim 1 : vector<4x256xf32>, i32 -> vector<4x256xf32>
    %cst_71 = arith.constant -3.000000e+00 : f32
    %170 = vector.broadcast %cst_71 : f32 to vector<1x256xf32>
    %171 = arith.cmpf oge, %8, %170 : vector<1x256xf32>
    %cst_72 = arith.constant 1.200000e+01 : f32
    %172 = vector.broadcast %cst_72 : f32 to vector<1x256xf32>
    %173 = arith.cmpf ole, %8, %172 : vector<1x256xf32>
    %174 = arith.andi %171, %173 : vector<1x256xi1>
    %cst_73 = arith.constant 3.000000e+00 : f32
    %175 = vector.broadcast %cst_73 : f32 to vector<1x256xf32>
    %176 = arith.cmpf oge, %11, %175 : vector<1x256xf32>
    %177 = arith.andi %174, %176 : vector<1x256xi1>
    %cst_74 = arith.constant 1.800000e+01 : f32
    %178 = vector.broadcast %cst_74 : f32 to vector<1x256xf32>
    %179 = arith.cmpf ole, %11, %178 : vector<1x256xf32>
    %180 = arith.andi %177, %179 : vector<1x256xi1>
    %181 = arith.extui %180 : vector<1x256xi1> to vector<1x256xi32>
    %182 = arith.sitofp %181 : vector<1x256xi32> to vector<1x256xf32>
    %183 = vector.broadcast %182 : vector<1x256xf32> to vector<4x256xf32>
    %184 = arith.mulf %169, %183 : vector<4x256xf32>
    %c6 = arith.constant 6 : index
    %c0_75 = arith.constant 0 : index
    %c0_76 = arith.constant 0 : index
    %185 = vector.load %arg4[%c6, %c0_75, %c0_76] : memref<27x4x4xf32, #tpu.memory_space<vmem>>, vector<1x4x4xf32>
    %186 = vector.shape_cast %185 : vector<1x4x4xf32> to vector<4x4xf32>
    %cst_77 = arith.constant dense<0.000000e+00> : vector<4x256xf32>
    %187 = tpu.matmul %186, %184, %cst_77 {dimension_numbers = #tpu.dot_dimension_numbers<[1], [0], [0], [1], [0, 0, 1, 1], [], []>} : vector<4x4xf32>, vector<4x256xf32>, vector<4x256xf32> -> vector<4x256xf32>
    %188 = arith.addf %168, %187 : vector<4x256xf32>
    %c208_i32 = arith.constant 208 : i32
    %189 = tpu.dynamic_rotate %63 by %c208_i32 dim 1 : vector<4x256xf32>, i32 -> vector<4x256xf32>
    %cst_78 = arith.constant -3.000000e+00 : f32
    %190 = vector.broadcast %cst_78 : f32 to vector<1x256xf32>
    %191 = arith.cmpf oge, %8, %190 : vector<1x256xf32>
    %cst_79 = arith.constant 1.200000e+01 : f32
    %192 = vector.broadcast %cst_79 : f32 to vector<1x256xf32>
    %193 = arith.cmpf ole, %8, %192 : vector<1x256xf32>
    %194 = arith.andi %191, %193 : vector<1x256xi1>
    %cst_80 = arith.constant 0.000000e+00 : f32
    %195 = vector.broadcast %cst_80 : f32 to vector<1x256xf32>
    %196 = arith.cmpf oge, %11, %195 : vector<1x256xf32>
    %197 = arith.andi %194, %196 : vector<1x256xi1>
    %cst_81 = arith.constant 1.500000e+01 : f32
    %198 = vector.broadcast %cst_81 : f32 to vector<1x256xf32>
    %199 = arith.cmpf ole, %11, %198 : vector<1x256xf32>
    %200 = arith.andi %197, %199 : vector<1x256xi1>
    %201 = arith.extui %200 : vector<1x256xi1> to vector<1x256xi32>
    %202 = arith.sitofp %201 : vector<1x256xi32> to vector<1x256xf32>
    %203 = vector.broadcast %202 : vector<1x256xf32> to vector<4x256xf32>
    %204 = arith.mulf %189, %203 : vector<4x256xf32>
    %c7 = arith.constant 7 : index
    %c0_82 = arith.constant 0 : index
    %c0_83 = arith.constant 0 : index
    %205 = vector.load %arg4[%c7, %c0_82, %c0_83] : memref<27x4x4xf32, #tpu.memory_space<vmem>>, vector<1x4x4xf32>
    %206 = vector.shape_cast %205 : vector<1x4x4xf32> to vector<4x4xf32>
    %cst_84 = arith.constant dense<0.000000e+00> : vector<4x256xf32>
    %207 = tpu.matmul %206, %204, %cst_84 {dimension_numbers = #tpu.dot_dimension_numbers<[1], [0], [0], [1], [0, 0, 1, 1], [], []>} : vector<4x4xf32>, vector<4x256xf32>, vector<4x256xf32> -> vector<4x256xf32>
    %208 = arith.addf %188, %207 : vector<4x256xf32>
    %c205_i32 = arith.constant 205 : i32
    %209 = tpu.dynamic_rotate %63 by %c205_i32 dim 1 : vector<4x256xf32>, i32 -> vector<4x256xf32>
    %cst_85 = arith.constant -3.000000e+00 : f32
    %210 = vector.broadcast %cst_85 : f32 to vector<1x256xf32>
    %211 = arith.cmpf oge, %8, %210 : vector<1x256xf32>
    %cst_86 = arith.constant 1.200000e+01 : f32
    %212 = vector.broadcast %cst_86 : f32 to vector<1x256xf32>
    %213 = arith.cmpf ole, %8, %212 : vector<1x256xf32>
    %214 = arith.andi %211, %213 : vector<1x256xi1>
    %cst_87 = arith.constant -3.000000e+00 : f32
    %215 = vector.broadcast %cst_87 : f32 to vector<1x256xf32>
    %216 = arith.cmpf oge, %11, %215 : vector<1x256xf32>
    %217 = arith.andi %214, %216 : vector<1x256xi1>
    %cst_88 = arith.constant 1.200000e+01 : f32
    %218 = vector.broadcast %cst_88 : f32 to vector<1x256xf32>
    %219 = arith.cmpf ole, %11, %218 : vector<1x256xf32>
    %220 = arith.andi %217, %219 : vector<1x256xi1>
    %221 = arith.extui %220 : vector<1x256xi1> to vector<1x256xi32>
    %222 = arith.sitofp %221 : vector<1x256xi32> to vector<1x256xf32>
    %223 = vector.broadcast %222 : vector<1x256xf32> to vector<4x256xf32>
    %224 = arith.mulf %209, %223 : vector<4x256xf32>
    %c8 = arith.constant 8 : index
    %c0_89 = arith.constant 0 : index
    %c0_90 = arith.constant 0 : index
    %225 = vector.load %arg4[%c8, %c0_89, %c0_90] : memref<27x4x4xf32, #tpu.memory_space<vmem>>, vector<1x4x4xf32>
    %226 = vector.shape_cast %225 : vector<1x4x4xf32> to vector<4x4xf32>
    %cst_91 = arith.constant dense<0.000000e+00> : vector<4x256xf32>
    %227 = tpu.matmul %226, %224, %cst_91 {dimension_numbers = #tpu.dot_dimension_numbers<[1], [0], [0], [1], [0, 0, 1, 1], [], []>} : vector<4x4xf32>, vector<4x256xf32>, vector<4x256xf32> -> vector<4x256xf32>
    %228 = arith.addf %208, %227 : vector<4x256xf32>
    %c0_92 = arith.constant 0 : index
    %c0_93 = arith.constant 0 : index
    %c0_94 = arith.constant 0 : index
    %229 = vector.load %arg5[%c0_92, %c0_93, %c0_94] : memref<3x4x1xf32, #tpu.memory_space<vmem>>, vector<1x4x1xf32>
    %230 = vector.shape_cast %229 : vector<1x4x1xf32> to vector<4x1xf32>
    %231 = vector.broadcast %230 : vector<4x1xf32> to vector<4x256xf32>
    %232 = arith.addf %228, %231 : vector<4x256xf32>
    %cst_95 = arith.constant dense<0.000000e+00> : vector<4xf32>
    %233 = vector.multi_reduction <add>, %232, %cst_95 [1] : vector<4x256xf32> to vector<4xf32>
    %234 = vector.shape_cast %233 : vector<4xf32> to vector<4x1xf32>
    %cst_96 = arith.constant 2.560000e+02 : f32
    %235 = vector.broadcast %cst_96 : f32 to vector<4x1xf32>
    %236 = arith.divf %234, %235 : vector<4x1xf32>
    %237 = vector.broadcast %236 : vector<4x1xf32> to vector<4x256xf32>
    %238 = arith.subf %232, %237 : vector<4x256xf32>
    %239 = arith.mulf %238, %238 : vector<4x256xf32>
    %cst_97 = arith.constant dense<0.000000e+00> : vector<4xf32>
    %240 = vector.multi_reduction <add>, %239, %cst_97 [1] : vector<4x256xf32> to vector<4xf32>
    %241 = vector.shape_cast %240 : vector<4xf32> to vector<4x1xf32>
    %cst_98 = arith.constant 2.560000e+02 : f32
    %242 = vector.broadcast %cst_98 : f32 to vector<4x1xf32>
    %243 = arith.divf %241, %242 : vector<4x1xf32>
    %cst_99 = arith.constant 9.99999974E-6 : f32
    %244 = vector.broadcast %cst_99 : f32 to vector<4x1xf32>
    %245 = arith.addf %243, %244 : vector<4x1xf32>
    %246 = math.sqrt %245 : vector<4x1xf32>
    %cst_100 = arith.constant 1.000000e+00 : f32
    %247 = vector.broadcast %cst_100 : f32 to vector<4x1xf32>
    %248 = arith.divf %247, %246 : vector<4x1xf32>
    %249 = vector.broadcast %248 : vector<4x1xf32> to vector<4x256xf32>
    %250 = arith.mulf %238, %249 : vector<4x256xf32>
    %c2_101 = arith.constant 2 : index
    %c0_102 = arith.constant 0 : index
    %c0_103 = arith.constant 0 : index
    %251 = vector.load %arg2[%c2_101, %c0_102, %c0_103] : memref<4x4x8xf32, #tpu.memory_space<vmem>>, vector<1x4x8xf32>
    %252 = vector.shape_cast %251 : vector<1x4x8xf32> to vector<4x8xf32>
    %c2_104 = arith.constant 2 : index
    %c0_105 = arith.constant 0 : index
    %c0_106 = arith.constant 0 : index
    %253 = vector.load %arg3[%c2_104, %c0_105, %c0_106] : memref<4x4x1xf32, #tpu.memory_space<vmem>>, vector<1x4x1xf32>
    %254 = vector.shape_cast %253 : vector<1x4x1xf32> to vector<4x1xf32>
    %cst_107 = arith.constant dense<0.000000e+00> : vector<4x256xf32>
    %255 = tpu.matmul %252, %1, %cst_107 {dimension_numbers = #tpu.dot_dimension_numbers<[1], [0], [0], [1], [0, 0, 1, 1], [], []>} : vector<4x8xf32>, vector<8x256xf32>, vector<4x256xf32> -> vector<4x256xf32>
    %256 = vector.broadcast %254 : vector<4x1xf32> to vector<4x256xf32>
    %257 = arith.addf %255, %256 : vector<4x256xf32>
    %cst_108 = arith.constant dense<0.000000e+00> : vector<4xf32>
    %258 = vector.multi_reduction <add>, %257, %cst_108 [1] : vector<4x256xf32> to vector<4xf32>
    %259 = vector.shape_cast %258 : vector<4xf32> to vector<4x1xf32>
    %cst_109 = arith.constant 2.560000e+02 : f32
    %260 = vector.broadcast %cst_109 : f32 to vector<4x1xf32>
    %261 = arith.divf %259, %260 : vector<4x1xf32>
    %262 = vector.broadcast %261 : vector<4x1xf32> to vector<4x256xf32>
    %263 = arith.subf %257, %262 : vector<4x256xf32>
    %264 = arith.mulf %263, %263 : vector<4x256xf32>
    %cst_110 = arith.constant dense<0.000000e+00> : vector<4xf32>
    %265 = vector.multi_reduction <add>, %264, %cst_110 [1] : vector<4x256xf32> to vector<4xf32>
    %266 = vector.shape_cast %265 : vector<4xf32> to vector<4x1xf32>
    %cst_111 = arith.constant 2.560000e+02 : f32
    %267 = vector.broadcast %cst_111 : f32 to vector<4x1xf32>
    %268 = arith.divf %266, %267 : vector<4x1xf32>
    %cst_112 = arith.constant 9.99999974E-6 : f32
    %269 = vector.broadcast %cst_112 : f32 to vector<4x1xf32>
    %270 = arith.addf %268, %269 : vector<4x1xf32>
    %271 = math.sqrt %270 : vector<4x1xf32>
    %cst_113 = arith.constant 1.000000e+00 : f32
    %272 = vector.broadcast %cst_113 : f32 to vector<4x1xf32>
    %273 = arith.divf %272, %271 : vector<4x1xf32>
    %274 = vector.broadcast %273 : vector<4x1xf32> to vector<4x256xf32>
    %275 = arith.mulf %263, %274 : vector<4x256xf32>
    %cst_114 = arith.constant 0.000000e+00 : f32
    %276 = vector.broadcast %cst_114 : f32 to vector<4x256xf32>
    %277 = arith.maximumf %275, %276 : vector<4x256xf32>
    %cst_115 = arith.constant 0.000000e+00 : f32
    %278 = vector.broadcast %cst_115 : f32 to vector<4x256xf32>
    %c102_i32 = arith.constant 102 : i32
    %279 = tpu.dynamic_rotate %277 by %c102_i32 dim 1 : vector<4x256xf32>, i32 -> vector<4x256xf32>
    %cst_116 = arith.constant 6.000000e+00 : f32
    %280 = vector.broadcast %cst_116 : f32 to vector<1x256xf32>
    %281 = arith.cmpf oge, %8, %280 : vector<1x256xf32>
    %cst_117 = arith.constant 2.100000e+01 : f32
    %282 = vector.broadcast %cst_117 : f32 to vector<1x256xf32>
    %283 = arith.cmpf ole, %8, %282 : vector<1x256xf32>
    %284 = arith.andi %281, %283 : vector<1x256xi1>
    %cst_118 = arith.constant 6.000000e+00 : f32
    %285 = vector.broadcast %cst_118 : f32 to vector<1x256xf32>
    %286 = arith.cmpf oge, %11, %285 : vector<1x256xf32>
    %287 = arith.andi %284, %286 : vector<1x256xi1>
    %cst_119 = arith.constant 2.100000e+01 : f32
    %288 = vector.broadcast %cst_119 : f32 to vector<1x256xf32>
    %289 = arith.cmpf ole, %11, %288 : vector<1x256xf32>
    %290 = arith.andi %287, %289 : vector<1x256xi1>
    %291 = arith.extui %290 : vector<1x256xi1> to vector<1x256xi32>
    %292 = arith.sitofp %291 : vector<1x256xi32> to vector<1x256xf32>
    %293 = vector.broadcast %292 : vector<1x256xf32> to vector<4x256xf32>
    %294 = arith.mulf %279, %293 : vector<4x256xf32>
    %c9 = arith.constant 9 : index
    %c0_120 = arith.constant 0 : index
    %c0_121 = arith.constant 0 : index
    %295 = vector.load %arg4[%c9, %c0_120, %c0_121] : memref<27x4x4xf32, #tpu.memory_space<vmem>>, vector<1x4x4xf32>
    %296 = vector.shape_cast %295 : vector<1x4x4xf32> to vector<4x4xf32>
    %cst_122 = arith.constant dense<0.000000e+00> : vector<4x256xf32>
    %297 = tpu.matmul %296, %294, %cst_122 {dimension_numbers = #tpu.dot_dimension_numbers<[1], [0], [0], [1], [0, 0, 1, 1], [], []>} : vector<4x4xf32>, vector<4x256xf32>, vector<4x256xf32> -> vector<4x256xf32>
    %298 = arith.addf %278, %297 : vector<4x256xf32>
    %c96_i32 = arith.constant 96 : i32
    %299 = tpu.dynamic_rotate %277 by %c96_i32 dim 1 : vector<4x256xf32>, i32 -> vector<4x256xf32>
    %cst_123 = arith.constant 6.000000e+00 : f32
    %300 = vector.broadcast %cst_123 : f32 to vector<1x256xf32>
    %301 = arith.cmpf oge, %8, %300 : vector<1x256xf32>
    %cst_124 = arith.constant 2.100000e+01 : f32
    %302 = vector.broadcast %cst_124 : f32 to vector<1x256xf32>
    %303 = arith.cmpf ole, %8, %302 : vector<1x256xf32>
    %304 = arith.andi %301, %303 : vector<1x256xi1>
    %cst_125 = arith.constant 0.000000e+00 : f32
    %305 = vector.broadcast %cst_125 : f32 to vector<1x256xf32>
    %306 = arith.cmpf oge, %11, %305 : vector<1x256xf32>
    %307 = arith.andi %304, %306 : vector<1x256xi1>
    %cst_126 = arith.constant 1.500000e+01 : f32
    %308 = vector.broadcast %cst_126 : f32 to vector<1x256xf32>
    %309 = arith.cmpf ole, %11, %308 : vector<1x256xf32>
    %310 = arith.andi %307, %309 : vector<1x256xi1>
    %311 = arith.extui %310 : vector<1x256xi1> to vector<1x256xi32>
    %312 = arith.sitofp %311 : vector<1x256xi32> to vector<1x256xf32>
    %313 = vector.broadcast %312 : vector<1x256xf32> to vector<4x256xf32>
    %314 = arith.mulf %299, %313 : vector<4x256xf32>
    %c10 = arith.constant 10 : index
    %c0_127 = arith.constant 0 : index
    %c0_128 = arith.constant 0 : index
    %315 = vector.load %arg4[%c10, %c0_127, %c0_128] : memref<27x4x4xf32, #tpu.memory_space<vmem>>, vector<1x4x4xf32>
    %316 = vector.shape_cast %315 : vector<1x4x4xf32> to vector<4x4xf32>
    %cst_129 = arith.constant dense<0.000000e+00> : vector<4x256xf32>
    %317 = tpu.matmul %316, %314, %cst_129 {dimension_numbers = #tpu.dot_dimension_numbers<[1], [0], [0], [1], [0, 0, 1, 1], [], []>} : vector<4x4xf32>, vector<4x256xf32>, vector<4x256xf32> -> vector<4x256xf32>
    %318 = arith.addf %298, %317 : vector<4x256xf32>
    %c90_i32 = arith.constant 90 : i32
    %319 = tpu.dynamic_rotate %277 by %c90_i32 dim 1 : vector<4x256xf32>, i32 -> vector<4x256xf32>
    %cst_130 = arith.constant 6.000000e+00 : f32
    %320 = vector.broadcast %cst_130 : f32 to vector<1x256xf32>
    %321 = arith.cmpf oge, %8, %320 : vector<1x256xf32>
    %cst_131 = arith.constant 2.100000e+01 : f32
    %322 = vector.broadcast %cst_131 : f32 to vector<1x256xf32>
    %323 = arith.cmpf ole, %8, %322 : vector<1x256xf32>
    %324 = arith.andi %321, %323 : vector<1x256xi1>
    %cst_132 = arith.constant -6.000000e+00 : f32
    %325 = vector.broadcast %cst_132 : f32 to vector<1x256xf32>
    %326 = arith.cmpf oge, %11, %325 : vector<1x256xf32>
    %327 = arith.andi %324, %326 : vector<1x256xi1>
    %cst_133 = arith.constant 9.000000e+00 : f32
    %328 = vector.broadcast %cst_133 : f32 to vector<1x256xf32>
    %329 = arith.cmpf ole, %11, %328 : vector<1x256xf32>
    %330 = arith.andi %327, %329 : vector<1x256xi1>
    %331 = arith.extui %330 : vector<1x256xi1> to vector<1x256xi32>
    %332 = arith.sitofp %331 : vector<1x256xi32> to vector<1x256xf32>
    %333 = vector.broadcast %332 : vector<1x256xf32> to vector<4x256xf32>
    %334 = arith.mulf %319, %333 : vector<4x256xf32>
    %c11 = arith.constant 11 : index
    %c0_134 = arith.constant 0 : index
    %c0_135 = arith.constant 0 : index
    %335 = vector.load %arg4[%c11, %c0_134, %c0_135] : memref<27x4x4xf32, #tpu.memory_space<vmem>>, vector<1x4x4xf32>
    %336 = vector.shape_cast %335 : vector<1x4x4xf32> to vector<4x4xf32>
    %cst_136 = arith.constant dense<0.000000e+00> : vector<4x256xf32>
    %337 = tpu.matmul %336, %334, %cst_136 {dimension_numbers = #tpu.dot_dimension_numbers<[1], [0], [0], [1], [0, 0, 1, 1], [], []>} : vector<4x4xf32>, vector<4x256xf32>, vector<4x256xf32> -> vector<4x256xf32>
    %338 = arith.addf %318, %337 : vector<4x256xf32>
    %c6_i32 = arith.constant 6 : i32
    %339 = tpu.dynamic_rotate %277 by %c6_i32 dim 1 : vector<4x256xf32>, i32 -> vector<4x256xf32>
    %cst_137 = arith.constant 0.000000e+00 : f32
    %340 = vector.broadcast %cst_137 : f32 to vector<1x256xf32>
    %341 = arith.cmpf oge, %8, %340 : vector<1x256xf32>
    %cst_138 = arith.constant 1.500000e+01 : f32
    %342 = vector.broadcast %cst_138 : f32 to vector<1x256xf32>
    %343 = arith.cmpf ole, %8, %342 : vector<1x256xf32>
    %344 = arith.andi %341, %343 : vector<1x256xi1>
    %cst_139 = arith.constant 6.000000e+00 : f32
    %345 = vector.broadcast %cst_139 : f32 to vector<1x256xf32>
    %346 = arith.cmpf oge, %11, %345 : vector<1x256xf32>
    %347 = arith.andi %344, %346 : vector<1x256xi1>
    %cst_140 = arith.constant 2.100000e+01 : f32
    %348 = vector.broadcast %cst_140 : f32 to vector<1x256xf32>
    %349 = arith.cmpf ole, %11, %348 : vector<1x256xf32>
    %350 = arith.andi %347, %349 : vector<1x256xi1>
    %351 = arith.extui %350 : vector<1x256xi1> to vector<1x256xi32>
    %352 = arith.sitofp %351 : vector<1x256xi32> to vector<1x256xf32>
    %353 = vector.broadcast %352 : vector<1x256xf32> to vector<4x256xf32>
    %354 = arith.mulf %339, %353 : vector<4x256xf32>
    %c12 = arith.constant 12 : index
    %c0_141 = arith.constant 0 : index
    %c0_142 = arith.constant 0 : index
    %355 = vector.load %arg4[%c12, %c0_141, %c0_142] : memref<27x4x4xf32, #tpu.memory_space<vmem>>, vector<1x4x4xf32>
    %356 = vector.shape_cast %355 : vector<1x4x4xf32> to vector<4x4xf32>
    %cst_143 = arith.constant dense<0.000000e+00> : vector<4x256xf32>
    %357 = tpu.matmul %356, %354, %cst_143 {dimension_numbers = #tpu.dot_dimension_numbers<[1], [0], [0], [1], [0, 0, 1, 1], [], []>} : vector<4x4xf32>, vector<4x256xf32>, vector<4x256xf32> -> vector<4x256xf32>
    %358 = arith.addf %338, %357 : vector<4x256xf32>
    %c13 = arith.constant 13 : index
    %c0_144 = arith.constant 0 : index
    %c0_145 = arith.constant 0 : index
    %359 = vector.load %arg4[%c13, %c0_144, %c0_145] : memref<27x4x4xf32, #tpu.memory_space<vmem>>, vector<1x4x4xf32>
    %360 = vector.shape_cast %359 : vector<1x4x4xf32> to vector<4x4xf32>
    %cst_146 = arith.constant dense<0.000000e+00> : vector<4x256xf32>
    %361 = tpu.matmul %360, %277, %cst_146 {dimension_numbers = #tpu.dot_dimension_numbers<[1], [0], [0], [1], [0, 0, 1, 1], [], []>} : vector<4x4xf32>, vector<4x256xf32>, vector<4x256xf32> -> vector<4x256xf32>
    %362 = arith.addf %358, %361 : vector<4x256xf32>
    %c250_i32 = arith.constant 250 : i32
    %363 = tpu.dynamic_rotate %277 by %c250_i32 dim 1 : vector<4x256xf32>, i32 -> vector<4x256xf32>
    %cst_147 = arith.constant 0.000000e+00 : f32
    %364 = vector.broadcast %cst_147 : f32 to vector<1x256xf32>
    %365 = arith.cmpf oge, %8, %364 : vector<1x256xf32>
    %cst_148 = arith.constant 1.500000e+01 : f32
    %366 = vector.broadcast %cst_148 : f32 to vector<1x256xf32>
    %367 = arith.cmpf ole, %8, %366 : vector<1x256xf32>
    %368 = arith.andi %365, %367 : vector<1x256xi1>
    %cst_149 = arith.constant -6.000000e+00 : f32
    %369 = vector.broadcast %cst_149 : f32 to vector<1x256xf32>
    %370 = arith.cmpf oge, %11, %369 : vector<1x256xf32>
    %371 = arith.andi %368, %370 : vector<1x256xi1>
    %cst_150 = arith.constant 9.000000e+00 : f32
    %372 = vector.broadcast %cst_150 : f32 to vector<1x256xf32>
    %373 = arith.cmpf ole, %11, %372 : vector<1x256xf32>
    %374 = arith.andi %371, %373 : vector<1x256xi1>
    %375 = arith.extui %374 : vector<1x256xi1> to vector<1x256xi32>
    %376 = arith.sitofp %375 : vector<1x256xi32> to vector<1x256xf32>
    %377 = vector.broadcast %376 : vector<1x256xf32> to vector<4x256xf32>
    %378 = arith.mulf %363, %377 : vector<4x256xf32>
    %c14 = arith.constant 14 : index
    %c0_151 = arith.constant 0 : index
    %c0_152 = arith.constant 0 : index
    %379 = vector.load %arg4[%c14, %c0_151, %c0_152] : memref<27x4x4xf32, #tpu.memory_space<vmem>>, vector<1x4x4xf32>
    %380 = vector.shape_cast %379 : vector<1x4x4xf32> to vector<4x4xf32>
    %cst_153 = arith.constant dense<0.000000e+00> : vector<4x256xf32>
    %381 = tpu.matmul %380, %378, %cst_153 {dimension_numbers = #tpu.dot_dimension_numbers<[1], [0], [0], [1], [0, 0, 1, 1], [], []>} : vector<4x4xf32>, vector<4x256xf32>, vector<4x256xf32> -> vector<4x256xf32>
    %382 = arith.addf %362, %381 : vector<4x256xf32>
    %c166_i32 = arith.constant 166 : i32
    %383 = tpu.dynamic_rotate %277 by %c166_i32 dim 1 : vector<4x256xf32>, i32 -> vector<4x256xf32>
    %cst_154 = arith.constant -6.000000e+00 : f32
    %384 = vector.broadcast %cst_154 : f32 to vector<1x256xf32>
    %385 = arith.cmpf oge, %8, %384 : vector<1x256xf32>
    %cst_155 = arith.constant 9.000000e+00 : f32
    %386 = vector.broadcast %cst_155 : f32 to vector<1x256xf32>
    %387 = arith.cmpf ole, %8, %386 : vector<1x256xf32>
    %388 = arith.andi %385, %387 : vector<1x256xi1>
    %cst_156 = arith.constant 6.000000e+00 : f32
    %389 = vector.broadcast %cst_156 : f32 to vector<1x256xf32>
    %390 = arith.cmpf oge, %11, %389 : vector<1x256xf32>
    %391 = arith.andi %388, %390 : vector<1x256xi1>
    %cst_157 = arith.constant 2.100000e+01 : f32
    %392 = vector.broadcast %cst_157 : f32 to vector<1x256xf32>
    %393 = arith.cmpf ole, %11, %392 : vector<1x256xf32>
    %394 = arith.andi %391, %393 : vector<1x256xi1>
    %395 = arith.extui %394 : vector<1x256xi1> to vector<1x256xi32>
    %396 = arith.sitofp %395 : vector<1x256xi32> to vector<1x256xf32>
    %397 = vector.broadcast %396 : vector<1x256xf32> to vector<4x256xf32>
    %398 = arith.mulf %383, %397 : vector<4x256xf32>
    %c15 = arith.constant 15 : index
    %c0_158 = arith.constant 0 : index
    %c0_159 = arith.constant 0 : index
    %399 = vector.load %arg4[%c15, %c0_158, %c0_159] : memref<27x4x4xf32, #tpu.memory_space<vmem>>, vector<1x4x4xf32>
    %400 = vector.shape_cast %399 : vector<1x4x4xf32> to vector<4x4xf32>
    %cst_160 = arith.constant dense<0.000000e+00> : vector<4x256xf32>
    %401 = tpu.matmul %400, %398, %cst_160 {dimension_numbers = #tpu.dot_dimension_numbers<[1], [0], [0], [1], [0, 0, 1, 1], [], []>} : vector<4x4xf32>, vector<4x256xf32>, vector<4x256xf32> -> vector<4x256xf32>
    %402 = arith.addf %382, %401 : vector<4x256xf32>
    %c160_i32 = arith.constant 160 : i32
    %403 = tpu.dynamic_rotate %277 by %c160_i32 dim 1 : vector<4x256xf32>, i32 -> vector<4x256xf32>
    %cst_161 = arith.constant -6.000000e+00 : f32
    %404 = vector.broadcast %cst_161 : f32 to vector<1x256xf32>
    %405 = arith.cmpf oge, %8, %404 : vector<1x256xf32>
    %cst_162 = arith.constant 9.000000e+00 : f32
    %406 = vector.broadcast %cst_162 : f32 to vector<1x256xf32>
    %407 = arith.cmpf ole, %8, %406 : vector<1x256xf32>
    %408 = arith.andi %405, %407 : vector<1x256xi1>
    %cst_163 = arith.constant 0.000000e+00 : f32
    %409 = vector.broadcast %cst_163 : f32 to vector<1x256xf32>
    %410 = arith.cmpf oge, %11, %409 : vector<1x256xf32>
    %411 = arith.andi %408, %410 : vector<1x256xi1>
    %cst_164 = arith.constant 1.500000e+01 : f32
    %412 = vector.broadcast %cst_164 : f32 to vector<1x256xf32>
    %413 = arith.cmpf ole, %11, %412 : vector<1x256xf32>
    %414 = arith.andi %411, %413 : vector<1x256xi1>
    %415 = arith.extui %414 : vector<1x256xi1> to vector<1x256xi32>
    %416 = arith.sitofp %415 : vector<1x256xi32> to vector<1x256xf32>
    %417 = vector.broadcast %416 : vector<1x256xf32> to vector<4x256xf32>
    %418 = arith.mulf %403, %417 : vector<4x256xf32>
    %c16 = arith.constant 16 : index
    %c0_165 = arith.constant 0 : index
    %c0_166 = arith.constant 0 : index
    %419 = vector.load %arg4[%c16, %c0_165, %c0_166] : memref<27x4x4xf32, #tpu.memory_space<vmem>>, vector<1x4x4xf32>
    %420 = vector.shape_cast %419 : vector<1x4x4xf32> to vector<4x4xf32>
    %cst_167 = arith.constant dense<0.000000e+00> : vector<4x256xf32>
    %421 = tpu.matmul %420, %418, %cst_167 {dimension_numbers = #tpu.dot_dimension_numbers<[1], [0], [0], [1], [0, 0, 1, 1], [], []>} : vector<4x4xf32>, vector<4x256xf32>, vector<4x256xf32> -> vector<4x256xf32>
    %422 = arith.addf %402, %421 : vector<4x256xf32>
    %c154_i32 = arith.constant 154 : i32
    %423 = tpu.dynamic_rotate %277 by %c154_i32 dim 1 : vector<4x256xf32>, i32 -> vector<4x256xf32>
    %cst_168 = arith.constant -6.000000e+00 : f32
    %424 = vector.broadcast %cst_168 : f32 to vector<1x256xf32>
    %425 = arith.cmpf oge, %8, %424 : vector<1x256xf32>
    %cst_169 = arith.constant 9.000000e+00 : f32
    %426 = vector.broadcast %cst_169 : f32 to vector<1x256xf32>
    %427 = arith.cmpf ole, %8, %426 : vector<1x256xf32>
    %428 = arith.andi %425, %427 : vector<1x256xi1>
    %cst_170 = arith.constant -6.000000e+00 : f32
    %429 = vector.broadcast %cst_170 : f32 to vector<1x256xf32>
    %430 = arith.cmpf oge, %11, %429 : vector<1x256xf32>
    %431 = arith.andi %428, %430 : vector<1x256xi1>
    %cst_171 = arith.constant 9.000000e+00 : f32
    %432 = vector.broadcast %cst_171 : f32 to vector<1x256xf32>
    %433 = arith.cmpf ole, %11, %432 : vector<1x256xf32>
    %434 = arith.andi %431, %433 : vector<1x256xi1>
    %435 = arith.extui %434 : vector<1x256xi1> to vector<1x256xi32>
    %436 = arith.sitofp %435 : vector<1x256xi32> to vector<1x256xf32>
    %437 = vector.broadcast %436 : vector<1x256xf32> to vector<4x256xf32>
    %438 = arith.mulf %423, %437 : vector<4x256xf32>
    %c17 = arith.constant 17 : index
    %c0_172 = arith.constant 0 : index
    %c0_173 = arith.constant 0 : index
    %439 = vector.load %arg4[%c17, %c0_172, %c0_173] : memref<27x4x4xf32, #tpu.memory_space<vmem>>, vector<1x4x4xf32>
    %440 = vector.shape_cast %439 : vector<1x4x4xf32> to vector<4x4xf32>
    %cst_174 = arith.constant dense<0.000000e+00> : vector<4x256xf32>
    %441 = tpu.matmul %440, %438, %cst_174 {dimension_numbers = #tpu.dot_dimension_numbers<[1], [0], [0], [1], [0, 0, 1, 1], [], []>} : vector<4x4xf32>, vector<4x256xf32>, vector<4x256xf32> -> vector<4x256xf32>
    %442 = arith.addf %422, %441 : vector<4x256xf32>
    %c1_175 = arith.constant 1 : index
    %c0_176 = arith.constant 0 : index
    %c0_177 = arith.constant 0 : index
    %443 = vector.load %arg5[%c1_175, %c0_176, %c0_177] : memref<3x4x1xf32, #tpu.memory_space<vmem>>, vector<1x4x1xf32>
    %444 = vector.shape_cast %443 : vector<1x4x1xf32> to vector<4x1xf32>
    %445 = vector.broadcast %444 : vector<4x1xf32> to vector<4x256xf32>
    %446 = arith.addf %442, %445 : vector<4x256xf32>
    %cst_178 = arith.constant dense<0.000000e+00> : vector<4xf32>
    %447 = vector.multi_reduction <add>, %446, %cst_178 [1] : vector<4x256xf32> to vector<4xf32>
    %448 = vector.shape_cast %447 : vector<4xf32> to vector<4x1xf32>
    %cst_179 = arith.constant 2.560000e+02 : f32
    %449 = vector.broadcast %cst_179 : f32 to vector<4x1xf32>
    %450 = arith.divf %448, %449 : vector<4x1xf32>
    %451 = vector.broadcast %450 : vector<4x1xf32> to vector<4x256xf32>
    %452 = arith.subf %446, %451 : vector<4x256xf32>
    %453 = arith.mulf %452, %452 : vector<4x256xf32>
    %cst_180 = arith.constant dense<0.000000e+00> : vector<4xf32>
    %454 = vector.multi_reduction <add>, %453, %cst_180 [1] : vector<4x256xf32> to vector<4xf32>
    %455 = vector.shape_cast %454 : vector<4xf32> to vector<4x1xf32>
    %cst_181 = arith.constant 2.560000e+02 : f32
    %456 = vector.broadcast %cst_181 : f32 to vector<4x1xf32>
    %457 = arith.divf %455, %456 : vector<4x1xf32>
    %cst_182 = arith.constant 9.99999974E-6 : f32
    %458 = vector.broadcast %cst_182 : f32 to vector<4x1xf32>
    %459 = arith.addf %457, %458 : vector<4x1xf32>
    %460 = math.sqrt %459 : vector<4x1xf32>
    %cst_183 = arith.constant 1.000000e+00 : f32
    %461 = vector.broadcast %cst_183 : f32 to vector<4x1xf32>
    %462 = arith.divf %461, %460 : vector<4x1xf32>
    %463 = vector.broadcast %462 : vector<4x1xf32> to vector<4x256xf32>
    %464 = arith.mulf %452, %463 : vector<4x256xf32>
    %c3_184 = arith.constant 3 : index
    %c0_185 = arith.constant 0 : index
    %c0_186 = arith.constant 0 : index
    %465 = vector.load %arg2[%c3_184, %c0_185, %c0_186] : memref<4x4x8xf32, #tpu.memory_space<vmem>>, vector<1x4x8xf32>
    %466 = vector.shape_cast %465 : vector<1x4x8xf32> to vector<4x8xf32>
    %c3_187 = arith.constant 3 : index
    %c0_188 = arith.constant 0 : index
    %c0_189 = arith.constant 0 : index
    %467 = vector.load %arg3[%c3_187, %c0_188, %c0_189] : memref<4x4x1xf32, #tpu.memory_space<vmem>>, vector<1x4x1xf32>
    %468 = vector.shape_cast %467 : vector<1x4x1xf32> to vector<4x1xf32>
    %cst_190 = arith.constant dense<0.000000e+00> : vector<4x256xf32>
    %469 = tpu.matmul %466, %1, %cst_190 {dimension_numbers = #tpu.dot_dimension_numbers<[1], [0], [0], [1], [0, 0, 1, 1], [], []>} : vector<4x8xf32>, vector<8x256xf32>, vector<4x256xf32> -> vector<4x256xf32>
    %470 = vector.broadcast %468 : vector<4x1xf32> to vector<4x256xf32>
    %471 = arith.addf %469, %470 : vector<4x256xf32>
    %cst_191 = arith.constant dense<0.000000e+00> : vector<4xf32>
    %472 = vector.multi_reduction <add>, %471, %cst_191 [1] : vector<4x256xf32> to vector<4xf32>
    %473 = vector.shape_cast %472 : vector<4xf32> to vector<4x1xf32>
    %cst_192 = arith.constant 2.560000e+02 : f32
    %474 = vector.broadcast %cst_192 : f32 to vector<4x1xf32>
    %475 = arith.divf %473, %474 : vector<4x1xf32>
    %476 = vector.broadcast %475 : vector<4x1xf32> to vector<4x256xf32>
    %477 = arith.subf %471, %476 : vector<4x256xf32>
    %478 = arith.mulf %477, %477 : vector<4x256xf32>
    %cst_193 = arith.constant dense<0.000000e+00> : vector<4xf32>
    %479 = vector.multi_reduction <add>, %478, %cst_193 [1] : vector<4x256xf32> to vector<4xf32>
    %480 = vector.shape_cast %479 : vector<4xf32> to vector<4x1xf32>
    %cst_194 = arith.constant 2.560000e+02 : f32
    %481 = vector.broadcast %cst_194 : f32 to vector<4x1xf32>
    %482 = arith.divf %480, %481 : vector<4x1xf32>
    %cst_195 = arith.constant 9.99999974E-6 : f32
    %483 = vector.broadcast %cst_195 : f32 to vector<4x1xf32>
    %484 = arith.addf %482, %483 : vector<4x1xf32>
    %485 = math.sqrt %484 : vector<4x1xf32>
    %cst_196 = arith.constant 1.000000e+00 : f32
    %486 = vector.broadcast %cst_196 : f32 to vector<4x1xf32>
    %487 = arith.divf %486, %485 : vector<4x1xf32>
    %488 = vector.broadcast %487 : vector<4x1xf32> to vector<4x256xf32>
    %489 = arith.mulf %477, %488 : vector<4x256xf32>
    %cst_197 = arith.constant 0.000000e+00 : f32
    %490 = vector.broadcast %cst_197 : f32 to vector<4x256xf32>
    %491 = arith.maximumf %489, %490 : vector<4x256xf32>
    %cst_198 = arith.constant 0.000000e+00 : f32
    %492 = vector.broadcast %cst_198 : f32 to vector<4x256xf32>
    %c153_i32 = arith.constant 153 : i32
    %493 = tpu.dynamic_rotate %491 by %c153_i32 dim 1 : vector<4x256xf32>, i32 -> vector<4x256xf32>
    %cst_199 = arith.constant 9.000000e+00 : f32
    %494 = vector.broadcast %cst_199 : f32 to vector<1x256xf32>
    %495 = arith.cmpf oge, %8, %494 : vector<1x256xf32>
    %cst_200 = arith.constant 2.400000e+01 : f32
    %496 = vector.broadcast %cst_200 : f32 to vector<1x256xf32>
    %497 = arith.cmpf ole, %8, %496 : vector<1x256xf32>
    %498 = arith.andi %495, %497 : vector<1x256xi1>
    %cst_201 = arith.constant 9.000000e+00 : f32
    %499 = vector.broadcast %cst_201 : f32 to vector<1x256xf32>
    %500 = arith.cmpf oge, %11, %499 : vector<1x256xf32>
    %501 = arith.andi %498, %500 : vector<1x256xi1>
    %cst_202 = arith.constant 2.400000e+01 : f32
    %502 = vector.broadcast %cst_202 : f32 to vector<1x256xf32>
    %503 = arith.cmpf ole, %11, %502 : vector<1x256xf32>
    %504 = arith.andi %501, %503 : vector<1x256xi1>
    %505 = arith.extui %504 : vector<1x256xi1> to vector<1x256xi32>
    %506 = arith.sitofp %505 : vector<1x256xi32> to vector<1x256xf32>
    %507 = vector.broadcast %506 : vector<1x256xf32> to vector<4x256xf32>
    %508 = arith.mulf %493, %507 : vector<4x256xf32>
    %c18 = arith.constant 18 : index
    %c0_203 = arith.constant 0 : index
    %c0_204 = arith.constant 0 : index
    %509 = vector.load %arg4[%c18, %c0_203, %c0_204] : memref<27x4x4xf32, #tpu.memory_space<vmem>>, vector<1x4x4xf32>
    %510 = vector.shape_cast %509 : vector<1x4x4xf32> to vector<4x4xf32>
    %cst_205 = arith.constant dense<0.000000e+00> : vector<4x256xf32>
    %511 = tpu.matmul %510, %508, %cst_205 {dimension_numbers = #tpu.dot_dimension_numbers<[1], [0], [0], [1], [0, 0, 1, 1], [], []>} : vector<4x4xf32>, vector<4x256xf32>, vector<4x256xf32> -> vector<4x256xf32>
    %512 = arith.addf %492, %511 : vector<4x256xf32>
    %c144_i32 = arith.constant 144 : i32
    %513 = tpu.dynamic_rotate %491 by %c144_i32 dim 1 : vector<4x256xf32>, i32 -> vector<4x256xf32>
    %cst_206 = arith.constant 9.000000e+00 : f32
    %514 = vector.broadcast %cst_206 : f32 to vector<1x256xf32>
    %515 = arith.cmpf oge, %8, %514 : vector<1x256xf32>
    %cst_207 = arith.constant 2.400000e+01 : f32
    %516 = vector.broadcast %cst_207 : f32 to vector<1x256xf32>
    %517 = arith.cmpf ole, %8, %516 : vector<1x256xf32>
    %518 = arith.andi %515, %517 : vector<1x256xi1>
    %cst_208 = arith.constant 0.000000e+00 : f32
    %519 = vector.broadcast %cst_208 : f32 to vector<1x256xf32>
    %520 = arith.cmpf oge, %11, %519 : vector<1x256xf32>
    %521 = arith.andi %518, %520 : vector<1x256xi1>
    %cst_209 = arith.constant 1.500000e+01 : f32
    %522 = vector.broadcast %cst_209 : f32 to vector<1x256xf32>
    %523 = arith.cmpf ole, %11, %522 : vector<1x256xf32>
    %524 = arith.andi %521, %523 : vector<1x256xi1>
    %525 = arith.extui %524 : vector<1x256xi1> to vector<1x256xi32>
    %526 = arith.sitofp %525 : vector<1x256xi32> to vector<1x256xf32>
    %527 = vector.broadcast %526 : vector<1x256xf32> to vector<4x256xf32>
    %528 = arith.mulf %513, %527 : vector<4x256xf32>
    %c19 = arith.constant 19 : index
    %c0_210 = arith.constant 0 : index
    %c0_211 = arith.constant 0 : index
    %529 = vector.load %arg4[%c19, %c0_210, %c0_211] : memref<27x4x4xf32, #tpu.memory_space<vmem>>, vector<1x4x4xf32>
    %530 = vector.shape_cast %529 : vector<1x4x4xf32> to vector<4x4xf32>
    %cst_212 = arith.constant dense<0.000000e+00> : vector<4x256xf32>
    %531 = tpu.matmul %530, %528, %cst_212 {dimension_numbers = #tpu.dot_dimension_numbers<[1], [0], [0], [1], [0, 0, 1, 1], [], []>} : vector<4x4xf32>, vector<4x256xf32>, vector<4x256xf32> -> vector<4x256xf32>
    %532 = arith.addf %512, %531 : vector<4x256xf32>
    %c135_i32 = arith.constant 135 : i32
    %533 = tpu.dynamic_rotate %491 by %c135_i32 dim 1 : vector<4x256xf32>, i32 -> vector<4x256xf32>
    %cst_213 = arith.constant 9.000000e+00 : f32
    %534 = vector.broadcast %cst_213 : f32 to vector<1x256xf32>
    %535 = arith.cmpf oge, %8, %534 : vector<1x256xf32>
    %cst_214 = arith.constant 2.400000e+01 : f32
    %536 = vector.broadcast %cst_214 : f32 to vector<1x256xf32>
    %537 = arith.cmpf ole, %8, %536 : vector<1x256xf32>
    %538 = arith.andi %535, %537 : vector<1x256xi1>
    %cst_215 = arith.constant -9.000000e+00 : f32
    %539 = vector.broadcast %cst_215 : f32 to vector<1x256xf32>
    %540 = arith.cmpf oge, %11, %539 : vector<1x256xf32>
    %541 = arith.andi %538, %540 : vector<1x256xi1>
    %cst_216 = arith.constant 6.000000e+00 : f32
    %542 = vector.broadcast %cst_216 : f32 to vector<1x256xf32>
    %543 = arith.cmpf ole, %11, %542 : vector<1x256xf32>
    %544 = arith.andi %541, %543 : vector<1x256xi1>
    %545 = arith.extui %544 : vector<1x256xi1> to vector<1x256xi32>
    %546 = arith.sitofp %545 : vector<1x256xi32> to vector<1x256xf32>
    %547 = vector.broadcast %546 : vector<1x256xf32> to vector<4x256xf32>
    %548 = arith.mulf %533, %547 : vector<4x256xf32>
    %c20 = arith.constant 20 : index
    %c0_217 = arith.constant 0 : index
    %c0_218 = arith.constant 0 : index
    %549 = vector.load %arg4[%c20, %c0_217, %c0_218] : memref<27x4x4xf32, #tpu.memory_space<vmem>>, vector<1x4x4xf32>
    %550 = vector.shape_cast %549 : vector<1x4x4xf32> to vector<4x4xf32>
    %cst_219 = arith.constant dense<0.000000e+00> : vector<4x256xf32>
    %551 = tpu.matmul %550, %548, %cst_219 {dimension_numbers = #tpu.dot_dimension_numbers<[1], [0], [0], [1], [0, 0, 1, 1], [], []>} : vector<4x4xf32>, vector<4x256xf32>, vector<4x256xf32> -> vector<4x256xf32>
    %552 = arith.addf %532, %551 : vector<4x256xf32>
    %c9_i32 = arith.constant 9 : i32
    %553 = tpu.dynamic_rotate %491 by %c9_i32 dim 1 : vector<4x256xf32>, i32 -> vector<4x256xf32>
    %cst_220 = arith.constant 0.000000e+00 : f32
    %554 = vector.broadcast %cst_220 : f32 to vector<1x256xf32>
    %555 = arith.cmpf oge, %8, %554 : vector<1x256xf32>
    %cst_221 = arith.constant 1.500000e+01 : f32
    %556 = vector.broadcast %cst_221 : f32 to vector<1x256xf32>
    %557 = arith.cmpf ole, %8, %556 : vector<1x256xf32>
    %558 = arith.andi %555, %557 : vector<1x256xi1>
    %cst_222 = arith.constant 9.000000e+00 : f32
    %559 = vector.broadcast %cst_222 : f32 to vector<1x256xf32>
    %560 = arith.cmpf oge, %11, %559 : vector<1x256xf32>
    %561 = arith.andi %558, %560 : vector<1x256xi1>
    %cst_223 = arith.constant 2.400000e+01 : f32
    %562 = vector.broadcast %cst_223 : f32 to vector<1x256xf32>
    %563 = arith.cmpf ole, %11, %562 : vector<1x256xf32>
    %564 = arith.andi %561, %563 : vector<1x256xi1>
    %565 = arith.extui %564 : vector<1x256xi1> to vector<1x256xi32>
    %566 = arith.sitofp %565 : vector<1x256xi32> to vector<1x256xf32>
    %567 = vector.broadcast %566 : vector<1x256xf32> to vector<4x256xf32>
    %568 = arith.mulf %553, %567 : vector<4x256xf32>
    %c21 = arith.constant 21 : index
    %c0_224 = arith.constant 0 : index
    %c0_225 = arith.constant 0 : index
    %569 = vector.load %arg4[%c21, %c0_224, %c0_225] : memref<27x4x4xf32, #tpu.memory_space<vmem>>, vector<1x4x4xf32>
    %570 = vector.shape_cast %569 : vector<1x4x4xf32> to vector<4x4xf32>
    %cst_226 = arith.constant dense<0.000000e+00> : vector<4x256xf32>
    %571 = tpu.matmul %570, %568, %cst_226 {dimension_numbers = #tpu.dot_dimension_numbers<[1], [0], [0], [1], [0, 0, 1, 1], [], []>} : vector<4x4xf32>, vector<4x256xf32>, vector<4x256xf32> -> vector<4x256xf32>
    %572 = arith.addf %552, %571 : vector<4x256xf32>
    %c22 = arith.constant 22 : index
    %c0_227 = arith.constant 0 : index
    %c0_228 = arith.constant 0 : index
    %573 = vector.load %arg4[%c22, %c0_227, %c0_228] : memref<27x4x4xf32, #tpu.memory_space<vmem>>, vector<1x4x4xf32>
    %574 = vector.shape_cast %573 : vector<1x4x4xf32> to vector<4x4xf32>
    %cst_229 = arith.constant dense<0.000000e+00> : vector<4x256xf32>
    %575 = tpu.matmul %574, %491, %cst_229 {dimension_numbers = #tpu.dot_dimension_numbers<[1], [0], [0], [1], [0, 0, 1, 1], [], []>} : vector<4x4xf32>, vector<4x256xf32>, vector<4x256xf32> -> vector<4x256xf32>
    %576 = arith.addf %572, %575 : vector<4x256xf32>
    %c247_i32 = arith.constant 247 : i32
    %577 = tpu.dynamic_rotate %491 by %c247_i32 dim 1 : vector<4x256xf32>, i32 -> vector<4x256xf32>
    %cst_230 = arith.constant 0.000000e+00 : f32
    %578 = vector.broadcast %cst_230 : f32 to vector<1x256xf32>
    %579 = arith.cmpf oge, %8, %578 : vector<1x256xf32>
    %cst_231 = arith.constant 1.500000e+01 : f32
    %580 = vector.broadcast %cst_231 : f32 to vector<1x256xf32>
    %581 = arith.cmpf ole, %8, %580 : vector<1x256xf32>
    %582 = arith.andi %579, %581 : vector<1x256xi1>
    %cst_232 = arith.constant -9.000000e+00 : f32
    %583 = vector.broadcast %cst_232 : f32 to vector<1x256xf32>
    %584 = arith.cmpf oge, %11, %583 : vector<1x256xf32>
    %585 = arith.andi %582, %584 : vector<1x256xi1>
    %cst_233 = arith.constant 6.000000e+00 : f32
    %586 = vector.broadcast %cst_233 : f32 to vector<1x256xf32>
    %587 = arith.cmpf ole, %11, %586 : vector<1x256xf32>
    %588 = arith.andi %585, %587 : vector<1x256xi1>
    %589 = arith.extui %588 : vector<1x256xi1> to vector<1x256xi32>
    %590 = arith.sitofp %589 : vector<1x256xi32> to vector<1x256xf32>
    %591 = vector.broadcast %590 : vector<1x256xf32> to vector<4x256xf32>
    %592 = arith.mulf %577, %591 : vector<4x256xf32>
    %c23 = arith.constant 23 : index
    %c0_234 = arith.constant 0 : index
    %c0_235 = arith.constant 0 : index
    %593 = vector.load %arg4[%c23, %c0_234, %c0_235] : memref<27x4x4xf32, #tpu.memory_space<vmem>>, vector<1x4x4xf32>
    %594 = vector.shape_cast %593 : vector<1x4x4xf32> to vector<4x4xf32>
    %cst_236 = arith.constant dense<0.000000e+00> : vector<4x256xf32>
    %595 = tpu.matmul %594, %592, %cst_236 {dimension_numbers = #tpu.dot_dimension_numbers<[1], [0], [0], [1], [0, 0, 1, 1], [], []>} : vector<4x4xf32>, vector<4x256xf32>, vector<4x256xf32> -> vector<4x256xf32>
    %596 = arith.addf %576, %595 : vector<4x256xf32>
    %c121_i32 = arith.constant 121 : i32
    %597 = tpu.dynamic_rotate %491 by %c121_i32 dim 1 : vector<4x256xf32>, i32 -> vector<4x256xf32>
    %cst_237 = arith.constant -9.000000e+00 : f32
    %598 = vector.broadcast %cst_237 : f32 to vector<1x256xf32>
    %599 = arith.cmpf oge, %8, %598 : vector<1x256xf32>
    %cst_238 = arith.constant 6.000000e+00 : f32
    %600 = vector.broadcast %cst_238 : f32 to vector<1x256xf32>
    %601 = arith.cmpf ole, %8, %600 : vector<1x256xf32>
    %602 = arith.andi %599, %601 : vector<1x256xi1>
    %cst_239 = arith.constant 9.000000e+00 : f32
    %603 = vector.broadcast %cst_239 : f32 to vector<1x256xf32>
    %604 = arith.cmpf oge, %11, %603 : vector<1x256xf32>
    %605 = arith.andi %602, %604 : vector<1x256xi1>
    %cst_240 = arith.constant 2.400000e+01 : f32
    %606 = vector.broadcast %cst_240 : f32 to vector<1x256xf32>
    %607 = arith.cmpf ole, %11, %606 : vector<1x256xf32>
    %608 = arith.andi %605, %607 : vector<1x256xi1>
    %609 = arith.extui %608 : vector<1x256xi1> to vector<1x256xi32>
    %610 = arith.sitofp %609 : vector<1x256xi32> to vector<1x256xf32>
    %611 = vector.broadcast %610 : vector<1x256xf32> to vector<4x256xf32>
    %612 = arith.mulf %597, %611 : vector<4x256xf32>
    %c24 = arith.constant 24 : index
    %c0_241 = arith.constant 0 : index
    %c0_242 = arith.constant 0 : index
    %613 = vector.load %arg4[%c24, %c0_241, %c0_242] : memref<27x4x4xf32, #tpu.memory_space<vmem>>, vector<1x4x4xf32>
    %614 = vector.shape_cast %613 : vector<1x4x4xf32> to vector<4x4xf32>
    %cst_243 = arith.constant dense<0.000000e+00> : vector<4x256xf32>
    %615 = tpu.matmul %614, %612, %cst_243 {dimension_numbers = #tpu.dot_dimension_numbers<[1], [0], [0], [1], [0, 0, 1, 1], [], []>} : vector<4x4xf32>, vector<4x256xf32>, vector<4x256xf32> -> vector<4x256xf32>
    %616 = arith.addf %596, %615 : vector<4x256xf32>
    %c112_i32 = arith.constant 112 : i32
    %617 = tpu.dynamic_rotate %491 by %c112_i32 dim 1 : vector<4x256xf32>, i32 -> vector<4x256xf32>
    %cst_244 = arith.constant -9.000000e+00 : f32
    %618 = vector.broadcast %cst_244 : f32 to vector<1x256xf32>
    %619 = arith.cmpf oge, %8, %618 : vector<1x256xf32>
    %cst_245 = arith.constant 6.000000e+00 : f32
    %620 = vector.broadcast %cst_245 : f32 to vector<1x256xf32>
    %621 = arith.cmpf ole, %8, %620 : vector<1x256xf32>
    %622 = arith.andi %619, %621 : vector<1x256xi1>
    %cst_246 = arith.constant 0.000000e+00 : f32
    %623 = vector.broadcast %cst_246 : f32 to vector<1x256xf32>
    %624 = arith.cmpf oge, %11, %623 : vector<1x256xf32>
    %625 = arith.andi %622, %624 : vector<1x256xi1>
    %cst_247 = arith.constant 1.500000e+01 : f32
    %626 = vector.broadcast %cst_247 : f32 to vector<1x256xf32>
    %627 = arith.cmpf ole, %11, %626 : vector<1x256xf32>
    %628 = arith.andi %625, %627 : vector<1x256xi1>
    %629 = arith.extui %628 : vector<1x256xi1> to vector<1x256xi32>
    %630 = arith.sitofp %629 : vector<1x256xi32> to vector<1x256xf32>
    %631 = vector.broadcast %630 : vector<1x256xf32> to vector<4x256xf32>
    %632 = arith.mulf %617, %631 : vector<4x256xf32>
    %c25 = arith.constant 25 : index
    %c0_248 = arith.constant 0 : index
    %c0_249 = arith.constant 0 : index
    %633 = vector.load %arg4[%c25, %c0_248, %c0_249] : memref<27x4x4xf32, #tpu.memory_space<vmem>>, vector<1x4x4xf32>
    %634 = vector.shape_cast %633 : vector<1x4x4xf32> to vector<4x4xf32>
    %cst_250 = arith.constant dense<0.000000e+00> : vector<4x256xf32>
    %635 = tpu.matmul %634, %632, %cst_250 {dimension_numbers = #tpu.dot_dimension_numbers<[1], [0], [0], [1], [0, 0, 1, 1], [], []>} : vector<4x4xf32>, vector<4x256xf32>, vector<4x256xf32> -> vector<4x256xf32>
    %636 = arith.addf %616, %635 : vector<4x256xf32>
    %c103_i32 = arith.constant 103 : i32
    %637 = tpu.dynamic_rotate %491 by %c103_i32 dim 1 : vector<4x256xf32>, i32 -> vector<4x256xf32>
    %cst_251 = arith.constant -9.000000e+00 : f32
    %638 = vector.broadcast %cst_251 : f32 to vector<1x256xf32>
    %639 = arith.cmpf oge, %8, %638 : vector<1x256xf32>
    %cst_252 = arith.constant 6.000000e+00 : f32
    %640 = vector.broadcast %cst_252 : f32 to vector<1x256xf32>
    %641 = arith.cmpf ole, %8, %640 : vector<1x256xf32>
    %642 = arith.andi %639, %641 : vector<1x256xi1>
    %cst_253 = arith.constant -9.000000e+00 : f32
    %643 = vector.broadcast %cst_253 : f32 to vector<1x256xf32>
    %644 = arith.cmpf oge, %11, %643 : vector<1x256xf32>
    %645 = arith.andi %642, %644 : vector<1x256xi1>
    %cst_254 = arith.constant 6.000000e+00 : f32
    %646 = vector.broadcast %cst_254 : f32 to vector<1x256xf32>
    %647 = arith.cmpf ole, %11, %646 : vector<1x256xf32>
    %648 = arith.andi %645, %647 : vector<1x256xi1>
    %649 = arith.extui %648 : vector<1x256xi1> to vector<1x256xi32>
    %650 = arith.sitofp %649 : vector<1x256xi32> to vector<1x256xf32>
    %651 = vector.broadcast %650 : vector<1x256xf32> to vector<4x256xf32>
    %652 = arith.mulf %637, %651 : vector<4x256xf32>
    %c26 = arith.constant 26 : index
    %c0_255 = arith.constant 0 : index
    %c0_256 = arith.constant 0 : index
    %653 = vector.load %arg4[%c26, %c0_255, %c0_256] : memref<27x4x4xf32, #tpu.memory_space<vmem>>, vector<1x4x4xf32>
    %654 = vector.shape_cast %653 : vector<1x4x4xf32> to vector<4x4xf32>
    %cst_257 = arith.constant dense<0.000000e+00> : vector<4x256xf32>
    %655 = tpu.matmul %654, %652, %cst_257 {dimension_numbers = #tpu.dot_dimension_numbers<[1], [0], [0], [1], [0, 0, 1, 1], [], []>} : vector<4x4xf32>, vector<4x256xf32>, vector<4x256xf32> -> vector<4x256xf32>
    %656 = arith.addf %636, %655 : vector<4x256xf32>
    %c2_258 = arith.constant 2 : index
    %c0_259 = arith.constant 0 : index
    %c0_260 = arith.constant 0 : index
    %657 = vector.load %arg5[%c2_258, %c0_259, %c0_260] : memref<3x4x1xf32, #tpu.memory_space<vmem>>, vector<1x4x1xf32>
    %658 = vector.shape_cast %657 : vector<1x4x1xf32> to vector<4x1xf32>
    %659 = vector.broadcast %658 : vector<4x1xf32> to vector<4x256xf32>
    %660 = arith.addf %656, %659 : vector<4x256xf32>
    %cst_261 = arith.constant dense<0.000000e+00> : vector<4xf32>
    %661 = vector.multi_reduction <add>, %660, %cst_261 [1] : vector<4x256xf32> to vector<4xf32>
    %662 = vector.shape_cast %661 : vector<4xf32> to vector<4x1xf32>
    %cst_262 = arith.constant 2.560000e+02 : f32
    %663 = vector.broadcast %cst_262 : f32 to vector<4x1xf32>
    %664 = arith.divf %662, %663 : vector<4x1xf32>
    %665 = vector.broadcast %664 : vector<4x1xf32> to vector<4x256xf32>
    %666 = arith.subf %660, %665 : vector<4x256xf32>
    %667 = arith.mulf %666, %666 : vector<4x256xf32>
    %cst_263 = arith.constant dense<0.000000e+00> : vector<4xf32>
    %668 = vector.multi_reduction <add>, %667, %cst_263 [1] : vector<4x256xf32> to vector<4xf32>
    %669 = vector.shape_cast %668 : vector<4xf32> to vector<4x1xf32>
    %cst_264 = arith.constant 2.560000e+02 : f32
    %670 = vector.broadcast %cst_264 : f32 to vector<4x1xf32>
    %671 = arith.divf %669, %670 : vector<4x1xf32>
    %cst_265 = arith.constant 9.99999974E-6 : f32
    %672 = vector.broadcast %cst_265 : f32 to vector<4x1xf32>
    %673 = arith.addf %671, %672 : vector<4x1xf32>
    %674 = math.sqrt %673 : vector<4x1xf32>
    %cst_266 = arith.constant 1.000000e+00 : f32
    %675 = vector.broadcast %cst_266 : f32 to vector<4x1xf32>
    %676 = arith.divf %675, %674 : vector<4x1xf32>
    %677 = vector.broadcast %676 : vector<4x1xf32> to vector<4x256xf32>
    %678 = arith.mulf %666, %677 : vector<4x256xf32>
    %c0_267 = arith.constant 0 : index
    %c0_268 = arith.constant 0 : index
    %679 = vector.load %arg7[%c0_267, %c0_268] : memref<16x1xf32, #tpu.memory_space<vmem>>, vector<16x1xf32>
    %c0_269 = arith.constant 0 : index
    %c0_270 = arith.constant 0 : index
    %c0_271 = arith.constant 0 : index
    %680 = vector.load %arg6[%c0_269, %c0_270, %c0_271] : memref<4x16x4xf32, #tpu.memory_space<vmem>>, vector<1x16x4xf32>
    %681 = vector.shape_cast %680 : vector<1x16x4xf32> to vector<16x4xf32>
    %cst_272 = arith.constant dense<0.000000e+00> : vector<16x256xf32>
    %682 = tpu.matmul %681, %36, %cst_272 {dimension_numbers = #tpu.dot_dimension_numbers<[1], [0], [0], [1], [0, 0, 1, 1], [], []>} : vector<16x4xf32>, vector<4x256xf32>, vector<16x256xf32> -> vector<16x256xf32>
    %683 = vector.broadcast %679 : vector<16x1xf32> to vector<16x256xf32>
    %684 = arith.addf %683, %682 : vector<16x256xf32>
    %c1_273 = arith.constant 1 : index
    %c0_274 = arith.constant 0 : index
    %c0_275 = arith.constant 0 : index
    %685 = vector.load %arg6[%c1_273, %c0_274, %c0_275] : memref<4x16x4xf32, #tpu.memory_space<vmem>>, vector<1x16x4xf32>
    %686 = vector.shape_cast %685 : vector<1x16x4xf32> to vector<16x4xf32>
    %cst_276 = arith.constant dense<0.000000e+00> : vector<16x256xf32>
    %687 = tpu.matmul %686, %250, %cst_276 {dimension_numbers = #tpu.dot_dimension_numbers<[1], [0], [0], [1], [0, 0, 1, 1], [], []>} : vector<16x4xf32>, vector<4x256xf32>, vector<16x256xf32> -> vector<16x256xf32>
    %688 = arith.addf %684, %687 : vector<16x256xf32>
    %c2_277 = arith.constant 2 : index
    %c0_278 = arith.constant 0 : index
    %c0_279 = arith.constant 0 : index
    %689 = vector.load %arg6[%c2_277, %c0_278, %c0_279] : memref<4x16x4xf32, #tpu.memory_space<vmem>>, vector<1x16x4xf32>
    %690 = vector.shape_cast %689 : vector<1x16x4xf32> to vector<16x4xf32>
    %cst_280 = arith.constant dense<0.000000e+00> : vector<16x256xf32>
    %691 = tpu.matmul %690, %464, %cst_280 {dimension_numbers = #tpu.dot_dimension_numbers<[1], [0], [0], [1], [0, 0, 1, 1], [], []>} : vector<16x4xf32>, vector<4x256xf32>, vector<16x256xf32> -> vector<16x256xf32>
    %692 = arith.addf %688, %691 : vector<16x256xf32>
    %c3_281 = arith.constant 3 : index
    %c0_282 = arith.constant 0 : index
    %c0_283 = arith.constant 0 : index
    %693 = vector.load %arg6[%c3_281, %c0_282, %c0_283] : memref<4x16x4xf32, #tpu.memory_space<vmem>>, vector<1x16x4xf32>
    %694 = vector.shape_cast %693 : vector<1x16x4xf32> to vector<16x4xf32>
    %cst_284 = arith.constant dense<0.000000e+00> : vector<16x256xf32>
    %695 = tpu.matmul %694, %678, %cst_284 {dimension_numbers = #tpu.dot_dimension_numbers<[1], [0], [0], [1], [0, 0, 1, 1], [], []>} : vector<16x4xf32>, vector<4x256xf32>, vector<16x256xf32> -> vector<16x256xf32>
    %696 = arith.addf %692, %695 : vector<16x256xf32>
    %cst_285 = arith.constant dense<0.000000e+00> : vector<16xf32>
    %697 = vector.multi_reduction <add>, %696, %cst_285 [1] : vector<16x256xf32> to vector<16xf32>
    %698 = vector.shape_cast %697 : vector<16xf32> to vector<16x1xf32>
    %cst_286 = arith.constant 2.560000e+02 : f32
    %699 = vector.broadcast %cst_286 : f32 to vector<16x1xf32>
    %700 = arith.divf %698, %699 : vector<16x1xf32>
    %701 = vector.broadcast %700 : vector<16x1xf32> to vector<16x256xf32>
    %702 = arith.subf %696, %701 : vector<16x256xf32>
    %703 = arith.mulf %702, %702 : vector<16x256xf32>
    %cst_287 = arith.constant dense<0.000000e+00> : vector<16xf32>
    %704 = vector.multi_reduction <add>, %703, %cst_287 [1] : vector<16x256xf32> to vector<16xf32>
    %705 = vector.shape_cast %704 : vector<16xf32> to vector<16x1xf32>
    %cst_288 = arith.constant 2.560000e+02 : f32
    %706 = vector.broadcast %cst_288 : f32 to vector<16x1xf32>
    %707 = arith.divf %705, %706 : vector<16x1xf32>
    %cst_289 = arith.constant 9.99999974E-6 : f32
    %708 = vector.broadcast %cst_289 : f32 to vector<16x1xf32>
    %709 = arith.addf %707, %708 : vector<16x1xf32>
    %710 = math.sqrt %709 : vector<16x1xf32>
    %cst_290 = arith.constant 1.000000e+00 : f32
    %711 = vector.broadcast %cst_290 : f32 to vector<16x1xf32>
    %712 = arith.divf %711, %710 : vector<16x1xf32>
    %713 = vector.broadcast %712 : vector<16x1xf32> to vector<16x256xf32>
    %714 = arith.mulf %702, %713 : vector<16x256xf32>
    %c0_291 = arith.constant 0 : index
    %c0_292 = arith.constant 0 : index
    %c0_293 = arith.constant 0 : index
    %715 = vector.load %arg8[%c0_291, %c0_292, %c0_293] : memref<1x16x256xf32, #tpu.memory_space<vmem>>, vector<1x16x256xf32>
    %716 = vector.shape_cast %715 : vector<1x16x256xf32> to vector<16x256xf32>
    %717 = vector.shape_cast %714 : vector<16x256xf32> to vector<1x16x256xf32>
    tpu.vector_store %arg8[%c0_291, %c0_292, %c0_293], %717 {strides = array<i32>} : memref<1x16x256xf32, #tpu.memory_space<vmem>>, vector<1x16x256xf32>,
    return
  }
  func.func @transform_0(%arg0: i32) -> (i32, i32, i32) {
    %c0_i32 = arith.constant 0 : i32
    %c0_i32_0 = arith.constant 0 : i32
    %c0_i32_1 = arith.constant 0 : i32
    return %arg0, %c0_i32, %c0_i32_0 : i32, i32, i32
  }
  func.func @transform_1(%arg0: i32) -> (i32, i32, i32) {
    %c0_i32 = arith.constant 0 : i32
    %c0_i32_0 = arith.constant 0 : i32
    %c0_i32_1 = arith.constant 0 : i32
    %c0_i32_2 = arith.constant 0 : i32
    return %c0_i32, %c0_i32_0, %c0_i32_1 : i32, i32, i32
  }
  func.func @transform_2(%arg0: i32) -> (i32, i32, i32) {
    %c0_i32 = arith.constant 0 : i32
    %c0_i32_0 = arith.constant 0 : i32
    %c0_i32_1 = arith.constant 0 : i32
    %c0_i32_2 = arith.constant 0 : i32
    return %c0_i32, %c0_i32_0, %c0_i32_1 : i32, i32, i32
  }
  func.func @transform_3(%arg0: i32) -> (i32, i32, i32) {
    %c0_i32 = arith.constant 0 : i32
    %c0_i32_0 = arith.constant 0 : i32
    %c0_i32_1 = arith.constant 0 : i32
    %c0_i32_2 = arith.constant 0 : i32
    return %c0_i32, %c0_i32_0, %c0_i32_1 : i32, i32, i32
  }
  func.func @transform_4(%arg0: i32) -> (i32, i32, i32) {
    %c0_i32 = arith.constant 0 : i32
    %c0_i32_0 = arith.constant 0 : i32
    %c0_i32_1 = arith.constant 0 : i32
    %c0_i32_2 = arith.constant 0 : i32
    return %c0_i32, %c0_i32_0, %c0_i32_1 : i32, i32, i32
  }
  func.func @transform_5(%arg0: i32) -> (i32, i32, i32) {
    %c0_i32 = arith.constant 0 : i32
    %c0_i32_0 = arith.constant 0 : i32
    %c0_i32_1 = arith.constant 0 : i32
    %c0_i32_2 = arith.constant 0 : i32
    return %c0_i32, %c0_i32_0, %c0_i32_1 : i32, i32, i32
  }
  func.func @transform_6(%arg0: i32) -> (i32, i32) {
    %c0_i32 = arith.constant 0 : i32
    %c0_i32_0 = arith.constant 0 : i32
    %c0_i32_1 = arith.constant 0 : i32
    return %c0_i32, %c0_i32_0 : i32, i32
  }
  func.func @transform_7(%arg0: i32) -> (i32, i32, i32) {
    %c0_i32 = arith.constant 0 : i32
    %c0_i32_0 = arith.constant 0 : i32
    %c0_i32_1 = arith.constant 0 : i32
    return %arg0, %c0_i32, %c0_i32_0 : i32, i32, i32
  }
}

</mosaic_0001>

<bundles_post_ra>
// kernel: tpu_custom_call.1
= control target key start
LH: loop header
LB: loop body
LE: loop exit
PB: predicated region body
PF: predicated region fallthrough
CT: control target
= control target key end

     0   :  { %12 = vsyncpa [#allocation3], 0  ;;  %s5877_s0 = inlined_call_operand.vmem [shape: f32[2,8,256], index: 0, kind: input, shape index: {}]   ;;  %s5878_s1 = inlined_call_operand.vmem [shape: f32[4,4,8], index: 1, kind: input, shape index: {}]   ;;  %s5879_s2 = inlined_call_operand.vmem [shape: f32[4,4,1], index: 2, kind: input, shape index: {}]   ;;  %s5880_s3 = inlined_call_operand.vmem [shape: f32[27,4,4], index: 3, kind: input, shape index: {}]   ;;  %s5881_s4 = inlined_call_operand.vmem [shape: f32[3,4,1], index: 4, kind: input, shape index: {}]   ;;  %s5882_s5 = inlined_call_operand.vmem [shape: f32[4,16,4], index: 5, kind: input, shape index: {}]   ;;  %s5883_s6 = inlined_call_operand.vmem [shape: f32[16,1], index: 6, kind: input, shape index: {}]   ;;  %s5884_s7 = inlined_call_operand.hbm [shape: f32[2,16,256], index: 7, kind: output, shape index: {}]  }
   0x1   :  { %14 = vsyncpa [#allocation3 + $0x1], 0  ;;  %s4615_s24 = smov 0   ;;  %s4617_s25 = smov 0  }
   0x2   :  { %s4619_s26 = smov 0   ;;  %s4621_s27 = smov 0  }
   0x3 LB: > { %s4636_s28 = sadd.s32 4294967295, %s4545_s27   ;;  %s4112_s29 = sadd.s32 4294967294, %s4545_s27   ;;  %s4545_s27 = sphi %s4621_s27, %s6157_s27   ;;  %s4541_s26 = sphi %s4619_s26, %s6156_s26   ;;  %s4537_s25 = sphi %s4617_s25, %s6155_s25   ;;  %s4533_s24 = sphi %s4615_s24, %s6154_s24  }
   0x4   : > { %s4640_s30 = sadd.s32 1, %s4545_s27   ;;  %s179_s8 = sadd.s32 1, %s4541_s26 }
   0x5   : > { %s176_s9 = ssub.s32 %s4545_s27, %s4640_s30  ;;  %p189_p0 = scmp.ne.s32.totalorder %s4541_s26, %s4537_s25 }
   0x6   : > { %p177_p1 = scmp.eq.s32.totalorder %s176_s9, 0  ;;  %p190_p2 = scmp.eq.s32.totalorder %s4636_s28, 1 }
   0x7   : > { %p195_p3 = scmp.ne.s32.totalorder %s4537_s25, %s4533_s24  ;;  %p196_p4 = scmp.eq.s32.totalorder %s4112_s29, 1 }
   0x8   : > { %s4651_s10 = scalar_select %p177_p1, %s4541_s26, %s179_s8  }
   0x9   : > { %p4653_p5 = por %p190_p2, %p189_p0  ;;  %p4657_p6 = por %p196_p4, %p195_p3 }
   0xa   : > { %p4115_p7 = scmp.ge.s32.totalorder %s4545_s27, 1  ;;  %p240_p8 = scmp.lt.s32.totalorder %s4545_s27, 3 }
   0xc   : > { %p241_p9 = pnand %p4115_p7, %p240_p8 }
   0xd   : > { %p272_p10 = scmp.lt.s32.totalorder (!%p241_p9), %s4636_s28, 1  ;;  %v4547_v0 = vmov (!%p241_p9), 0.0   ;;  %v4548_v1 = vmov (!%p241_p9), 0   ;;  %v4121_v2 = vld [vmem:[%s5879_s2 + $0x4] sm:$0xf] (!%p241_p9)  ;;  %vm5885_vm0 = vcmask (!%p241_p9), 64512   ;;  %v279_v40 = vlaneseq (!%p241_p9) }
   0xe   : > { %244 = sbr.rel (%p241_p9) target bundleno = 2618 (0xa3a), region = 48  ;;  %482 = vmatprep.mubr.f32.mxu1 (!%p241_p9), %v4547_v0  ;;  %4445 = vset.pattern.permute.xlu0 (!%p241_p9), %v4548_v1  ;;  %v4120_v5 = vld [vmem:[%s5878_s1 + $0x4] sm:$0xf] (!%p241_p9)  ;;  %vm5900_vm1 = vcmask (!%p241_p9), 1043456   ;;  %v4174_v23 = vld [vmem:[%s5878_s1 + $0x8] sm:$0xf] (!%p241_p9) }
   0xf   : > { %412 = vperm.xlu0 (!%p241_p9), %4445, %v4121_v2   ;;  %369 = vmatprep.mubr.f32.mxu0 (!%p241_p9), %v4547_v0  ;;  %v294_v32 = vld [vmem:[%s5878_s1] sm:$0xf] (!%p241_p9)  ;;  %s4549_s9 = smov (!%p241_p9), 45   ;;  %s4550_s13 = smov (!%p241_p9), 48   ;;  %v4231_v38 = vld [vmem:[%s5879_s2 + $0xc] sm:$0xf] (!%p241_p9) }
  0x10   : > { %4446 = vset.pattern.permute.xlu1 (!%p241_p9), %v4548_v1  ;;  %s4551_s14 = smov (!%p241_p9), 83   ;;  %s4554_s17 = smov (!%p241_p9), 77   ;;  %v4175_v39 = vld [vmem:[%s5879_s2 + $0x8] sm:$0xf] (!%p241_p9)  ;;  %v4728_v41 = vand.u32 (!%p241_p9), 127, %v279_v40 }
  0x11   : > { %s4555_s20 = smov (!%p241_p9), 3   ;;  %s4556_s21 = smov (!%p241_p9), 125   ;;  %v4146_v55 = vld [vmem:[%s5880_s3 + $0x10] sm:$0xf] (!%p241_p9) }
  0x12   : > { %v281_v42 = vadd.s32 (!%p241_p9), 128, %v4728_v41  ;;  %v282_v43 = vcvt.s32.f32 (!%p241_p9), %v4728_v41  ;;  %s4559_s22 = smov (!%p241_p9), 16   ;;  %s4560_s23 = smov (!%p241_p9), 90  }
  0x13   : > { %s4561_s29 = smov (!%p241_p9), 25   ;;  %s4562_s8 = smov (!%p241_p9), 6  }
  0x14   : > { %v283_v44 = vcvt.s32.f32 (!%p241_p9), %v281_v42  ;;  %v284_v45 = vadd.f32 (!%p241_p9), 0.5, %v282_v43  ;;  %v4142_v42 = vld [vmem:[%s5880_s3 + $0xc] sm:$0xf] (!%p241_p9)  ;;  %s4569_s18 = smov (!%p241_p9), 121  }
  0x15   : > { %s273_s15 = scalar_select %p272_p10, %s4636_s28, 1 }
  0x16   : > { %v285_v46 = vadd.f32 0.5, %v283_v44  ;;  %v286_v47 = vmul.f32 0.0625, %v284_v45 }
  0x17   : > { %s4313_s16 = sshll.u32 %s273_s15, 4  ;;  %s4552_s15 = smov 80  }
  0x18   : > { %s276_s19 = scalar_lea.vmem %s5877_s0, %s4313_s16  ;;  %s4553_s16 = smov 51   ;;  %v287_v48 = vmul.f32 0.0625, %v285_v46  ;;  %v4732_v49 = vfloor.f32 %v286_v47 }
  0x19   : > { %v4673_v3 = vld [vmem:[%s276_s19 + $0x8] sm:$0xff]  ;;  %v4675_v4 = vld [vmem:[%s276_s19] sm:$0xff]  ;;  %s4570_s19 = smov 26  }
  0x1a   : > { %418 = vmatprep.subr.mxu1 %v4673_v3  ;;  %305 = vmatprep.subr.mxu0 %v4673_v3  ;;  %v4734_v50 = vfloor.f32 %v287_v48  ;;  %v290_v51 = vmul.f32 16.0, %v4732_v49  ;;  %vm526_vm4 = vcmp.ge.f32.partialorder %v4732_v49, 3.0  ;;  %vm528_vm5 = vcmp.le.f32.partialorder %v4732_v49, 18.0 }
  0x1b   : > { %419 = vmatpush1.msra.mxu1 %v4675_v4  ;;  %306 = vmatpush1.msra.mxu0 %v4675_v4  ;;  %vm4746_vm8 = vmand %vm526_vm4, %vm528_vm5 }
  0x1c   : > { %4122 = vmatmul.mubr.msk.f32.vlgmr.msra.gmra.mrb[0].mxu1 %vm5885_vm0, %v4120_v5  ;;  %1485 = vmatprep.subr.mxu1 %v4673_v3  ;;  %v291_v52 = vmul.f32 16.0, %v4734_v50  ;;  %v4738_v53 = vsub.f32 %v282_v43, %v290_v51  ;;  %vm527_vm6 = vcmp.ge.f32.partialorder %v4734_v50, 3.0  ;;  %vm529_vm7 = vcmp.le.f32.partialorder %v4734_v50, 18.0 }
  0x1d   : > { %1486 = vmatpush1.msra.mxu1 %v4675_v4  ;;  %1549 = vmatprep.mubr.f32.mxu1 %v4547_v0  ;;  %vm4751_vm10 = vmand %vm527_vm6, %vm529_vm7  ;;  %vm551_vm6 = vcmp.lt.s32.totalorder %v4728_v41, 48 }
  0x1e   : > { %4119 = vmatmul.mubr.msk.f32.vlgmr.msra.gmra.mrb[0].mxu0 %vm5885_vm0, %v294_v32  ;;  %v4740_v54 = vsub.f32 %v283_v44, %v291_v52  ;;  %vm5887_vm9 = vcmp.ge.f32.partialorder %v4738_v53, 0.0  ;;  %vm5886_vm13 = vcmp.le.f32.partialorder %v4738_v53, 15.0  ;;  %vm532_vm4 = vcmp.ge.f32.partialorder %v4738_v53, 3.0 }
  0x1f   : > { %644 = vmatprep.mubr.f32.mxu0 %v4547_v0  ;;  %vm556_vm12 = vmand %vm4746_vm8, %vm5887_vm9  ;;  %vm5895_vm9 = vcmask 31744  }
  0x20   : > { %4176 = vmatmul.mubr.msk.f32.vlgmr.msra.gmra.mrb[2].mxu1 %vm5885_vm0, %v4174_v23  ;;  %vm5889_vm11 = vcmp.ge.f32.partialorder %v4740_v54, 0.0  ;;  %vm5888_vm15 = vcmp.le.f32.partialorder %v4740_v54, 15.0  ;;  %vm5892_vm5 = vcmp.ge.f32.partialorder %v4740_v54, 3.0  ;;  %vm534_vm7 = vmand %vm4746_vm8, %vm532_vm4  ;;  %vm5891_vm0 = vcmp.le.f32.partialorder %v4740_v54, 18.0 }
  0x21   : > { %1707 = vmatprep.mubr.f32.mxu1 %v4547_v0  ;;  %vm557_vm14 = vmand %vm4751_vm10, %vm5889_vm11 }
  0x8e   : > { %v413_v6 = vpop.permute.xlu0 %412 }
  0xef   : > { %v484_v7 = vpop.f32.mrb[0].mxu1 }
  0xf0   : > { %v485_v8 = vadd.f32 %v484_v7, %v413_v6  ;;  %v486_v9 = vpop.f32.mrb[1].mxu1  ;;  %v4127_v7 = vld [vmem:[%s5880_s3 + $0x4] sm:$0xf] }
  0xf1   : > { %v487_v10 = vadd.f32 %v486_v9, %v413_v6 }
  0xf2   : > { %v489_v11 = vsel %vm5900_vm1, %v485_v8, 0.0 }
  0xf3   : > { %v490_v12 = vsel %vm5900_vm1, %v487_v10, 0.0  ;;  %v4773_v58 = vpop.f32.mrb[2].mxu1 }
  0xf4   : > { %v491_v13 = vadd.f32 %v490_v12, %v489_v11  ;;  %v4782_v61 = vpop.f32.mrb[3].mxu1 }
  0xf6   : > { %492 = vadd.xlane.f32.xlu0 %v491_v13 }
 0x183   : > { %v493_v14 = vpop.xlane.xlu0 %492 }
 0x184   : > { %v494_v15 = vmul.f32 0.00390625, %v493_v14  ;;  %v5926_v14 = vmov 0 }
 0x186   : > { %v495_v16 = vsub.f32 %v485_v8, %v494_v15  ;;  %v496_v17 = vsub.f32 %v487_v10, %v494_v15 }
 0x188   : > { %v497_v18 = vmul.f32 %v495_v16, %v495_v16  ;;  %v498_v19 = vmul.f32 %v496_v17, %v496_v17 }
 0x18a   : > { %v499_v20 = vsel %vm5900_vm1, %v497_v18, 0.0  ;;  %v500_v21 = vsel %vm5900_vm1, %v498_v19, 0.0 }
 0x18b   : > { %v501_v22 = vadd.f32 %v500_v21, %v499_v20  ;;  %v546_v20 = vld [vmem:[%s5880_s3] sm:$0xf] }
 0x18d   : > { %502 = vadd.xlane.f32.xlu1 %v501_v22 }
 0x21a   : > { %v503_v24 = vpop.xlane.xlu1 %502 }
 0x21b   : > { %v504_v25 = vmul.f32 0.00390625, %v503_v24 }
 0x21d   : > { %v505_v26 = vadd.f32 1e-05, %v504_v25 }
 0x21f   : > { %4447 = vrsqrt.f32 %v505_v26  ;;  %vm508_vm2 = vcmp.eq.f32.partialorder %v505_v26, inf  ;;  %v511_v29 = vand.u32 2147483648, %v505_v26  ;;  %vm510_vm3 = vcmp.eq.f32.partialorder %v505_v26, 0.0 }
 0x229   : > { %v4448_v27 = vpop.eup %4447 }
 0x22a   : > { %v507_v28 = vmul.f32 %v4448_v27, %v505_v26 }
 0x22c   : > { %v509_v30 = vsel %vm508_vm2, %v505_v26, %v507_v28  ;;  %vm560_vm2 = vmand %vm556_vm12, %vm5886_vm13  ;;  %vm5890_vm12 = vcmp.le.f32.partialorder %v4738_v53, 18.0  ;;  %vm5894_vm13 = vcmp.ge.f32.partialorder %v4740_v54, -3.0 }
 0x22d   : > { %v512_v31 = vsel %vm510_vm3, %v511_v29, %v509_v30  ;;  %vm561_vm3 = vmand %vm557_vm14, %vm5888_vm15  ;;  %v4125_v59 = vsel %vm560_vm2, 1.0, %v4547_v0  ;;  %vm5893_vm2 = vcmp.ge.f32.partialorder %v4738_v53, -3.0  ;;  %vm742_vm15 = vcmp.le.f32.partialorder %v4738_v53, 12.0  ;;  %v4136_v30 = vld [vmem:[%s5880_s3 + $0x8] sm:$0xf] }
 0x22e   : > { %4449 = vrcp.f32 %v512_v31  ;;  %v4126_v60 = vsel %vm561_vm3, 1.0, %v4547_v0  ;;  %vm535_vm14 = vmand %vm4751_vm10, %vm5892_vm5  ;;  %vm845_vm5 = vcmp.le.f32.partialorder %v4732_v49, 15.0 }
 0x22f   : > { %vm4792_vm3 = vmand %vm534_vm7, %vm5890_vm12  ;;  %vm5896_vm12 = vcmp.le.f32.partialorder %v4740_v54, 12.0 }
 0x230   : > { %vm740_vm7 = vmand %vm4746_vm8, %vm5893_vm2  ;;  %v4123_v9 = vsel %vm4792_vm3, 1.0, %v4547_v0  ;;  %vm846_vm2 = vcmp.le.f32.partialorder %v4734_v50, 15.0  ;;  %vm735_vm3 = vcmp.lt.s32.totalorder %v4728_v41, 45 }
 0x231   : > { %vm741_vm11 = vmand %vm4751_vm10, %vm5894_vm13  ;;  %vm844_vm10 = vcmp.ge.f32.partialorder %v4734_v50, 0.0 }
 0x232   : > { %vm744_vm8 = vmand %vm740_vm7, %vm742_vm15 }
 0x233   : > { %vm745_vm13 = vmand %vm741_vm11, %vm5896_vm12  ;;  %v4134_v18 = vsel %vm744_vm8, 1.0, %v4547_v0  ;;  %vm5930_vm11 = vcmp.ge.f32.partialorder %v4740_v54, 3.0 }
 0x234   : > { %v4135_v19 = vsel %vm745_vm13, 1.0, %v4547_v0 }
 0x238   : > { %v4450_v33 = vpop.eup %4449 }
 0x239   : > { %v515_v34 = vmul.f32 %v4450_v33, %v495_v16  ;;  %v516_v35 = vmul.f32 %v4450_v33, %v496_v17  ;;  %v5928_v17 = vmov 0 }
 0x23b   : > { %v4702_v36 = vmax.f32 %v515_v34, 0.0  ;;  %v4704_v37 = vmax.f32 %v516_v35, 0.0 }
 0x23d   : > { %733 = vrot.lane.b32.xlu0 %v4704_v37, %s4549_s9  ;;  %547 = vrot.lane.b32.xlu1 %v4702_v36, %s4550_s13 }
 0x241   : > { %1130 = vrot.lane.b32.xlu0 %v4704_v37, %s4551_s14  ;;  %549 = vrot.lane.b32.xlu1 %v4704_v37, %s4550_s13  ;;  %s4564_s13 = smov 9  }
 0x245   : > { %1237 = vrot.lane.b32.xlu0 %v4704_v37, %s4552_s15  ;;  %519 = vrot.lane.b32.xlu1 %v4702_v36, %s4553_s16 }
 0x249   : > { %1338 = vrot.lane.b32.xlu0 %v4704_v37, %s4554_s17  ;;  %521 = vrot.lane.b32.xlu1 %v4704_v37, %s4553_s16  ;;  %s4557_s16 = smov 96  }
 0x24d   : > { %2537 = vperm.xlu0 %4445, %v4231_v38   ;;  %731 = vrot.lane.b32.xlu1 %v4702_v36, %s4549_s9  ;;  %s4563_s9 = smov 7  }
 0x251   : > { %836 = vrot.lane.b32.xlu1 %v4702_v36, %s4555_s20 }
 0x255   : > { %838 = vrot.lane.b32.xlu1 %v4704_v37, %s4555_s20  ;;  %s4571_s20 = smov 112  }
 0x259   : > { %1027 = vrot.lane.b32.xlu1 %v4702_v36, %s4556_s21 }
 0x25d   : > { %1029 = vrot.lane.b32.xlu1 %v4704_v37, %s4556_s21  ;;  %s4572_s21 = smov 103  }
 0x261   : > { %1128 = vrot.lane.b32.xlu1 %v4702_v36, %s4551_s14  ;;  %s4565_s14 = smov 122  }
 0x265   : > { %1235 = vrot.lane.b32.xlu1 %v4702_v36, %s4552_s15  ;;  %s4566_s15 = smov 38  }
 0x269   : > { %1336 = vrot.lane.b32.xlu1 %v4702_v36, %s4554_s17  ;;  %s4558_s17 = smov 102  }
 0x26d   : > { %1479 = vperm.xlu1 %4446, %v4175_v39  }
 0x2af   : > { %v548_v57 = vpop.permute.xlu1 %547  ;;  %v734_v21 = vpop.permute.xlu0 %733 }
 0x2b3   : > { %v550_v62 = vpop.permute.xlu1 %549  ;;  %v1131_v47 = vpop.permute.xlu0 %1130 }
 0x2b4   : > { %v552_v63 = vsel %vm551_vm6, %v548_v57, %v550_v62  ;;  %v553_v1 = vsel %vm551_vm6, %v550_v62, %v548_v57  ;;  %vm539_vm6 = vmand %vm535_vm14, %vm5891_vm0  ;;  %vm523_vm14 = vcmp.lt.s32.totalorder %v4728_v41, 51  ;;  %vm843_vm0 = vcmp.ge.f32.partialorder %v4732_v49, 0.0 }
 0x2b5   : > { %v566_v2 = vmul.f32 %v4125_v59, %v553_v1  ;;  %v567_v5 = vmul.f32 %v4126_v60, %v552_v63  ;;  %v4124_v10 = vsel %vm539_vm6, 1.0, %v4547_v0  ;;  %vm4834_vm6 = vmand %vm844_vm10, %vm846_vm2  ;;  %vm5932_vm2 = vcmp.le.f32.partialorder %v4738_v53, 18.0 }
 0x2b6   : > { %v5929_v17 = vsel %vm4834_vm6, 4294967295, %v5928_v17  ;;  %vm850_vm13 = vmand %vm4834_vm6, %vm5930_vm11  ;;  %vm840_vm10 = vcmp.lt.s32.totalorder %v4728_v41, 3 }
 0x2b7   : > { %v520_v8 = vpop.permute.xlu1 %519  ;;  %4128 = vmatprep.subr.msk.mxu0 %vm5900_vm1, %v567_v5  ;;  %v1238_v60 = vpop.permute.xlu0 %1237  ;;  %v4152_v5 = vld [vmem:[%s5880_s3 + $0x14] sm:$0xf] }
 0x2b8   : > { %4129 = vmatpush1.msk.msra.mxu0 %vm5900_vm1, %v566_v2 }
 0x2b9   : > { %4130 = vmatmul.mubr.msk.f32.vlgmr.msra.gmra.mrb[2].mxu0 %vm5895_vm9, %v4127_v7  ;;  %vm4829_vm9 = vmand %vm843_vm0, %vm845_vm5  ;;  %vm5931_vm5 = vcmask 31744  }
 0x2ba   : > { %724 = vmatprep.mubr.f32.mxu0 %v4547_v0  ;;  %v5927_v14 = vsel %vm4829_vm9, 4294967295, %v5926_v14  ;;  %vm849_vm0 = vmand %vm4829_vm9, %vm532_vm4 }
 0x2bb   : > { %v522_v11 = vpop.permute.xlu1 %521  ;;  %vm851_vm7 = vmand %vm849_vm0, %vm5932_vm2 }
 0x2bc   : > { %v524_v12 = vsel %vm523_vm14, %v520_v8, %v522_v11  ;;  %v525_v13 = vsel %vm523_vm14, %v522_v11, %v520_v8  ;;  %vm5933_vm14 = vcmp.le.f32.partialorder %v4740_v54, 18.0  ;;  %v4140_v28 = vsel %vm851_vm7, 1.0, %v4547_v0  ;;  %vm5935_vm11 = vmmov %vm5931_vm5 }
 0x2bd   : > { %v544_v15 = vmul.f32 %v4123_v9, %v525_v13  ;;  %v545_v16 = vmul.f32 %v4124_v10, %v524_v12  ;;  %vm852_vm8 = vmand %vm850_vm13, %vm5933_vm14  ;;  %vm1136_vm13 = vcmp.ge.f32.partialorder %v4734_v50, -3.0  ;;  %vm1031_vm7 = vcmp.lt.s32.totalorder %v4728_v41, 125  ;;  %v1339_v9 = vpop.permute.xlu0 %1338 }
 0x2be   : > { %v4141_v29 = vsel %vm852_vm8, 1.0, %v4547_v0  ;;  %vm5938_vm8 = vcmp.ge.f32.partialorder %v4738_v53, -3.0 }
 0x2bf   : > { %v732_v22 = vpop.permute.xlu1 %731  ;;  %4131 = vmatprep.subr.msk.mxu0 %vm5900_vm1, %v545_v16 }
 0x2c0   : > { %v736_v23 = vsel %vm735_vm3, %v732_v22, %v734_v21  ;;  %v737_v24 = vsel %vm735_vm3, %v734_v21, %v732_v22  ;;  %4132 = vmatpush1.msk.msra.mxu0 %vm5900_vm1, %v544_v15  ;;  %vm5934_vm3 = vcmp.ge.f32.partialorder %v4740_v54, -3.0  ;;  %v4158_v15 = vld [vmem:[%s5880_s3 + $0x18] sm:$0xf] }
 0x2c1   : > { %v750_v25 = vmul.f32 %v4134_v18, %v737_v24  ;;  %v751_v26 = vmul.f32 %v4135_v19, %v736_v23  ;;  %4133 = vmatmul.mubr.msk.f32.vlgmr.msra.gmra.mrb[2].mxu0 %vm5931_vm5, %v546_v20  ;;  %vm1035_vm0 = vmand %vm4834_vm6, %vm5934_vm3  ;;  %vm1138_vm5 = vcmp.le.f32.partialorder %v4734_v50, 12.0  ;;  %vm5939_vm3 = vcmp.ge.f32.partialorder %v4740_v54, 3.0  ;;  %v4164_v24 = vld [vmem:[%s5880_s3 + $0x1c] sm:$0xf] }
 0x2c2   : > { %827 = vmatprep.mubr.f32.mxu0 %v4547_v0  ;;  %vm1037_vm2 = vmand %vm1035_vm0, %vm5896_vm12  ;;  %vm5940_vm12 = vcmp.le.f32.partialorder %v4740_v54, 18.0 }
 0x2c3   : > { %v837_v27 = vpop.permute.xlu1 %836  ;;  %4137 = vmatprep.subr.msk.mxu0 %vm5900_vm1, %v751_v26  ;;  %vm4882_vm14 = vmand %vm1136_vm13, %vm1138_vm5  ;;  %v4151_v40 = vsel %vm1037_vm2, 1.0, %v4547_v0  ;;  %vm1135_vm13 = vcmp.ge.f32.partialorder %v4732_v49, -3.0  ;;  %vm1137_vm5 = vcmp.le.f32.partialorder %v4732_v49, 12.0 }
 0x2c4   : > { %4138 = vmatpush1.msk.msra.mxu0 %vm5900_vm1, %v750_v25  ;;  %vm1142_vm0 = vmand %vm4882_vm14, %vm5939_vm3 }
 0x2c5   : > { %vm1144_vm3 = vmand %vm1142_vm0, %vm5940_vm12  ;;  %vm5944_vm0 = vcmask 31744  }
 0x2c6   : > { %v4157_v51 = vsel %vm1144_vm3, 1.0, %v4547_v0 }
 0x2c7   : > { %v839_v31 = vpop.permute.xlu1 %838 }
 0x2c8   : > { %v841_v32 = vsel %vm840_vm10, %v837_v27, %v839_v31  ;;  %v842_v33 = vsel %vm840_vm10, %v839_v31, %v837_v27  ;;  %vm1034_vm10 = vmand %vm4829_vm9, %vm5938_vm8  ;;  %vm1132_vm8 = vcmp.lt.s32.totalorder %v4728_v41, 83  ;;  %vm5913_vm9 = vcmp.ge.f32.partialorder %v4738_v53, 9.0 }
 0x2c9   : > { %v857_v34 = vmul.f32 %v4140_v28, %v842_v33  ;;  %v858_v35 = vmul.f32 %v4141_v29, %v841_v32  ;;  %4139 = vmatmul.mubr.msk.f32.vlgmr.msra.gmra.mrb[2].mxu0 %vm5935_vm11, %v4136_v30  ;;  %vm1036_vm2 = vmand %vm1034_vm10, %vm742_vm15  ;;  %vm5943_vm10 = vcmp.ge.f32.partialorder %v4740_v54, 0.0 }
 0x2ca   : > { %934 = vmatprep.mubr.f32.mxu0 %v4547_v0  ;;  %v4150_v48 = vsel %vm1036_vm2, 1.0, %v4547_v0  ;;  %vm1239_vm2 = vcmp.lt.s32.totalorder %v4728_v41, 80 }
 0x2cb   : > { %v1028_v38 = vpop.permute.xlu1 %1027  ;;  %4143 = vmatprep.subr.msk.mxu0 %vm5900_vm1, %v858_v35 }
 0x2cc   : > { %4144 = vmatpush1.msk.msra.mxu0 %vm5900_vm1, %v857_v34  ;;  %v2538_v35 = vpop.permute.xlu0 %2537 }
 0x2cd   : > { %4147 = vmatprep.subr.msk.mxu0 %vm5900_vm1, %v4704_v37 }
 0x2cf   : > { %v1030_v43 = vpop.permute.xlu1 %1029 }
 0x2d0   : > { %v1033_v37 = vsel %vm1031_vm7, %v1030_v43, %v1028_v38 }
 0x2d1   : > { %v1043_v44 = vmul.f32 %v4151_v40, %v1033_v37  ;;  %4145 = vmatmul.mubr.msk.f32.vlgmr.msra.gmra.mrb[2].mxu0 %vm5935_vm11, %v4142_v42  ;;  %vm4912_vm11 = vmand %vm1135_vm13, %vm1137_vm5  ;;  %vm5945_vm13 = vcmp.le.f32.partialorder %v4738_v53, 18.0 }
 0x2d2   : > { %4148 = vmatpush1.msk.msra.mxu0 %vm5900_vm1, %v4702_v36  ;;  %1018 = vmatprep.mubr.f32.mxu0 %v4547_v0  ;;  %v1032_v36 = vsel %vm1031_vm7, %v1028_v38, %v1030_v43  ;;  %vm1141_vm12 = vmand %vm4912_vm11, %vm532_vm4  ;;  %vm5946_vm4 = vcmp.le.f32.partialorder %v4740_v54, 15.0 }
 0x2d3   : > { %v1129_v45 = vpop.permute.xlu1 %1128  ;;  %4153 = vmatprep.subr.msk.mxu0 %vm5900_vm1, %v1043_v44  ;;  %v1042_v56 = vmul.f32 %v4150_v48, %v1032_v36  ;;  %vm1243_vm7 = vmand %vm4882_vm14, %vm5943_vm10 }
 0x2d4   : > { %v1134_v52 = vsel %vm1132_vm8, %v1131_v47, %v1129_v45  ;;  %vm1143_vm5 = vmand %vm1141_vm12, %vm5945_vm13  ;;  %v1133_v63 = vsel %vm1132_vm8, %v1129_v45, %v1131_v47  ;;  %vm5947_vm12 = vcmp.ge.f32.partialorder %v4738_v53, 0.0  ;;  %vm5949_vm13 = vcmp.le.f32.partialorder %v4738_v53, 15.0 }
 0x2d5   : > { %v1150_v57 = vmul.f32 %v4157_v51, %v1134_v52  ;;  %vm1245_vm3 = vmand %vm1243_vm7, %vm5946_vm4  ;;  %v4156_v62 = vsel %vm1143_vm5, 1.0, %v4547_v0  ;;  %vm5948_vm7 = vcmp.ge.f32.partialorder %v4740_v54, -3.0  ;;  %vm1340_vm4 = vcmp.lt.s32.totalorder %v4728_v41, 77 }
 0x2d6   : > { %v4163_v1 = vsel %vm1245_vm3, 1.0, %v4547_v0  ;;  %vm1242_vm10 = vmand %vm4912_vm11, %vm5947_vm12  ;;  %v1149_v6 = vmul.f32 %v4156_v62, %v1133_v63  ;;  %vm5950_vm3 = vcmp.le.f32.partialorder %v4740_v54, 12.0 }
 0x2d7   : > { %v1236_v59 = vpop.permute.xlu1 %1235  ;;  %vm1344_vm8 = vmand %vm4882_vm14, %vm5948_vm7  ;;  %vm5951_vm14 = vcmp.ge.f32.partialorder %v4738_v53, -3.0 }
 0x2d8   : > { %v1241_v2 = vsel %vm1239_vm2, %v1238_v60, %v1236_v59  ;;  %vm1244_vm5 = vmand %vm1242_vm10, %vm5949_vm13  ;;  %v1240_v11 = vsel %vm1239_vm2, %v1236_v59, %v1238_v60 }
 0x2d9   : > { %4149 = vmatmul.mubr.msk.f32.vlgmr.msra.gmra.mrb[2].mxu0 %vm5944_vm0, %v4146_v55  ;;  %v1251_v7 = vmul.f32 %v4163_v1, %v1241_v2  ;;  %vm1346_vm12 = vmand %vm1344_vm8, %vm5950_vm3  ;;  %v4162_v10 = vsel %vm1244_vm5, 1.0, %v4547_v0  ;;  %vm5955_vm8 = vcmask 64512   ;;  %vm1593_vm5 = vcmp.ge.f32.partialorder %v4732_v49, 6.0 }
 0x2da   : > { %4154 = vmatpush1.msk.msra.mxu0 %vm5900_vm1, %v1042_v56  ;;  %1119 = vmatprep.mubr.f32.mxu0 %v4547_v0  ;;  %v4169_v12 = vsel %vm1346_vm12, 1.0, %v4547_v0  ;;  %vm1343_vm10 = vmand %vm4912_vm11, %vm5951_vm14  ;;  %v1250_v16 = vmul.f32 %v4162_v10, %v1240_v11  ;;  %vm1594_vm3 = vcmp.ge.f32.partialorder %v4734_v50, 6.0  ;;  %vm1596_vm12 = vcmp.le.f32.partialorder %v4734_v50, 21.0 }
 0x2db   : > { %4159 = vmatprep.subr.msk.mxu0 %vm5900_vm1, %v1150_v57  ;;  %v1337_v8 = vpop.permute.xlu1 %1336  ;;  %vm5952_vm7 = vmmov %vm5944_vm0 }
 0x2dc   : > { %v1342_v13 = vsel %vm1340_vm4, %v1339_v9, %v1337_v8  ;;  %vm1345_vm2 = vmand %vm1343_vm10, %vm742_vm15  ;;  %v1341_v21 = vsel %vm1340_vm4, %v1337_v8, %v1339_v9  ;;  %vm1595_vm4 = vcmp.le.f32.partialorder %v4732_v49, 21.0 }
 0x2dd   : > { %v1352_v18 = vmul.f32 %v4169_v12, %v1342_v13  ;;  %v4168_v20 = vsel %vm1345_vm2, 1.0, %v4547_v0  ;;  %vm5953_vm15 = vmmov %vm5944_vm0 }
 0x2de   : > { %v1351_v27 = vmul.f32 %v4168_v20, %v1341_v21  ;;  %vm5954_vm11 = vmmov %vm5944_vm0 }
 0x2df   : > { %vm5046_vm14 = vmand %vm1593_vm5, %vm1595_vm4  ;;  %vm5897_vm5 = vcmp.ge.f32.partialorder %v4740_v54, 6.0  ;;  %vm5963_vm4 = vcmp.le.f32.partialorder %v4740_v54, 15.0 }
 0x2e0   : > { %vm5050_vm10 = vmand %vm1594_vm3, %vm1596_vm12 }
 0x2e1   : > { %4155 = vmatmul.mubr.msk.f32.vlgmr.msra.gmra.mrb[2].mxu0 %vm5944_vm0, %v4152_v5 }
 0x2e2   : > { %4160 = vmatpush1.msk.msra.mxu0 %vm5900_vm1, %v1149_v6  ;;  %1226 = vmatprep.mubr.f32.mxu0 %v4547_v0 }
 0x2e3   : > { %4165 = vmatprep.subr.msk.mxu0 %vm5900_vm1, %v1251_v7 }
 0x2e9   : > { %4161 = vmatmul.mubr.msk.f32.vlgmr.msra.gmra.mrb[2].mxu0 %vm5952_vm7, %v4158_v15  ;;  %vm5960_vm7 = vcmp.ge.f32.partialorder %v4738_v53, 0.0 }
 0x2ea   : > { %4166 = vmatpush1.msk.msra.mxu0 %vm5900_vm1, %v1250_v16  ;;  %1327 = vmatprep.mubr.f32.mxu0 %v4547_v0  ;;  %vm1622_vm2 = vmand %vm5046_vm14, %vm5960_vm7  ;;  %vm5899_vm7 = vcmp.le.f32.partialorder %v4738_v53, 21.0 }
 0x2eb   : > { %4171 = vmatprep.subr.msk.mxu0 %vm5900_vm1, %v1352_v18 }
 0x2ec   : > { %v1480_v19 = vpop.permute.xlu1 %1479 }
 0x2ed   : > { %v1552_v22 = vadd.f32 %v4773_v58, %v1480_v19  ;;  %v1554_v23 = vadd.f32 %v4782_v61, %v1480_v19  ;;  %v4170_v58 = vld [vmem:[%s5880_s3 + $0x20] sm:$0xf]  ;;  %v4230_v61 = vld [vmem:[%s5878_s1 + $0xc] sm:$0xf] }
 0x2ef   : > { %v1556_v25 = vsel %vm5900_vm1, %v1552_v22, 0.0  ;;  %v1557_v26 = vsel %vm5900_vm1, %v1554_v23, 0.0 }
 0x2f0   : > { %v1558_v28 = vadd.f32 %v1557_v26, %v1556_v25 }
 0x2f1   : > { %4167 = vmatmul.mubr.msk.f32.vlgmr.msra.gmra.mrb[2].mxu0 %vm5953_vm15, %v4164_v24  ;;  %vm5961_vm15 = vcmp.ge.f32.partialorder %v4740_v54, 0.0 }
 0x2f2   : > { %4172 = vmatpush1.msk.msra.mxu0 %vm5900_vm1, %v1351_v27  ;;  %1428 = vmatprep.mubr.f32.mxu0 %v4547_v0 }
 0x2f3   : > { %2543 = vmatprep.subr.mxu0 %v4673_v3  ;;  %1559 = vadd.xlane.f32.xlu1 %v1558_v28  ;;  %v5012_v3 = vpop.f32.mrb[0].mxu0 }
 0x2f4   : > { %v5014_v29 = vpop.f32.mrb[1].mxu0 }
 0x2f9   : > { %4173 = vmatmul.mubr.msk.f32.vlgmr.msra.gmra.mrb[2].mxu0 %vm5954_vm11, %v4170_v58  ;;  %vm1623_vm11 = vmand %vm5050_vm10, %vm5961_vm15 }
 0x2fa   : > { %2544 = vmatpush1.msra.mxu0 %v4675_v4  ;;  %2607 = vmatprep.mubr.f32.mxu0 %v4547_v0  ;;  %vm1625_vm3 = vmand %vm1623_vm11, %vm5963_vm4  ;;  %vm1619_vm11 = vcmp.lt.s32.totalorder %v4728_v41, 96 }
 0x2fb   : > { %vm1602_vm15 = vmand %vm5050_vm10, %vm5897_vm5  ;;  %v4181_v25 = vsel %vm1625_vm3, 1.0, %v4547_v0  ;;  %vm1590_vm5 = vcmp.lt.s32.totalorder %v4728_v41, 102 }
 0x2fd   : > { %4232 = vmatmul.mubr.msk.f32.vlgmr.msra.gmra.mrb[4].mxu0 %vm5955_vm8, %v4230_v61  ;;  %vm5901_vm8 = vcmp.ge.f32.partialorder %v4738_v53, 6.0 }
 0x2fe   : > { %2765 = vmatprep.mubr.f32.mxu0 %v4547_v0  ;;  %vm1601_vm12 = vmand %vm5046_vm14, %vm5901_vm8  ;;  %vm5907_vm8 = vcmp.le.f32.partialorder %v4738_v53, 9.0 }
 0x380   : > { %v1560_v30 = vpop.xlane.xlu1 %1559 }
 0x381   : > { %v1561_v31 = vmul.f32 0.00390625, %v1560_v30 }
 0x383   : > { %v1562_v4 = vsub.f32 %v1552_v22, %v1561_v31  ;;  %v1563_v34 = vsub.f32 %v1554_v23, %v1561_v31 }
 0x385   : > { %v1564_v43 = vmul.f32 %v1562_v4, %v1562_v4  ;;  %v1565_v37 = vmul.f32 %v1563_v34, %v1563_v34 }
 0x387   : > { %v1566_v47 = vsel %vm5900_vm1, %v1564_v43, 0.0  ;;  %v1567_v48 = vsel %vm5900_vm1, %v1565_v37, 0.0 }
 0x388   : > { %v1568_v36 = vadd.f32 %v1567_v48, %v1566_v47  ;;  %v4179_v47 = vld [vmem:[%s5880_s3 + $0x24] sm:$0xf] }
 0x3cc   : > { %v5016_v32 = vpop.f32.mrb[2].mxu0 }
 0x3cd   : > { %v5018_v33 = vpop.f32.mrb[3].mxu0 }
 0x3d0   : > { %v2609_v38 = vpop.f32.mrb[4].mxu0 }
 0x3d1   : > { %v2610_v39 = vadd.f32 %v2609_v38, %v2538_v35  ;;  %v2611_v40 = vpop.f32.mrb[5].mxu0 }
 0x3d2   : > { %v2612_v42 = vadd.f32 %v2611_v40, %v2538_v35  ;;  %v4182_v35 = vld [vmem:[%s5880_s3 + $0x28] sm:$0xf] }
 0x3d3   : > { %v2614_v44 = vsel %vm5900_vm1, %v2610_v39, 0.0 }
 0x3d4   : > { %v2615_v45 = vsel %vm5900_vm1, %v2612_v42, 0.0 }
 0x3d5   : > { %v2616_v46 = vadd.f32 %v2615_v45, %v2614_v44 }
 0x3d7   : > { %2617 = vadd.xlane.f32.xlu0 %v2616_v46 }
 0x3db   : > { %1569 = vadd.xlane.f32.xlu0 %v1568_v36 }
 0x464   : > { %v2618_v51 = vpop.xlane.xlu0 %2617 }
 0x465   : > { %v2619_v52 = vmul.f32 0.00390625, %v2618_v51 }
 0x467   : > { %v5024_v55 = vsub.f32 %v2610_v39, %v2619_v52  ;;  %v5026_v56 = vsub.f32 %v2612_v42, %v2619_v52 }
 0x468   : > { %v1570_v57 = vpop.xlane.xlu0 %1569 }
 0x469   : > { %v1571_v59 = vmul.f32 0.00390625, %v1570_v57  ;;  %v2622_v60 = vmul.f32 %v5024_v55, %v5024_v55  ;;  %v2623_v62 = vmul.f32 %v5026_v56, %v5026_v56 }
 0x46b   : > { %v1572_v63 = vadd.f32 1e-05, %v1571_v59  ;;  %v2624_v1 = vsel %vm5900_vm1, %v2622_v60, 0.0  ;;  %v2625_v2 = vsel %vm5900_vm1, %v2623_v62, 0.0  ;;  %v4229_v59 = vld [vmem:[%s5881_s4 + $0x4] sm:$0xf] }
 0x46c   : > { %v2626_v5 = vadd.f32 %v2625_v2, %v2624_v1  ;;  %v4285_v60 = vld [vmem:[%s5881_s4 + $0x8] sm:$0xf] }
 0x46d   : > { %4451 = vrsqrt.f32 %v1572_v63  ;;  %vm1575_vm0 = vcmp.eq.f32.partialorder %v1572_v63, inf  ;;  %v1578_v8 = vand.u32 2147483648, %v1572_v63  ;;  %vm1577_vm13 = vcmp.eq.f32.partialorder %v1572_v63, 0.0 }
 0x46e   : > { %2627 = vadd.xlane.f32.xlu1 %v2626_v5 }
 0x477   : > { %v4452_v6 = vpop.eup %4451 }
 0x478   : > { %v1574_v7 = vmul.f32 %v4452_v6, %v1572_v63 }
 0x47a   : > { %v1576_v9 = vsel %vm1575_vm0, %v1572_v63, %v1574_v7  ;;  %vm5962_vm0 = vcmp.le.f32.partialorder %v4738_v53, 15.0 }
 0x47b   : > { %v1579_v10 = vsel %vm1577_vm13, %v1578_v8, %v1576_v9  ;;  %vm1624_vm13 = vmand %vm1622_vm2, %vm5962_vm0  ;;  %vm5898_vm2 = vcmp.le.f32.partialorder %v4740_v54, 21.0 }
 0x47c   : > { %4453 = vrcp.f32 %v1579_v10  ;;  %vm1605_vm0 = vmand %vm1601_vm12, %vm5899_vm7  ;;  %v4180_v24 = vsel %vm1624_vm13, 1.0, %v4547_v0  ;;  %vm5964_vm13 = vcmask 31744   ;;  %vm5971_vm7 = vcmp.ge.f32.partialorder %v4740_v54, 0.0 }
 0x47d   : > { %vm1606_vm4 = vmand %vm1602_vm15, %vm5898_vm2  ;;  %v4177_v30 = vsel %vm1605_vm0, 1.0, %v4547_v0  ;;  %vm2651_vm15 = vcmp.ge.f32.partialorder %v4732_v49, 9.0  ;;  %vm2652_vm0 = vcmp.ge.f32.partialorder %v4734_v50, 9.0  ;;  %vm5906_vm2 = vcmp.ge.f32.partialorder %v4738_v53, -6.0 }
 0x47e   : > { %v4178_v31 = vsel %vm1606_vm4, 1.0, %v4547_v0  ;;  %vm5965_vm12 = vmmov %vm5964_vm13  ;;  %vm2654_vm4 = vcmp.le.f32.partialorder %v4734_v50, 24.0 }
 0x486   : > { %v4454_v11 = vpop.eup %4453 }
 0x487   : > { %v1582_v12 = vmul.f32 %v4454_v11, %v1562_v4  ;;  %v1583_v13 = vmul.f32 %v4454_v11, %v1563_v34 }
 0x489   : > { %v5034_v15 = vmax.f32 %v1582_v12, 0.0  ;;  %v5036_v16 = vmax.f32 %v1583_v13, 0.0 }
 0x48b   : > { %1617 = vrot.lane.b32.xlu1 %v5036_v16, %s4557_s16  ;;  %1615 = vrot.lane.b32.xlu0 %v5034_v15, %s4557_s16  ;;  %s4567_s16 = smov 119  }
 0x48f   : > { %1586 = vrot.lane.b32.xlu1 %v5034_v15, %s4558_s17  ;;  %1588 = vrot.lane.b32.xlu0 %v5036_v16, %s4558_s17  ;;  %s4568_s17 = smov 32  }
 0x4fb   : > { %v2628_v20 = vpop.xlane.xlu1 %2627 }
 0x4fc   : > { %v2629_v21 = vmul.f32 0.00390625, %v2628_v20 }
 0x4fd   : > { %v1616_v22 = vpop.permute.xlu0 %1615 }
 0x4fe   : > { %v2630_v23 = vadd.f32 1e-05, %v2629_v21  ;;  %v4238_v21 = vld [vmem:[%s5880_s3 + $0x4c] sm:$0xf] }
 0x4ff   : > { %v1618_v26 = vpop.permute.xlu1 %1617 }
 0x500   : > { %4455 = vrsqrt.f32 %v2630_v23  ;;  %v1620_v27 = vsel %vm1619_vm11, %v1616_v22, %v1618_v26  ;;  %v1621_v28 = vsel %vm1619_vm11, %v1618_v26, %v1616_v22  ;;  %vm2633_vm3 = vcmp.eq.f32.partialorder %v2630_v23, inf }
 0x501   : > { %v1630_v58 = vmul.f32 %v4180_v24, %v1621_v28  ;;  %v1631_v61 = vmul.f32 %v4181_v25, %v1620_v27  ;;  %v1589_v4 = vpop.permute.xlu0 %1588  ;;  %v2636_v44 = vand.u32 2147483648, %v2630_v23  ;;  %vm2653_vm11 = vcmp.le.f32.partialorder %v4732_v49, 24.0 }
 0x503   : > { %v1587_v34 = vpop.permute.xlu1 %1586  ;;  %4183 = vmatprep.subr.msk.mxu1 %vm5900_vm1, %v1631_v61 }
 0x504   : > { %v1591_v38 = vsel %vm1590_vm5, %v1587_v34, %v1589_v4  ;;  %v1592_v39 = vsel %vm1590_vm5, %v1589_v4, %v1587_v34  ;;  %4184 = vmatpush1.msk.msra.mxu1 %vm5900_vm1, %v1630_v58  ;;  %vm2635_vm5 = vcmp.eq.f32.partialorder %v2630_v23, 0.0  ;;  %v4191_v34 = vld [vmem:[%s5880_s3 + $0x2c] sm:$0xf] }
 0x505   : > { %v1611_v40 = vmul.f32 %v4177_v30, %v1592_v39  ;;  %v1612_v42 = vmul.f32 %v4178_v31, %v1591_v38  ;;  %4185 = vmatmul.mubr.msk.f32.vlgmr.msra.gmra.mrb[4].mxu1 %vm5964_vm13, %v4182_v35  ;;  %vm5154_vm13 = vmand %vm2651_vm15, %vm2653_vm11  ;;  %vm5972_vm15 = vcmp.le.f32.partialorder %v4738_v53, 15.0 }
 0x506   : > { %1787 = vmatprep.mubr.f32.mxu1 %v4547_v0 }
 0x507   : > { %4186 = vmatprep.subr.msk.mxu1 %vm5900_vm1, %v1612_v42 }
 0x508   : > { %4187 = vmatpush1.msk.msra.mxu1 %vm5900_vm1, %v1611_v40 }
 0x50a   : > { %v4456_v43 = vpop.eup %4455 }
 0x50b   : > { %v2632_v37 = vmul.f32 %v4456_v43, %v2630_v23 }
 0x50d   : > { %v2634_v45 = vsel %vm2633_vm3, %v2630_v23, %v2632_v37  ;;  %4188 = vmatmul.mubr.msk.f32.vlgmr.msra.gmra.mrb[4].mxu1 %vm5965_vm12, %v4179_v47  ;;  %vm5158_vm3 = vmand %vm2652_vm0, %vm2654_vm4  ;;  %vm5908_vm0 = vcmp.ge.f32.partialorder %v4740_v54, -6.0  ;;  %v4235_v47 = vld [vmem:[%s5880_s3 + $0x48] sm:$0xf] }
 0x50e   : > { %v2637_v46 = vsel %vm2635_vm5, %v2636_v44, %v2634_v45  ;;  %1890 = vmatprep.mubr.f32.mxu1 %v4547_v0  ;;  %vm5970_vm5 = vcmp.ge.f32.partialorder %v4738_v53, 0.0  ;;  %vm2681_vm1 = vmand %vm5158_vm3, %vm5971_vm7 }
 0x50f   : > { %4457 = vrcp.f32 %v2637_v46  ;;  %vm2680_vm12 = vmand %vm5154_vm13, %vm5970_vm5  ;;  %vm5973_vm5 = vcmp.le.f32.partialorder %v4740_v54, 15.0 }
 0x510   : > { %vm2682_vm11 = vmand %vm2680_vm12, %vm5972_vm15  ;;  %vm5909_vm12 = vcmp.le.f32.partialorder %v4740_v54, 9.0 }
 0x511   : > { %vm1803_vm4 = vmand %vm5046_vm14, %vm5906_vm2  ;;  %vm5910_vm14 = vcmp.ge.f32.partialorder %v4740_v54, 9.0  ;;  %vm2677_vm2 = vcmp.lt.s32.totalorder %v4728_v41, 16  ;;  %v4236_v5 = vsel %vm2682_vm11, 1.0, %v4547_v0  ;;  %vm5980_vm11 = vcmp.ge.f32.partialorder %v4738_v53, 6.0 }
 0x512   : > { %vm2683_vm6 = vmand %vm2681_vm1, %vm5973_vm5  ;;  %vm5912_vm5 = vcmp.le.f32.partialorder %v4738_v53, 24.0 }
 0x513   : > { %vm1804_vm7 = vmand %vm5050_vm10, %vm5908_vm0  ;;  %v4237_v6 = vsel %vm2683_vm6, 1.0, %v4547_v0  ;;  %vm5981_vm6 = vnez %v5927_v14 }
 0x514   : > { %vm5189_vm15 = vmand %vm1803_vm4, %vm5907_vm8  ;;  %vm5911_vm8 = vcmp.le.f32.partialorder %v4740_v54, 24.0 }
 0x515   : > { %vm2659_vm1 = vmand %vm5154_vm13, %vm5913_vm9  ;;  %v4189_v19 = vsel %vm5189_vm15, 1.0, %v4547_v0  ;;  %vm5989_vm15 = vcmp.le.f32.partialorder %v4738_v53, 21.0 }
 0x516   : > { %vm5202_vm10 = vmand %vm1804_vm7, %vm5909_vm12  ;;  %vm1798_vm12 = vcmp.lt.s32.totalorder %v4728_v41, 90 }
 0x517   : > { %vm2660_vm4 = vmand %vm5158_vm3, %vm5910_vm14  ;;  %v4190_v20 = vsel %vm5202_vm10, 1.0, %v4547_v0  ;;  %vm5914_vm10 = vcmp.ge.f32.partialorder %v4740_v54, -9.0 }
 0x518   : > { %vm5215_vm0 = vmand %vm2659_vm1, %vm5912_vm5  ;;  %vm5917_vm1 = vcmp.ge.f32.partialorder %v4738_v53, -9.0 }
 0x519   : > { %v4458_v48 = vpop.eup %4457  ;;  %vm1906_vm7 = vmand %vm5981_vm6, %vm5980_vm11  ;;  %v4233_v31 = vsel %vm5215_vm0, 1.0, %v4547_v0  ;;  %vm6001_vm0 = vcmask 1043456  }
 0x51a   : > { %v2640_v36 = vmul.f32 %v4458_v48, %v5024_v55  ;;  %v2641_v51 = vmul.f32 %v4458_v48, %v5026_v56  ;;  %v295_v55 = vld [vmem:[%s5879_s2] sm:$0xf]  ;;  %vm5226_vm14 = vmand %vm2660_vm4, %vm5911_vm8  ;;  %vm5985_vm4 = vnez %v5929_v17  ;;  %vm5988_vm8 = vcmask 1043456  }
 0x51b   : > { %v1437_v56 = vld [vmem:[%s5881_s4] sm:$0xf]  ;;  %vm5251_vm5 = vmand %vm1906_vm7, %vm5989_vm15  ;;  %vm5995_vm7 = vcmask 31744   ;;  %vm2648_vm15 = vcmp.lt.s32.totalorder %v4728_v41, 25  ;;  %v4234_v4 = vsel %vm5226_vm14, 1.0, %v4547_v0  ;;  %vm5916_vm14 = vcmp.le.f32.partialorder %v4740_v54, 6.0 }
 0x51c   : > { %v5104_v52 = vmax.f32 %v2640_v36, 0.0  ;;  %v5106_v57 = vmax.f32 %v2641_v51, 0.0  ;;  %vm5992_vm9 = vmmov %vm5988_vm8  ;;  %v4195_v45 = vsel %vm5251_vm5, 1.0, %v4547_v0  ;;  %v4219_v17 = vld [vmem:[%s5880_s3 + $0x40] sm:$0xf] }
 0x51e   : > { %2673 = vrot.lane.b32.xlu1 %v5104_v52, %s4559_s22  ;;  %2675 = vrot.lane.b32.xlu0 %v5106_v57, %s4559_s22 }
 0x522   : > { %1794 = vrot.lane.b32.xlu1 %v5034_v15, %s4560_s23  ;;  %1796 = vrot.lane.b32.xlu0 %v5036_v16, %s4560_s23 }
 0x526   : > { %2644 = vrot.lane.b32.xlu1 %v5104_v52, %s4561_s29  ;;  %2646 = vrot.lane.b32.xlu0 %v5106_v57, %s4561_s29 }
 0x52a   : > { %1899 = vrot.lane.b32.xlu1 %v5034_v15, %s4562_s8  ;;  %1901 = vrot.lane.b32.xlu0 %v5036_v16, %s4562_s8 }
 0x52e   : > { %2852 = vrot.lane.b32.xlu1 %v5104_v52, %s4563_s9  ;;  %2854 = vrot.lane.b32.xlu0 %v5106_v57, %s4563_s9 }
 0x532   : > { %2957 = vrot.lane.b32.xlu1 %v5104_v52, %s4564_s13  ;;  %2959 = vrot.lane.b32.xlu0 %v5106_v57, %s4564_s13  ;;  %s4573_s13 = smov [#allocation2]  }
 0x536   : > { %2084 = vrot.lane.b32.xlu1 %v5034_v15, %s4565_s14  ;;  %2086 = vrot.lane.b32.xlu0 %v5036_v16, %s4565_s14  ;;  %s4487_s14 = sshll.u32 %s4573_s13, 4  ;;  %s4488_s14 = int_to_ptr.vmem [resolvable:$false] %s4487_s14 }
 0x53a   : > { %2185 = vrot.lane.b32.xlu1 %v5034_v15, %s4566_s15  ;;  %2187 = vrot.lane.b32.xlu0 %v5036_v16, %s4566_s15  ;;  %s4489_s15 = scalar_lea.vmem %s4488_s14, 1024 }
 0x53e   : > { %3142 = vrot.lane.b32.xlu1 %v5104_v52, %s4567_s16  ;;  %3144 = vrot.lane.b32.xlu0 %v5106_v57, %s4567_s16 }
 0x542   : > { %2292 = vrot.lane.b32.xlu1 %v5034_v15, %s4568_s17  ;;  %2294 = vrot.lane.b32.xlu0 %v5036_v16, %s4568_s17  ;;  %s269_s17 = sand.u32 1, %s4537_s25  }
 0x546   : > { %3243 = vrot.lane.b32.xlu1 %v5104_v52, %s4569_s18  ;;  %3245 = vrot.lane.b32.xlu0 %v5106_v57, %s4569_s18  ;;  %s4116_s18 = sshll.u32 %s269_s17, 5 }
 0x54a   : > { %2393 = vrot.lane.b32.xlu1 %v5034_v15, %s4570_s19  ;;  %2395 = vrot.lane.b32.xlu0 %v5036_v16, %s4570_s19  ;;  %s4314_s19 = sshll.u32 %s4636_s28, 9  ;;  %s5835_s28 = scalar_lea.sflag [#allocation3], %s269_s17 }
 0x54b   : > { %s5831_s8 = scalar_lea.hbm %s5884_s7, %s4314_s19 }
 0x54e   : > { %3350 = vrot.lane.b32.xlu1 %v5104_v52, %s4571_s20  ;;  %3352 = vrot.lane.b32.xlu0 %v5106_v57, %s4571_s20  ;;  %s271_s20 = scalar_lea.vmem [#allocation2], %s4116_s18 }
 0x552   : > { %3451 = vrot.lane.b32.xlu1 %v5104_v52, %s4572_s21  ;;  %3453 = vrot.lane.b32.xlu0 %v5106_v57, %s4572_s21  ;;  %s4050_s21 = sshll.u32 %s271_s20, 4  ;;  %s5833_s21 = int_to_ptr.vmem [resolvable:$true] %s4050_s21 }
 0x553   : > { %s4483_s9 = scalar_lea.vmem %s5833_s21, 512  ;;  %p4490_p0 = scmp.lt.s32.totalorder %s5833_s21, %s4488_s14 }
 0x554   : > { %p4484_p11 = scmp.ne.s32.totalorder %s5833_s21, %s4483_s9  ;;  %p4491_p1 = scmp.lt.s32.totalorder %s4489_s15, %s4483_s9 }
 0x556   : > { %298 = vperm.xlu1 %4446, %v295_v55   ;;  %1440 = vperm.xlu0 %4445, %v1437_v56   ;;  %p4485_p12 = pnand %p4484_p11, %p4653_p5  ;;  %p4492_p2 = por %p4491_p1, %p4490_p0 }
 0x558   : > { %p4486_p13 = pneg %p4485_p12 }
 0x55a   : > { %2498 = vperm.xlu1 %4446, %v4229_v59   ;;  %3556 = vperm.xlu0 %4445, %v4285_v60   ;;  %p4493_p3 = pnand %p4492_p2, %p4486_p13 }
 0x590   : > { %v2674_v7 = vpop.permute.xlu1 %2673  ;;  %v2676_v8 = vpop.permute.xlu0 %2675 }
 0x591   : > { %v2678_v10 = vsel %vm2677_vm2, %v2674_v7, %v2676_v8  ;;  %v2679_v11 = vsel %vm2677_vm2, %v2676_v8, %v2674_v7  ;;  %vm5984_vm2 = vcmp.ge.f32.partialorder %v4740_v54, 6.0 }
 0x592   : > { %v2688_v12 = vmul.f32 %v4236_v5, %v2678_v10  ;;  %v2689_v13 = vmul.f32 %v4237_v6, %v2679_v11  ;;  %vm5244_vm11 = vmand %vm5985_vm4, %vm5984_vm2  ;;  %v4197_v6 = vld [vmem:[%s5880_s3 + $0x30] sm:$0xf]  ;;  %v4213_v10 = vld [vmem:[%s5880_s3 + $0x3c] sm:$0xf] }
 0x593   : > { %vm5261_vm2 = vmand %vm5154_vm13, %vm5917_vm1 }
 0x594   : > { %v1795_v23 = vpop.permute.xlu1 %1794  ;;  %4239 = vmatprep.subr.msk.mxu0 %vm5988_vm8, %v2689_v13  ;;  %v1797_v24 = vpop.permute.xlu0 %1796  ;;  %vm5915_vm8 = vcmp.le.f32.partialorder %v4738_v53, 6.0  ;;  %vm5290_vm13 = vmand %vm5158_vm3, %vm5914_vm10  ;;  %vm1903_vm10 = vcmp.lt.s32.totalorder %v4728_v41, 6 }
 0x595   : > { %v1799_v26 = vsel %vm1798_vm12, %v1795_v23, %v1797_v24  ;;  %v1800_v27 = vsel %vm1798_vm12, %v1797_v24, %v1795_v23  ;;  %4240 = vmatpush1.msk.msra.mxu0 %vm5992_vm9, %v2688_v12  ;;  %vm5996_vm12 = vcmp.le.f32.partialorder %v4740_v54, 21.0  ;;  %vm6004_vm3 = vmmov %vm6001_vm0 }
 0x596   : > { %v1813_v58 = vmul.f32 %v4189_v19, %v1800_v27  ;;  %v1814_v61 = vmul.f32 %v4190_v20, %v1799_v26  ;;  %4241 = vmatmul.mubr.msk.f32.vlgmr.msra.gmra.mrb[6].mxu0 %vm5995_vm7, %v4238_v21  ;;  %vm5272_vm9 = vmand %vm5244_vm11, %vm5996_vm12  ;;  %vm6005_vm7 = vcmp.ge.f32.partialorder %v4738_v53, 9.0 }
 0x597   : > { %2845 = vmatprep.mubr.f32.mxu0 %v4547_v0  ;;  %vm5300_vm11 = vmand %vm5261_vm2, %vm5915_vm8  ;;  %vm6007_vm2 = vcmp.ge.f32.partialorder %v4740_v54, 9.0  ;;  %v4196_v46 = vsel %vm5272_vm9, 1.0, %v4547_v0  ;;  %vm6011_vm9 = vcmp.le.f32.partialorder %v4738_v53, 24.0 }
 0x598   : > { %v2645_v38 = vpop.permute.xlu1 %2644  ;;  %4192 = vmatprep.subr.msk.mxu1 %vm6001_vm0, %v1814_v61  ;;  %v2647_v39 = vpop.permute.xlu0 %2646  ;;  %vm2964_vm12 = vmand %vm5981_vm6, %vm6005_vm7  ;;  %vm6006_vm0 = vcmask 31744   ;;  %v4245_v2 = vsel %vm5300_vm11, 1.0, %v4547_v0  ;;  %vm2192_vm11 = vcmp.ge.f32.partialorder %v4732_v49, -6.0 }
 0x599   : > { %v2649_v42 = vsel %vm2648_vm15, %v2645_v38, %v2647_v39  ;;  %v2650_v43 = vsel %vm2648_vm15, %v2647_v39, %v2645_v38  ;;  %4193 = vmatpush1.msk.msra.mxu1 %vm6004_vm3, %v1813_v58  ;;  %vm2965_vm8 = vmand %vm5985_vm4, %vm6007_vm2  ;;  %vm2193_vm2 = vcmp.ge.f32.partialorder %v4734_v50, -6.0 }
 0x59a   : > { %v2669_v37 = vmul.f32 %v4233_v31, %v2649_v42  ;;  %v2670_v44 = vmul.f32 %v4234_v4, %v2650_v43  ;;  %4194 = vmatmul.mubr.msk.f32.vlgmr.msra.gmra.mrb[4].mxu1 %vm6006_vm0, %v4191_v34  ;;  %vm5328_vm15 = vmand %vm5290_vm13, %vm5916_vm14  ;;  %vm6015_vm13 = vcmp.le.f32.partialorder %v4740_v54, 24.0  ;;  %vm6029_vm14 = vcmp.le.f32.partialorder %v4738_v53, 9.0  ;;  %v4201_v31 = vld [vmem:[%s5880_s3 + $0x34] sm:$0xf] }
 0x59b   : > { %1991 = vmatprep.mubr.f32.mxu1 %v4547_v0  ;;  %vm6010_vm5 = vmmov %vm6004_vm3  ;;  %v4246_v5 = vsel %vm5328_vm15, 1.0, %v4547_v0  ;;  %vm6025_vm15 = vcmask 1043456   ;;  %v4253_v43 = vld [vmem:[%s5880_s3 + $0x54] sm:$0xf] }
 0x59c   : > { %v1900_v36 = vpop.permute.xlu1 %1899  ;;  %4242 = vmatprep.subr.msk.mxu0 %vm6010_vm5, %v2670_v44  ;;  %v1902_v51 = vpop.permute.xlu0 %1901  ;;  %vm5336_vm3 = vmand %vm2964_vm12, %vm6011_vm9  ;;  %vm6018_vm12 = vcmask 31744   ;;  %vm2856_vm9 = vcmp.lt.s32.totalorder %v4728_v41, 7 }
 0x59d   : > { %v1904_v56 = vsel %vm1903_vm10, %v1900_v36, %v1902_v51  ;;  %v1905_v59 = vsel %vm1903_vm10, %v1902_v51, %v1900_v36  ;;  %vm6014_vm7 = vmmov %vm6010_vm5  ;;  %vm2195_vm5 = vcmp.le.f32.partialorder %v4734_v50, 9.0  ;;  %vm6019_vm10 = vcmp.ge.f32.partialorder %v4738_v53, -6.0 }
 0x59e   : > { %4243 = vmatpush1.msk.msra.mxu0 %vm6014_vm7, %v2669_v37  ;;  %vm5343_vm0 = vmand %vm2965_vm8, %vm6015_vm13  ;;  %v1914_v62 = vmul.f32 %v4195_v45, %v1905_v59  ;;  %v1915_v63 = vmul.f32 %v4196_v46, %v1904_v56  ;;  %vm6022_vm8 = vcmp.ge.f32.partialorder %v4740_v54, -6.0  ;;  %v4251_v21 = vsel %vm5336_vm3, 1.0, %v4547_v0  ;;  %v4207_v59 = vld [vmem:[%s5880_s3 + $0x38] sm:$0xf] }
 0x59f   : > { %4244 = vmatmul.mubr.msk.f32.vlgmr.msra.gmra.mrb[6].mxu0 %vm6018_vm12, %v4235_v47  ;;  %vm5355_vm7 = vmand %vm5981_vm6, %vm6019_vm10  ;;  %vm2194_vm12 = vcmp.le.f32.partialorder %v4732_v49, 9.0  ;;  %v4252_v22 = vsel %vm5343_vm0, 1.0, %v4547_v0  ;;  %vm6039_vm3 = vcmp.le.f32.partialorder %v4740_v54, 9.0 }
 0x5a0   : > { %2948 = vmatprep.mubr.f32.mxu0 %v4547_v0  ;;  %vm5373_vm13 = vmand %vm5985_vm4, %vm6022_vm8  ;;  %v2853_v8 = vpop.permute.xlu1 %2852  ;;  %4198 = vmatprep.subr.msk.mxu1 %vm6025_vm15, %v1915_v63  ;;  %v2855_v9 = vpop.permute.xlu0 %2854 }
 0x5a1   : > { %vm5384_vm10 = vmand %vm2193_vm2, %vm2195_vm5  ;;  %v2857_v11 = vsel %vm2856_vm9, %v2853_v8, %v2855_v9  ;;  %v2858_v12 = vsel %vm2856_vm9, %v2855_v9, %v2853_v8  ;;  %vm2961_vm5 = vcmp.lt.s32.totalorder %v4728_v41, 9  ;;  %v4257_v8 = vld [vmem:[%s5880_s3 + $0x58] sm:$0xf] }
 0x5a2   : > { %vm6028_vm8 = vmmov %vm6025_vm15  ;;  %v2871_v18 = vmul.f32 %v4245_v2, %v2857_v11  ;;  %v2872_v19 = vmul.f32 %v4246_v5, %v2858_v12  ;;  %vm6032_vm15 = vcmask 31744  }
 0x5a3   : > { %4199 = vmatpush1.msk.msra.mxu1 %vm6028_vm8, %v1914_v62  ;;  %vm5393_vm1 = vmand %vm5355_vm7, %vm6029_vm14  ;;  %vm6037_vm7 = vcmp.ge.f32.partialorder %v4740_v54, 6.0 }
 0x5a4   : > { %4200 = vmatmul.mubr.msk.f32.vlgmr.msra.gmra.mrb[4].mxu1 %vm6032_vm15, %v4197_v6  ;;  %vm6033_vm2 = vmmov %vm6028_vm8  ;;  %v2960_v23 = vpop.permute.xlu0 %2959  ;;  %vm6041_vm15 = vcmp.ge.f32.partialorder %v4738_v53, 6.0  ;;  %v4205_v61 = vsel %vm5393_vm1, 1.0, %v4547_v0 }
 0x5a5   : > { %4202 = vmatprep.subr.msk.mxu1 %vm6033_vm2, %v5036_v16  ;;  %vm5403_vm9 = vmand %vm2192_vm11, %vm2194_vm12  ;;  %v4247_v16 = vld [vmem:[%s5880_s3 + $0x50] sm:$0xf]  ;;  %2075 = vmatprep.mubr.f32.mxu1 %v4547_v0 }
 0x5a6   : > { %vm6036_vm14 = vmmov %vm6033_vm2 }
 0x5a7   : > { %4203 = vmatpush1.msk.msra.mxu1 %vm6036_vm14, %v5034_v15  ;;  %vm2199_vm11 = vmand %vm5384_vm10, %vm6037_vm7  ;;  %v2958_v15 = vpop.permute.xlu1 %2957  ;;  %vm6044_vm14 = vcmask 31744   ;;  %vm2088_vm7 = vcmp.lt.s32.totalorder %v4728_v41, 122 }
 0x5a8   : > { %vm6038_vm12 = vmmov %vm6033_vm2  ;;  %v2962_v24 = vsel %vm2961_vm5, %v2958_v15, %v2960_v23  ;;  %v2963_v25 = vsel %vm2961_vm5, %v2960_v23, %v2958_v15  ;;  %vm6048_vm5 = vcmp.ge.f32.partialorder %v4738_v53, -9.0  ;;  %v2087_v34 = vpop.permute.xlu0 %2086 }
 0x5a9   : > { %4248 = vmatprep.subr.msk.mxu0 %vm6038_vm12, %v2872_v19  ;;  %vm2094_vm0 = vmand %vm5373_vm13, %vm6039_vm3  ;;  %v2972_v27 = vmul.f32 %v4251_v21, %v2963_v25  ;;  %v2973_v28 = vmul.f32 %v4252_v22, %v2962_v24  ;;  %vm6045_vm13 = vcmp.le.f32.partialorder %v4740_v54, 21.0 }
 0x5aa   : > { %vm6040_vm8 = vmmov %vm6033_vm2  ;;  %v4206_v30 = vsel %vm2094_vm0, 1.0, %v4547_v0 }
 0x5ab   : > { %4249 = vmatpush1.msk.msra.mxu0 %vm6040_vm8, %v2871_v18  ;;  %vm5433_vm2 = vmand %vm5403_vm9, %vm6041_vm15  ;;  %v2085_v4 = vpop.permute.xlu1 %2084  ;;  %vm6052_vm15 = vcmp.le.f32.partialorder %v4738_v53, 21.0 }
 0x5ac   : > { %4250 = vmatmul.mubr.msk.f32.vlgmr.msra.gmra.mrb[6].mxu0 %vm6044_vm14, %v4247_v16  ;;  %vm5441_vm12 = vmand %vm2199_vm11, %vm6045_vm13  ;;  %v2089_v35 = vsel %vm2088_vm7, %v2085_v4, %v2087_v34  ;;  %v2090_v38 = vsel %vm2088_vm7, %v2087_v34, %v2085_v4  ;;  %vm6057_vm7 = vcmp.le.f32.partialorder %v4738_v53, 6.0  ;;  %v2188_v44 = vpop.permute.xlu0 %2187 }
 0x5ad   : > { %3049 = vmatprep.mubr.f32.mxu0 %v4547_v0  ;;  %vm3149_vm11 = vmand %vm5981_vm6, %vm6048_vm5  ;;  %v2099_v39 = vmul.f32 %v4205_v61, %v2089_v35  ;;  %v2100_v40 = vmul.f32 %v4206_v30, %v2090_v38  ;;  %vm6055_vm6 = vcmask 31744   ;;  %v4212_v42 = vsel %vm5441_vm12, 1.0, %v4547_v0  ;;  %v4263_v61 = vld [vmem:[%s5880_s3 + $0x5c] sm:$0xf] }
 0x5ae   : > { %vm6049_vm3 = vmmov %vm6040_vm8  ;;  %vm6050_vm8 = vcmp.ge.f32.partialorder %v4740_v54, -9.0  ;;  %4204 = vmatmul.mubr.msk.f32.vlgmr.msra.gmra.mrb[4].mxu1 %vm6055_vm6, %v4201_v31  ;;  %vm6063_vm12 = vcmp.ge.f32.partialorder %v4740_v54, 0.0  ;;  %vm6067_vm6 = vcmp.ge.f32.partialorder %v4738_v53, 0.0 }
 0x5af   : > { %4254 = vmatprep.subr.msk.mxu0 %vm6049_vm3, %v2973_v28  ;;  %vm3150_vm1 = vmand %vm5985_vm4, %vm6050_vm8  ;;  %vm2189_vm4 = vcmp.lt.s32.totalorder %v4728_v41, 38  ;;  %2176 = vmatprep.mubr.f32.mxu1 %v4547_v0  ;;  %vm3253_vm8 = vcmp.le.f32.partialorder %v4734_v50, 6.0  ;;  %v2186_v37 = vpop.permute.xlu1 %2185 }
 0x5b0   : > { %vm6051_vm0 = vmmov %vm6049_vm3  ;;  %v2191_v46 = vsel %vm2189_vm4, %v2188_v44, %v2186_v37  ;;  %v2190_v36 = vsel %vm2189_vm4, %v2186_v37, %v2188_v44 }
 0x5b1   : > { %4255 = vmatpush1.msk.msra.mxu0 %vm6051_vm0, %v2972_v27  ;;  %vm5467_vm14 = vmand %vm5433_vm2, %vm6052_vm15  ;;  %vm6060_vm2 = vcmp.le.f32.partialorder %v4740_v54, 6.0  ;;  %4208 = vmatprep.subr.msk.mxu1 %vm6051_vm0, %v2100_v40  ;;  %v2207_v51 = vmul.f32 %v4212_v42, %v2191_v46 }
 0x5b2   : > { %vm6056_vm13 = vmmov %vm6051_vm0  ;;  %v4211_v48 = vsel %vm5467_vm14, 1.0, %v4547_v0  ;;  %vm6074_vm14 = vcmp.le.f32.partialorder %v4740_v54, 15.0 }
 0x5b3   : > { %4258 = vmatprep.subr.msk.mxu0 %vm6056_vm13, %v5106_v57  ;;  %vm5477_vm5 = vmand %vm3149_vm11, %vm6057_vm7  ;;  %vm3251_vm11 = vcmp.ge.f32.partialorder %v4734_v50, -9.0  ;;  %vm3250_vm7 = vcmp.ge.f32.partialorder %v4732_v49, -9.0  ;;  %v3143_v60 = vpop.permute.xlu1 %3142  ;;  %v2206_v63 = vmul.f32 %v4211_v48, %v2190_v36  ;;  %v4269_v48 = vld [vmem:[%s5880_s3 + $0x60] sm:$0xf] }
 0x5b4   : > { %vm5489_vm3 = vmand %vm3150_vm1, %vm6060_vm2  ;;  %vm3252_vm2 = vcmp.le.f32.partialorder %v4732_v49, 6.0  ;;  %v4261_v5 = vsel %vm5477_vm5, 1.0, %v4547_v0  ;;  %vm6086_vm5 = vcmp.ge.f32.partialorder %v4738_v53, 9.0 }
 0x5b5   : > { %vm5501_vm15 = vmand %vm5384_vm10, %vm6063_vm12  ;;  %vm3146_vm12 = vcmp.lt.s32.totalorder %v4728_v41, 119  ;;  %v4262_v56 = vsel %vm5489_vm3, 1.0, %v4547_v0 }
 0x5b6   : > { %vm6066_vm1 = vmmov %vm6051_vm0  ;;  %vm6070_vm0 = vcmask 31744  }
 0x5b7   : > { %4209 = vmatpush1.msk.msra.mxu1 %vm6066_vm1, %v2099_v39  ;;  %vm5512_vm13 = vmand %vm5403_vm9, %vm6067_vm6  ;;  %4256 = vmatmul.mubr.msk.f32.vlgmr.msra.gmra.mrb[6].mxu0 %vm6070_vm0, %v4253_v43  ;;  %vm6073_vm6 = vcmask 1043456   ;;  %v2293_v9 = vpop.permute.xlu1 %2292 }
 0x5b8   : > { %vm5529_vm1 = vmand %vm3251_vm11, %vm3253_vm8  ;;  %4259 = vmatpush1.msk.msra.mxu0 %vm6073_vm6, %v5104_v52  ;;  %3133 = vmatprep.mubr.f32.mxu0 %v4547_v0  ;;  %v3145_v52 = vpop.permute.xlu0 %3144  ;;  %vm6080_vm8 = vcmp.ge.f32.partialorder %v4740_v54, 9.0 }
 0x5b9   : > { %vm5545_vm4 = vmand %vm5501_vm15, %vm6074_vm14  ;;  %v3148_v1 = vsel %vm3146_vm12, %v3145_v52, %v3143_v60  ;;  %v3147_v6 = vsel %vm3146_vm12, %v3143_v60, %v3145_v52 }
 0x5ba   : > { %vm6077_vm11 = vmmov %vm6073_vm6  ;;  %v3158_v49 = vmul.f32 %v4262_v56, %v3148_v1  ;;  %v4218_v7 = vsel %vm5545_vm4, 1.0, %v4547_v0  ;;  %v3157_v12 = vmul.f32 %v4261_v5, %v3147_v6 }
 0x5bb   : > { %4214 = vmatprep.subr.msk.mxu1 %vm6077_vm11, %v2207_v51  ;;  %vm5555_vm3 = vmand %vm3250_vm7, %vm3252_vm2  ;;  %vm2296_vm2 = vcmp.lt.s32.totalorder %v4728_v41, 32  ;;  %v3244_v15 = vpop.permute.xlu1 %3243 }
 0x5bc   : > { %vm5563_vm15 = vmand %vm5529_vm1, %vm6080_vm8  ;;  %4264 = vmatprep.subr.msk.mxu0 %vm6077_vm11, %v3158_v49  ;;  %v2295_v11 = vpop.permute.xlu0 %2294  ;;  %vm6088_vm8 = vcmp.ge.f32.partialorder %v4740_v54, -6.0 }
 0x5bd   : > { %vm6083_vm7 = vmmov %vm6070_vm0  ;;  %vm6084_vm0 = vcmp.le.f32.partialorder %v4738_v53, 15.0  ;;  %v2298_v13 = vsel %vm2296_vm2, %v2295_v11, %v2293_v9  ;;  %v2297_v21 = vsel %vm2296_vm2, %v2293_v9, %v2295_v11 }
 0x5be   : > { %4210 = vmatmul.mubr.msk.f32.vlgmr.msra.gmra.mrb[4].mxu1 %vm6083_vm7, %v4207_v59  ;;  %vm2301_vm6 = vmand %vm5512_vm13, %vm6084_vm0  ;;  %vm6087_vm13 = vcmp.le.f32.partialorder %v4740_v54, 24.0  ;;  %v2308_v22 = vmul.f32 %v4218_v7, %v2298_v13  ;;  %vm6091_vm0 = vcmask 31744   ;;  %v4225_v59 = vld [vmem:[%s5880_s3 + $0x44] sm:$0xf] }
 0x5bf   : > { %vm6085_vm14 = vmmov %vm6077_vm11  ;;  %2283 = vmatprep.mubr.f32.mxu1 %v4547_v0  ;;  %v4217_v19 = vsel %vm2301_vm6, 1.0, %v4547_v0  ;;  %4260 = vmatmul.mubr.msk.f32.vlgmr.msra.gmra.mrb[6].mxu0 %vm6091_vm0, %v4257_v8  ;;  %v2394_v31 = vpop.permute.xlu1 %2393 }
 0x5c0   : > { %4215 = vmatpush1.msk.msra.mxu1 %vm6085_vm14, %v2206_v63  ;;  %vm3256_vm12 = vmand %vm5555_vm3, %vm6086_vm5  ;;  %vm3247_vm14 = vcmp.lt.s32.totalorder %v4728_v41, 121  ;;  %4265 = vmatpush1.msk.msra.mxu0 %vm6077_vm11, %v3157_v12  ;;  %v3246_v23 = vpop.permute.xlu0 %3245  ;;  %v2307_v24 = vmul.f32 %v4217_v19, %v2297_v21 }
 0x5c1   : > { %vm3259_vm4 = vmand %vm5563_vm15, %vm6087_vm13  ;;  %vm6092_vm15 = vcmp.le.f32.partialorder %v4738_v53, 24.0  ;;  %3234 = vmatprep.mubr.f32.mxu0 %v4547_v0  ;;  %v3248_v25 = vsel %vm3247_vm14, %v3244_v15, %v3246_v23  ;;  %v3249_v27 = vsel %vm3247_vm14, %v3246_v23, %v3244_v15 }
 0x5c2   : > { %vm5597_vm7 = vmand %vm5384_vm10, %vm6088_vm8  ;;  %v4268_v16 = vsel %vm3259_vm4, 1.0, %v4547_v0  ;;  %vm6093_vm10 = vcmp.ge.f32.partialorder %v4738_v53, -6.0  ;;  %vm6096_vm4 = vcmp.ge.f32.partialorder %v4740_v54, 0.0 }
 0x5c3   : > { %vm3258_vm5 = vmand %vm3256_vm12, %vm6092_vm15  ;;  %vm6095_vm12 = vcmp.le.f32.partialorder %v4740_v54, 9.0  ;;  %v3265_v28 = vmul.f32 %v4268_v16, %v3248_v25  ;;  %v3351_v42 = vpop.permute.xlu1 %3350 }
 0x5c4   : > { %vm2400_vm2 = vmand %vm5403_vm9, %vm6093_vm10  ;;  %v4267_v26 = vsel %vm3258_vm5, 1.0, %v4547_v0  ;;  %vm6102_vm10 = vcmp.ge.f32.partialorder %v4738_v53, 0.0  ;;  %v2396_v4 = vpop.permute.xlu0 %2395 }
 0x5c5   : > { %vm6094_vm6 = vmmov %vm6077_vm11  ;;  %v3264_v34 = vmul.f32 %v4267_v26, %v3249_v27 }
 0x5c6   : > { %4220 = vmatprep.subr.msk.mxu1 %vm6094_vm6, %v2308_v22  ;;  %vm2403_vm13 = vmand %vm5597_vm7, %vm6095_vm12  ;;  %vm6100_vm7 = vcmp.le.f32.partialorder %v4738_v53, 9.0  ;;  %vm6107_vm12 = vcmp.ge.f32.partialorder %v4740_v54, -9.0 }
 0x5c7   : > { %vm5625_vm8 = vmand %vm5529_vm1, %vm6096_vm4  ;;  %v4224_v58 = vsel %vm2403_vm13, 1.0, %v4547_v0 }
 0x5c8   : > { %vm6099_vm9 = vmmov %vm6091_vm0  ;;  %vm2397_vm0 = vcmp.lt.s32.totalorder %v4728_v41, 26  ;;  %v3353_v43 = vpop.permute.xlu0 %3352 }
 0x5c9   : > { %4216 = vmatmul.mubr.msk.f32.vlgmr.msra.gmra.mrb[4].mxu1 %vm6099_vm9, %v4213_v10  ;;  %vm2402_vm15 = vmand %vm2400_vm2, %vm6100_vm7  ;;  %vm6106_vm2 = vcmp.le.f32.partialorder %v4740_v54, 15.0  ;;  %v2399_v35 = vsel %vm2397_vm0, %v2396_v4, %v2394_v31  ;;  %v2398_v14 = vsel %vm2397_vm0, %v2394_v31, %v2396_v4  ;;  %vm6112_vm0 = vcmp.le.f32.partialorder %v4740_v54, 6.0  ;;  %v3452_v54 = vpop.permute.xlu1 %3451 }
 0x5ca   : > { %vm6101_vm11 = vmmov %vm6094_vm6  ;;  %2384 = vmatprep.mubr.f32.mxu1 %v4547_v0  ;;  %v4223_v38 = vsel %vm2402_vm15, 1.0, %v4547_v0  ;;  %v2409_v39 = vmul.f32 %v4224_v58, %v2399_v35 }
 0x5cb   : > { %4221 = vmatpush1.msk.msra.mxu1 %vm6101_vm11, %v2307_v24  ;;  %vm5643_vm14 = vmand %vm5555_vm3, %vm6102_vm10  ;;  %vm6110_vm11 = vcmp.le.f32.partialorder %v4738_v53, 15.0  ;;  %v2408_v57 = vmul.f32 %v4223_v38, %v2398_v14 }
 0x5cc   : > { %vm6105_vm5 = vmmov %vm6094_vm6  ;;  %v3454_v36 = vpop.permute.xlu0 %3453 }
 0x5cd   : > { %4270 = vmatprep.subr.msk.mxu0 %vm6105_vm5, %v3265_v28  ;;  %vm3360_vm6 = vmand %vm5625_vm8, %vm6106_vm2 }
 0x5ce   : > { %vm3459_vm13 = vmand %vm5529_vm1, %vm6107_vm12  ;;  %v4274_v40 = vsel %vm3360_vm6, 1.0, %v4547_v0  ;;  %vm6116_vm6 = vcmp.ge.f32.partialorder %v4738_v53, -9.0 }
 0x5cf   : > { %vm6108_vm4 = vmmov %vm6099_vm9  ;;  %vm3354_vm9 = vcmp.lt.s32.totalorder %v4728_v41, 112 }
 0x5d0   : > { %4266 = vmatmul.mubr.msk.f32.vlgmr.msra.gmra.mrb[6].mxu0 %vm6108_vm4, %v4263_v61  ;;  %vm6109_vm7 = vmmov %vm6105_vm5  ;;  %v3355_v37 = vsel %vm3354_vm9, %v3351_v42, %v3353_v43  ;;  %v3356_v45 = vsel %vm3354_vm9, %v3353_v43, %v3351_v42 }
 0x5d1   : > { %4271 = vmatpush1.msk.msra.mxu0 %vm6109_vm7, %v3264_v34  ;;  %vm3359_vm8 = vmand %vm5643_vm14, %vm6110_vm11  ;;  %3341 = vmatprep.mubr.f32.mxu0 %v4547_v0  ;;  %v3366_v46 = vmul.f32 %v4274_v40, %v3355_v37  ;;  %vm3455_vm14 = vcmp.lt.s32.totalorder %v4728_v41, 103  ;;  %v4281_v41 = vld [vmem:[%s5880_s3 + $0x68] sm:$0xf] }
 0x5d2   : > { %vm6111_vm1 = vmmov %vm6105_vm5  ;;  %v4273_v44 = vsel %vm3359_vm8, 1.0, %v4547_v0  ;;  %v3456_v55 = vsel %vm3455_vm14, %v3452_v54, %v3454_v36  ;;  %v3457_v60 = vsel %vm3455_vm14, %v3454_v36, %v3452_v54 }
 0x5d3   : > { %4226 = vmatprep.subr.msk.mxu1 %vm6111_vm1, %v2409_v39  ;;  %vm3461_vm15 = vmand %vm3459_vm13, %vm6112_vm0  ;;  %v3365_v51 = vmul.f32 %v4273_v44, %v3356_v45 }
 0x5d4   : > { %vm6113_vm10 = vmmov %vm6108_vm4  ;;  %v4280_v47 = vsel %vm3461_vm15, 1.0, %v4547_v0 }
 0x5d5   : > { %4222 = vmatmul.mubr.msk.f32.vlgmr.msra.gmra.mrb[4].mxu1 %vm6113_vm10, %v4219_v17  ;;  %vm6114_vm5 = vmmov %vm6111_vm1  ;;  %v3467_v56 = vmul.f32 %v4280_v47, %v3456_v55  ;;  %v299_v62 = vpop.permute.xlu1 %298  ;;  %v1441_v63 = vpop.permute.xlu0 %1440 }
 0x5d6   : > { %4227 = vmatpush1.msk.msra.mxu1 %vm6114_vm5, %v2408_v57  ;;  %2485 = vmatprep.mubr.f32.mxu1 %v4547_v0  ;;  %vm6115_vm2 = vmmov %vm6111_vm1  ;;  %v372_v1 = vadd.f32 %v5012_v3, %v299_v62  ;;  %v374_v2 = vadd.f32 %v5014_v29, %v299_v62  ;;  %v1443_v5 = vadd.f32 %v1441_v63, %v5016_v32 }
 0x5d7   : > { %4276 = vmatprep.subr.msk.mxu0 %vm6115_vm2, %v3366_v46  ;;  %vm3458_vm12 = vmand %vm5555_vm3, %vm6116_vm6  ;;  %v1444_v6 = vadd.f32 %v1441_v63, %v5018_v33 }
 0x5d8   : > { %vm6117_vm13 = vmmov %vm6108_vm4  ;;  %vm6118_vm4 = vcmp.le.f32.partialorder %v4738_v53, 6.0  ;;  %v4275_v53 = vld [vmem:[%s5880_s3 + $0x64] sm:$0xf] }
 0x5d9   : > { %4272 = vmatmul.mubr.msk.f32.vlgmr.msra.gmra.mrb[6].mxu0 %vm6117_vm13, %v4269_v48  ;;  %vm3460_vm9 = vmand %vm3458_vm12, %vm6118_vm4  ;;  %v2499_v3 = vpop.permute.xlu1 %2498  ;;  %v3557_v18 = vpop.permute.xlu0 %3556 }
 0x5da   : > { %vm6119_vm7 = vmmov %vm6111_vm1  ;;  %3442 = vmatprep.mubr.f32.mxu0 %v4547_v0  ;;  %v4279_v50 = vsel %vm3460_vm9, 1.0, %v4547_v0 }
 0x5db   : > { %4277 = vmatpush1.msk.msra.mxu0 %vm6119_vm7, %v3365_v51  ;;  %vm6120_vm3 = vmmov %vm6111_vm1  ;;  %v3466_v52 = vmul.f32 %v4279_v50, %v3457_v60 }
 0x5dc   : > { %4282 = vmatprep.subr.msk.mxu0 %vm6120_vm3, %v3467_v56  ;;  %vm6121_vm11 = vmmov %vm6113_vm10 }
 0x5dd   : > { %4228 = vmatmul.mubr.msk.f32.vlgmr.msra.gmra.mrb[4].mxu1 %vm6121_vm11, %v4225_v59  ;;  %vm6122_vm8 = vmmov %vm6113_vm10 }
 0x5de   : > { %3669 = vmatprep.mubr.f32.mxu1 %v4547_v0  ;;  %vm6123_vm0 = vmmov %vm6122_vm8 }
 0x5df   : > { %vm6124_vm15 = vmmov %vm6111_vm1 }
 0x5e0   : > { %v377_v49 = vsel %vm6124_vm15, %v372_v1, 0.0  ;;  %vm6125_vm10 = vmmov %vm6111_vm1 }
 0x5e1   : > { %4278 = vmatmul.mubr.msk.f32.vlgmr.msra.gmra.mrb[6].mxu0 %vm6122_vm8, %v4275_v53  ;;  %v378_v7 = vsel %vm6125_vm10, %v374_v2, 0.0  ;;  %vm6126_vm14 = vmmov %vm6111_vm1 }
 0x5e2   : > { %4283 = vmatpush1.msk.msra.mxu0 %vm6111_vm1, %v3466_v52  ;;  %3543 = vmatprep.mubr.f32.mxu0 %v4547_v0  ;;  %v1445_v8 = vsel %vm6126_vm14, %v1443_v5, 0.0  ;;  %vm6127_vm5 = vmmov %vm6111_vm1  ;;  %v379_v11 = vadd.f32 %v378_v7, %v377_v49 }
 0x5e3   : > { %v1446_v9 = vsel %vm6127_vm5, %v1444_v6, 0.0  ;;  %vm6128_vm2 = vmmov %vm6111_vm1 }
 0x5e4   : > { %v1447_v12 = vadd.f32 %v1446_v9, %v1445_v8  ;;  %380 = vadd.xlane.f32.xlu1 %v379_v11  ;;  %vm6129_vm6 = vmmov %vm6111_vm1 }
 0x5e5   : > { %vm6130_vm12 = vmmov %vm6111_vm1 }
 0x5e6   : > { %1448 = vadd.xlane.f32.xlu0 %v1447_v12  ;;  %vm6131_vm13 = vmmov %vm6111_vm1 }
 0x5e7   : > { %vm6132_vm4 = vmmov %vm6111_vm1 }
 0x5e8   : > { %vm6133_vm9 = vmmov %vm6111_vm1 }
 0x5e9   : > { %4284 = vmatmul.mubr.msk.f32.vlgmr.msra.gmra.mrb[6].mxu0 %vm6123_vm0, %v4281_v41  ;;  %vm6134_vm7 = vmmov %vm6111_vm1 }
 0x5ea   : > { %vm6135_vm3 = vmmov %vm6111_vm1 }
 0x5eb   : > { %vm6136_vm11 = vmmov %vm6111_vm1 }
 0x5ec   : > { %vm6137_vm8 = vmmov %vm6111_vm1 }
 0x5ed   : > { %vm6138_vm0 = vmmov %vm6111_vm1 }
 0x671   : > { %v381_v29 = vpop.xlane.xlu1 %380 }
 0x672   : > { %v383_v13 = vmul.f32 0.00390625, %v381_v29 }
 0x673   : > { %v1449_v23 = vpop.xlane.xlu0 %1448 }
 0x674   : > { %v5721_v32 = vsub.f32 %v372_v1, %v383_v13  ;;  %v5723_v33 = vsub.f32 %v374_v2, %v383_v13  ;;  %v1450_v26 = vmul.f32 0.00390625, %v1449_v23  ;;  %v3591_v23 = vld [vmem:[%s5882_s5] sm:$0xff] }
 0x676   : > { %v386_v10 = vmul.f32 %v5721_v32, %v5721_v32  ;;  %v387_v15 = vmul.f32 %v5723_v33, %v5723_v33  ;;  %v5733_v61 = vsub.f32 %v1443_v5, %v1450_v26  ;;  %v5735_v30 = vsub.f32 %v1444_v6, %v1450_v26  ;;  %v4291_v26 = vld [vmem:[%s5882_s5 + $0x18] sm:$0xff] }
 0x678   : > { %v388_v27 = vsel %vm6130_vm12, %v386_v10, 0.0  ;;  %v389_v28 = vsel %vm6131_vm13, %v387_v15, 0.0  ;;  %v1453_v38 = vmul.f32 %v5733_v61, %v5733_v61  ;;  %v1454_v14 = vmul.f32 %v5735_v30, %v5735_v30  ;;  %v3590_v15 = vld [vmem:[%s5883_s6 + $0x8] sm:$0xff]  ;;  %vm6142_vm13 = vmmov %vm6138_vm0 }
 0x679   : > { %v390_v58 = vadd.f32 %v389_v28, %v388_v27  ;;  %vm6141_vm12 = vcmask 31744  }
 0x67a   : > { %v1455_v42 = vsel %vm6134_vm7, %v1453_v38, 0.0  ;;  %v1456_v43 = vsel %vm6135_vm3, %v1454_v14, 0.0 }
 0x67b   : > { %v1457_v57 = vadd.f32 %v1456_v43, %v1455_v42 }
 0x6b0   : > { %v2487_v19 = vpop.f32.mrb[4].mxu1 }
 0x6b1   : > { %v2501_v21 = vadd.f32 %v2499_v3, %v2487_v19  ;;  %v2489_v22 = vpop.f32.mrb[5].mxu1 }
 0x6b2   : > { %v2502_v16 = vadd.f32 %v2499_v3, %v2489_v22  ;;  %v3589_v3 = vld [vmem:[%s5883_s6] sm:$0xff] }
 0x6b3   : > { %v2503_v24 = vsel %vm6128_vm2, %v2501_v21, 0.0  ;;  %vm6139_vm2 = vmmov %vm6138_vm0 }
 0x6b4   : > { %v2504_v25 = vsel %vm6129_vm6, %v2502_v16, 0.0  ;;  %vm6140_vm6 = vmmov %vm6138_vm0 }
 0x6b5   : > { %v2505_v20 = vadd.f32 %v2504_v25, %v2503_v24  ;;  %v3592_v25 = vld [vmem:[%s5882_s5 + $0x8] sm:$0xff] }
 0x6b7   : > { %2506 = vadd.xlane.f32.xlu0 %v2505_v20  ;;  %v4290_v20 = vld [vmem:[%s5882_s5 + $0x10] sm:$0xff] }
 0x6bb   : > { %391 = vadd.xlane.f32.xlu0 %v390_v58 }
 0x6bc   : > { %v3545_v31 = vpop.f32.mrb[6].mxu0 }
 0x6bd   : > { %v3559_v4 = vadd.f32 %v3557_v18, %v3545_v31  ;;  %v3547_v34 = vpop.f32.mrb[7].mxu0 }
 0x6be   : > { %v3560_v35 = vadd.f32 %v3557_v18, %v3547_v34 }
 0x6bf   : > { %v3561_v39 = vsel %vm6132_vm4, %v3559_v4, 0.0  ;;  %vm6143_vm4 = vmmov %vm6138_vm0 }
 0x6c0   : > { %v3562_v40 = vsel %vm6133_vm9, %v3560_v35, 0.0  ;;  %vm6144_vm9 = vmmov %vm6141_vm12 }
 0x6c1   : > { %v3563_v17 = vadd.f32 %v3562_v40, %v3561_v39  ;;  %vm6145_vm7 = vmmov %vm6144_vm9 }
 0x6c2   : > { %vm6146_vm3 = vmmov %vm6145_vm7 }
 0x6c3   : > { %3564 = vadd.xlane.f32.xlu1 %v3563_v17 }
 0x6c7   : > { %1458 = vadd.xlane.f32.xlu1 %v1457_v57 }
 0x744   : > { %v2507_v37 = vpop.xlane.xlu0 %2506 }
 0x745   : > { %v2508_v44 = vmul.f32 0.00390625, %v2507_v37 }
 0x747   : > { %v5745_v45 = vsub.f32 %v2501_v21, %v2508_v44  ;;  %v5747_v46 = vsub.f32 %v2502_v16, %v2508_v44 }
 0x748   : > { %v392_v47 = vpop.xlane.xlu0 %391 }
 0x749   : > { %v393_v48 = vmul.f32 0.00390625, %v392_v47  ;;  %v2511_v54 = vmul.f32 %v5745_v45, %v5745_v45  ;;  %v2512_v36 = vmul.f32 %v5747_v46, %v5747_v46  ;;  %v4296_v47 = vld [vmem:[%s5882_s5 + $0x20] sm:$0xff] }
 0x74b   : > { %v394_v51 = vadd.f32 1e-05, %v393_v48  ;;  %v2513_v55 = vsel %vm6136_vm11, %v2511_v54, 0.0  ;;  %v2514_v56 = vsel %vm6137_vm8, %v2512_v36, 0.0  ;;  %v4302_v36 = vld [vmem:[%s5882_s5 + $0x30] sm:$0xff] }
 0x74c   : > { %v2515_v59 = vadd.f32 %v2514_v56, %v2513_v55 }
 0x74d   : > { %4459 = vrsqrt.f32 %v394_v51  ;;  %vm397_vm15 = vcmp.eq.f32.partialorder %v394_v51, inf  ;;  %v400_v9 = vand.u32 2147483648, %v394_v51  ;;  %vm399_vm10 = vcmp.eq.f32.partialorder %v394_v51, 0.0 }
 0x74e   : > { %2516 = vadd.xlane.f32.xlu0 %v2515_v59 }
 0x750   : > { %v3565_v50 = vpop.xlane.xlu1 %3564 }
 0x751   : > { %v3566_v60 = vmul.f32 0.00390625, %v3565_v50 }
 0x753   : > { %v5755_v53 = vsub.f32 %v3559_v4, %v3566_v60  ;;  %v5757_v52 = vsub.f32 %v3560_v35, %v3566_v60 }
 0x754   : > { %v1459_v41 = vpop.xlane.xlu1 %1458 }
 0x755   : > { %v1460_v62 = vmul.f32 0.00390625, %v1459_v41  ;;  %v3569_v63 = vmul.f32 %v5755_v53, %v5755_v53  ;;  %v3570_v1 = vmul.f32 %v5757_v52, %v5757_v52 }
 0x757   : > { %v4460_v2 = vpop.eup %4459  ;;  %v1461_v5 = vadd.f32 1e-05, %v1460_v62  ;;  %v3571_v6 = vsel %vm6111_vm1, %v3569_v63, 0.0  ;;  %v3572_v49 = vsel %vm6138_vm0, %v3570_v1, 0.0 }
 0x758   : > { %v396_v7 = vmul.f32 %v4460_v2, %v394_v51  ;;  %v3573_v8 = vadd.f32 %v3572_v49, %v3571_v6 }
 0x759   : > { %4461 = vrsqrt.f32 %v1461_v5  ;;  %vm1464_vm14 = vcmp.eq.f32.partialorder %v1461_v5, inf  ;;  %v1467_v18 = vand.u32 2147483648, %v1461_v5  ;;  %vm1466_vm5 = vcmp.eq.f32.partialorder %v1461_v5, 0.0 }
 0x75a   : > { %v398_v11 = vsel %vm397_vm15, %v394_v51, %v396_v7  ;;  %3574 = vadd.xlane.f32.xlu1 %v3573_v8  ;;  %vm6147_vm15 = vmmov %vm6139_vm2  ;;  %v4303_v51 = vld [vmem:[%s5882_s5 + $0x38] sm:$0xff] }
 0x75b   : > { %v401_v12 = vsel %vm399_vm10, %v400_v9, %v398_v11  ;;  %vm6148_vm10 = vmmov %vm6139_vm2 }
 0x75c   : > { %4463 = vrcp.f32 %v401_v12 }
 0x763   : > { %v4462_v29 = vpop.eup %4461 }
 0x764   : > { %v1463_v13 = vmul.f32 %v4462_v29, %v1461_v5  ;;  %3684 = vperm.xlu0 %4445, %v3589_v3  }
 0x766   : > { %v4464_v19 = vpop.eup %4463  ;;  %v1465_v21 = vsel %vm1464_vm14, %v1461_v5, %v1463_v13  ;;  %vm6149_vm14 = vmmov %vm6146_vm3 }
 0x767   : > { %v405_v22 = vmul.f32 %v4464_v19, %v5723_v33  ;;  %v404_v16 = vmul.f32 %v4464_v19, %v5721_v32  ;;  %v1468_v10 = vsel %vm1466_vm5, %v1467_v18, %v1465_v21  ;;  %vm6150_vm5 = vmmov %vm6146_vm3 }
 0x768   : > { %4465 = vrcp.f32 %v1468_v10 }
 0x769   : > { %4286 = vmatprep.subr.msk.mxu1 %vm6139_vm2, %v405_v22 }
 0x76a   : > { %4287 = vmatpush1.msk.msra.mxu1 %vm6140_vm6, %v404_v16  ;;  %vm6151_vm6 = vmmov %vm6139_vm2 }
 0x76b   : > { %3689 = vperm.xlu1 %4446, %v3590_v15   ;;  %4288 = vmatmul.mubr.msk.f32.vlgmr.msra.gmra.mrb[6].mxu1 %vm6141_vm12, %v3591_v23  ;;  %vm6152_vm12 = vmmov %vm6146_vm3 }
 0x76c   : > { %3675 = vmatprep.mubr.f32.mxu1 %v4547_v0 }
 0x76f   : > { %4289 = vmatmul.mubr.msk.f32.gmra.mrb[8].mxu1 %vm6144_vm9, %v3592_v25 }
 0x770   : > { %3775 = vmatprep.mubr.f32.mxu1 %v4547_v0 }
 0x772   : > { %v4466_v32 = vpop.eup %4465 }
 0x773   : > { %v1472_v33 = vmul.f32 %v4466_v32, %v5735_v30  ;;  %v1471_v24 = vmul.f32 %v4466_v32, %v5733_v61 }
 0x775   : > { %4292 = vmatprep.subr.msk.mxu1 %vm6142_vm13, %v1472_v33  ;;  %vm6153_vm13 = vmmov %vm6146_vm3 }
 0x776   : > { %4293 = vmatpush1.msk.msra.mxu1 %vm6143_vm4, %v1471_v24 }
 0x777   : > { %4294 = vmatmul.mubr.msk.f32.vlgmr.msra.gmra.mrb[6].mxu1 %vm6145_vm7, %v4290_v20 }
 0x778   : > { %3781 = vmatprep.mubr.f32.mxu1 %v4547_v0 }
 0x77b   : > { %4295 = vmatmul.mubr.msk.f32.gmra.mrb[8].mxu1 %vm6146_vm3, %v4291_v26 }
 0x77c   : > { %3871 = vmatprep.mubr.f32.mxu1 %v4547_v0 }
 0x7db   : > { %v2517_v27 = vpop.xlane.xlu0 %2516 }
 0x7dc   : > { %v2518_v28 = vmul.f32 0.00390625, %v2517_v27 }
 0x7de   : > { %v2519_v58 = vadd.f32 1e-05, %v2518_v28 }
 0x7e0   : > { %4467 = vrsqrt.f32 %v2519_v58  ;;  %vm2522_vm11 = vcmp.eq.f32.partialorder %v2519_v58, inf  ;;  %v2525_v35 = vand.u32 2147483648, %v2519_v58  ;;  %vm2524_vm8 = vcmp.eq.f32.partialorder %v2519_v58, 0.0 }
 0x7e3   : > { %v3685_v55 = vpop.permute.xlu0 %3684 }
 0x7e7   : > { %v3575_v61 = vpop.xlane.xlu1 %3574 }
 0x7e8   : > { %v3576_v30 = vmul.f32 0.00390625, %v3575_v61 }
 0x7ea   : > { %v4468_v31 = vpop.eup %4467  ;;  %v3577_v4 = vadd.f32 1e-05, %v3576_v30 }
 0x7eb   : > { %v2521_v34 = vmul.f32 %v4468_v31, %v2519_v58 }
 0x7ec   : > { %4469 = vrsqrt.f32 %v3577_v4  ;;  %vm3580_vm1 = vcmp.eq.f32.partialorder %v3577_v4, inf  ;;  %v3583_v17 = vand.u32 2147483648, %v3577_v4  ;;  %vm3582_vm0 = vcmp.eq.f32.partialorder %v3577_v4, 0.0 }
 0x7ed   : > { %v2523_v38 = vsel %vm2522_vm11, %v2519_v58, %v2521_v34 }
 0x7ee   : > { %v2526_v14 = vsel %vm2524_vm8, %v2525_v35, %v2523_v38 }
 0x7ef   : > { %4471 = vrcp.f32 %v2526_v14 }
 0x7f6   : > { %v4470_v39 = vpop.eup %4469 }
 0x7f7   : > { %v3579_v40 = vmul.f32 %v4470_v39, %v3577_v4 }
 0x7f9   : > { %v4472_v42 = vpop.eup %4471  ;;  %v3581_v43 = vsel %vm3580_vm1, %v3577_v4, %v3579_v40 }
 0x7fa   : > { %v2530_v57 = vmul.f32 %v4472_v42, %v5747_v46  ;;  %v2529_v37 = vmul.f32 %v4472_v42, %v5745_v45  ;;  %v3584_v44 = vsel %vm3582_vm0, %v3583_v17, %v3581_v43  ;;  %v4297_v46 = vld [vmem:[%s5882_s5 + $0x28] sm:$0xff] }
 0x7fb   : > { %4473 = vrcp.f32 %v3584_v44 }
 0x7fc   : > { %4298 = vmatprep.subr.msk.mxu1 %vm6147_vm15, %v2530_v57 }
 0x7fd   : > { %4299 = vmatpush1.msk.msra.mxu1 %vm6148_vm10, %v2529_v37 }
 0x7fe   : > { %4300 = vmatmul.mubr.msk.f32.vlgmr.msra.gmra.mrb[6].mxu1 %vm6149_vm14, %v4296_v47 }
 0x7ff   : > { %3877 = vmatprep.mubr.f32.mxu1 %v4547_v0 }
 0x802   : > { %4301 = vmatmul.mubr.msk.f32.gmra.mrb[8].mxu1 %vm6150_vm5, %v4297_v46 }
 0x803   : > { %3967 = vmatprep.mubr.f32.mxu1 %v4547_v0 }
 0x805   : > { %v4474_v45 = vpop.eup %4473 }
 0x806   : > { %v3588_v48 = vmul.f32 %v4474_v45, %v5757_v52  ;;  %v3587_v54 = vmul.f32 %v4474_v45, %v5755_v53  ;;  %v3690_v53 = vpop.permute.xlu1 %3689 }
 0x808   : > { %4304 = vmatprep.subr.msk.mxu1 %vm6139_vm2, %v3588_v48 }
 0x809   : > { %4305 = vmatpush1.msk.msra.mxu1 %vm6151_vm6, %v3587_v54 }
 0x80a   : > { %4306 = vmatmul.mubr.msk.f32.vlgmr.msra.gmra.mrb[6].mxu1 %vm6152_vm12, %v4302_v36 }
 0x80b   : > { %3973 = vmatprep.mubr.f32.mxu1 %v4547_v0 }
 0x80e   : > { %4307 = vmatmul.mubr.msk.f32.gmra.mrb[8].mxu1 %vm6153_vm13, %v4303_v51 }
 0x8dd   : > { %v3969_v56 = vpop.f32.mrb[6].mxu1 }
 0x8de   : > { %v4315_v59 = vadd.f32 %v3969_v56, %v3685_v55  ;;  %v3971_v50 = vpop.f32.mrb[7].mxu1 }
 0x8df   : > { %v4316_v60 = vadd.f32 %v3971_v50, %v3685_v55 }
 0x8e1   : > { %v3975_v52 = vpop.f32.mrb[8].mxu1  ;;  %v3984_v41 = vadd.f32 %v4316_v60, %v4315_v59 }
 0x8e2   : > { %v4317_v62 = vadd.f32 %v3975_v52, %v3690_v53  ;;  %v3977_v63 = vpop.f32.mrb[9].mxu1 }
 0x8e3   : > { %v4318_v1 = vadd.f32 %v3977_v63, %v3690_v53  ;;  %3985 = vadd.xlane.f32.xlu1 %v3984_v41 }
 0x8e5   : > { %v3987_v2 = vadd.f32 %v4318_v1, %v4317_v62 }
 0x8e7   : > { %3988 = vadd.xlane.f32.xlu0 %v3987_v2 }
 0x970   : > { %v3986_v0 = vpop.xlane.xlu1 %3985 }
 0x971   : > { %v3990_v5 = vmul.f32 0.00390625, %v3986_v0 }
 0x973   : > { %v3992_v6 = vsub.f32 %v4315_v59, %v3990_v5  ;;  %v3993_v49 = vsub.f32 %v4316_v60, %v3990_v5 }
 0x974   : > { %v3989_v7 = vpop.xlane.xlu0 %3988 }
 0x975   : > { %v3991_v8 = vmul.f32 0.00390625, %v3989_v7  ;;  %v3996_v9 = vmul.f32 %v3992_v6, %v3992_v6  ;;  %v3997_v11 = vmul.f32 %v3993_v49, %v3993_v49 }
 0x977   : > { %v3994_v12 = vsub.f32 %v4317_v62, %v3991_v8  ;;  %v3995_v3 = vsub.f32 %v4318_v1, %v3991_v8  ;;  %v4000_v29 = vadd.f32 %v3997_v11, %v3996_v9 }
 0x979   : > { %4001 = vadd.xlane.f32.xlu0 %v4000_v29  ;;  %v3998_v13 = vmul.f32 %v3994_v12, %v3994_v12  ;;  %v3999_v18 = vmul.f32 %v3995_v3, %v3995_v3 }
 0x97b   : > { %v4003_v19 = vadd.f32 %v3999_v18, %v3998_v13 }
 0x97d   : > { %4004 = vadd.xlane.f32.xlu1 %v4003_v19 }
 0xa06   : > { %v4002_v21 = vpop.xlane.xlu0 %4001 }
 0xa07   : > { %v4006_v22 = vmul.f32 0.00390625, %v4002_v21 }
 0xa09   : > { %v4008_v16 = vadd.f32 1e-05, %v4006_v22 }
 0xa0a   : > { %v4005_v10 = vpop.xlane.xlu1 %4004 }
 0xa0b   : > { %4475 = vrsqrt.f32 %v4008_v16  ;;  %v4007_v15 = vmul.f32 0.00390625, %v4005_v10  ;;  %vm4012_vm4 = vcmp.eq.f32.partialorder %v4008_v16, inf  ;;  %v4015_v24 = vand.u32 2147483648, %v4008_v16 }
 0xa0c   : > { %vm4014_vm9 = vcmp.eq.f32.partialorder %v4008_v16, 0.0 }
 0xa0d   : > { %v4009_v23 = vadd.f32 1e-05, %v4007_v15 }
 0xa0f   : > { %4477 = vrsqrt.f32 %v4009_v23  ;;  %vm4019_vm7 = vcmp.eq.f32.partialorder %v4009_v23, inf  ;;  %v4022_v28 = vand.u32 2147483648, %v4009_v23  ;;  %vm4021_vm3 = vcmp.eq.f32.partialorder %v4009_v23, 0.0 }
 0xa15   : > { %v4476_v32 = vpop.eup %4475 }
 0xa16   : > { %v4011_v33 = vmul.f32 %v4476_v32, %v4008_v16 }
 0xa18   : > { %v4013_v25 = vsel %vm4012_vm4, %v4008_v16, %v4011_v33 }
 0xa19   : > { %v4016_v20 = vsel %vm4014_vm9, %v4015_v24, %v4013_v25  ;;  %v4478_v26 = vpop.eup %4477 }
 0xa1a   : > { %4479 = vrcp.f32 %v4016_v20  ;;  %v4018_v27 = vmul.f32 %v4478_v26, %v4009_v23 }
 0xa1c   : > { %v4020_v58 = vsel %vm4019_vm7, %v4009_v23, %v4018_v27 }
 0xa1d   : > { %v4023_v61 = vsel %vm4021_vm3, %v4022_v28, %v4020_v58 }
 0xa1e   : > { %4481 = vrcp.f32 %v4023_v61 }
 0xa24   : > { %v4480_v30 = vpop.eup %4479 }
 0xa25   : > { %v4028_v31 = vmul.f32 %v4480_v30, %v3992_v6  ;;  %v4029_v4 = vmul.f32 %v4480_v30, %v3993_v49 }
 0xa27   : > { %4032 = vst [vmem:[%s271_s20] sm:$0xff] %v4028_v31  ;;  %4033 = vst [vmem:[%s271_s20 + $0x8] sm:$0xff] %v4029_v4 }
 0xa28   : > { %v4482_v34 = vpop.eup %4481 }
 0xa29   : > { %v4030_v35 = vmul.f32 %v4482_v34, %v3994_v12  ;;  %v4031_v38 = vmul.f32 %v4482_v34, %v3995_v3 }
 0xa2b   : > { %4034 = vst [vmem:[%s271_s20 + $0x10] sm:$0xff] %v4030_v35  ;;  %4035 = vst [vmem:[%s271_s20 + $0x18] sm:$0xff] %v4031_v38 }
 0xa2c   : > { %4496 = shalt.err (!%p4493_p3)
}
 0xa2d   : > { %s4497_s16 = scalar_lea.hbm %s5831_s8, 512  ;;  %s4501_s19 = scalar_lea.hbm %s5884_s7, 1024 }
 0xa2e   : > { %p4498_p4 = scmp.ne.s32.totalorder %s5831_s8, %s4497_s16  ;;  %p4502_p9 = scmp.lt.u32.totalorder %s5831_s8, %s5884_s7 }
 0xa2f   : > { %p4503_p10 = scmp.lt.u32.totalorder %s4501_s19, %s4497_s16  ;;  %p4505_p12 = scmp.lt.u32.totalorder %s4497_s16, %s5831_s8 }
 0xa30   : > { %p4499_p7 = pnand %p4498_p4, %p4653_p5 }
 0xa31   : > { %p4504_p11 = por %p4503_p10, %p4502_p9 }
 0xa32   : > { %p4500_p8 = pneg %p4499_p7 }
 0xa33   : > { %p4506_p13 = por %p4505_p12, %p4504_p11 }
 0xa35   : > { %p4507_p0 = pnand %p4506_p13, %p4500_p8 }
 0xa37   : > { %4510 = shalt.err (!%p4507_p0)
}
 0xa38   : > { %s4574_s29 = smov 256  }
 0xa39   : > { %4379 = dma.vmem_to_hbm [thread:$0]  (%p4653_p5), %s5833_s21, 512, %s5831_s8, %s5835_s28, %s4574_s29, %s4574_s29, %s4559_s22  }
 0xa3a PF: > { %p4385_p1 = scmp.ge.s32.totalorder %s4545_s27, 2  ;;  %s4065_s9 = sand.u32 1, %s4533_s24  }
 0xa3b   : > { %s4066_s13 = scalar_lea.sflag [#allocation3], %s4065_s9 }
 0xa3c   : > { %p4382_p2 = pnand %p4385_p1, %p4657_p6 }
 0xa3e   : > { %4528 = dma.done.wait (!%p4382_p2), %s4066_s13, 512  }
 0xa3f   : > { %4530 = vsyncadd (!%p4382_p2), %s4066_s13, 4294966784  ;;  %p17_p3 = scmp.ge.s32.totalorder %s4640_s30, 4   ;;  %s6154_s24 = smov %s4537_s25 }
 0xa40   : > { %s6155_s25 = smov %s4541_s26  ;;  %s6156_s26 = smov %s4651_s10 }
 0xa41   : > { %s6157_s27 = smov %s4640_s30  ;;  %19 = sbr.rel (!%p17_p3) target bundleno = 3 (0x3), region = 120 }
 0xa48   :  { %4071 = vsyncpa [#allocation3], 1 }
 0xa49   :  { %4073 = vsyncpa [#allocation3 + $0x1], 1 }

</bundles_post_ra>
